<compile_context>
chip_gen: v7x
topology: tpu7x:2x2x1
jax: 0.10.0
libtpu: 0.0.40
codegen_flags: <defaults>
</compile_context>

<pallas_src>
import math
import functools

import jax
import jax.numpy as jnp
from jax import lax
from jax.experimental import pallas as pl
from jax.experimental.pallas import tpu as pltpu

LN_EPS = 1e-5                      # PyTorch LayerNorm default eps
_SQRT2_INV = 1.0 / math.sqrt(2.0)

# Matmul operand dtype. float32 keeps exact parity with the PyTorch reference;
# flip to jnp.bfloat16 on v6e/v7x for ~2x MXU throughput (accumulation stays f32
# via preferred_element_type; LN/softmax/GELU epilogues stay f32 either way).
MM_DTYPE = jnp.float32


# ------------------------------ tiling helpers ------------------------------

def _pick_tile(dim, pref, align):
    """Largest multiple of `align` that divides `dim` and is <= `pref`, else `dim`."""
    if dim <= pref:
        return dim
    t = (pref // align) * align
    while t >= align:
        if dim % t == 0:
            return t
        t -= align
    return dim


# ----------------------------- Pallas kernels ------------------------------

def _linear_kernel(x_ref, w_ref, b_ref, o_ref, acc_ref, *, activation):
    """Tiled  y = act(x @ w + b)  with f32 accumulation over the K grid axis."""
    @pl.when(pl.program_id(2) == 0)
    def _():
        acc_ref[...] = jnp.zeros_like(acc_ref)

    acc_ref[...] += jnp.dot(x_ref[...], w_ref[...],
                            preferred_element_type=jnp.float32)

    @pl.when(pl.program_id(2) == pl.num_programs(2) - 1)
    def _():
        y = acc_ref[...] + b_ref[...].astype(jnp.float32)
        if activation == "gelu":
            # exact GELU (PyTorch activation='gelu' default, erf-based)
            y = 0.5 * y * (1.0 + lax.erf(y * _SQRT2_INV))
        o_ref[...] = y.astype(o_ref.dtype)


def _linear_res_ln_kernel(x_ref, w_ref, b_ref, r_ref, g_ref, beta_ref,
                          o_ref, acc_ref):
    """Tiled  y = LayerNorm(residual + x @ w + b)  — add+LN fused into the epilogue.
    The full output width N stays resident per block (N = n_embd)."""
    @pl.when(pl.program_id(1) == 0)
    def _():
        acc_ref[...] = jnp.zeros_like(acc_ref)

    acc_ref[...] += jnp.dot(x_ref[...], w_ref[...],
                            preferred_element_type=jnp.float32)

    @pl.when(pl.program_id(1) == pl.num_programs(1) - 1)
    def _():
        y = (acc_ref[...] + b_ref[...].astype(jnp.float32)
             + r_ref[...].astype(jnp.float32))
        mean = jnp.mean(y, axis=-1, keepdims=True)
        yc = y - mean
        var = jnp.mean(yc * yc, axis=-1, keepdims=True)
        y = yc * lax.rsqrt(var + LN_EPS)
        o_ref[...] = (y * g_ref[...] + beta_ref[...]).astype(o_ref.dtype)


def _ln_chain_kernel(*refs, n_ln):
    """Apply `n_ln` LayerNorms sequentially in one pass (used for enc_norm and
    dec_norm+ln_f), tiled over rows."""
    x_ref, o_ref = refs[0], refs[-1]
    gb = refs[1:-1]
    y = x_ref[...].astype(jnp.float32)
    for i in range(n_ln):
        g = gb[2 * i][...]
        b = gb[2 * i + 1][...]
        mean = jnp.mean(y, axis=-1, keepdims=True)
        yc = y - mean
        var = jnp.mean(yc * yc, axis=-1, keepdims=True)
        y = yc * lax.rsqrt(var + LN_EPS) * g + b
    o_ref[...] = y.astype(o_ref.dtype)


def _attn_kernel(q_ref, k_ref, v_ref, o_ref, *, n_head, scale):
    """All heads of one (batch, q-tile) block; lane-dense (tq, E) output store."""
    q = q_ref[0].astype(jnp.float32)          # [tq, E]
    k = k_ref[0].astype(jnp.float32)          # [Tk, E]
    v = v_ref[0].astype(jnp.float32)          # [Tk, E]
    dh = q.shape[-1] // n_head
    outs = []
    for h in range(n_head):                   # static unrolled head loop
        qh = q[:, h * dh:(h + 1) * dh]
        kh = k[:, h * dh:(h + 1) * dh]
        vh = v[:, h * dh:(h + 1) * dh]
        # contract on the last axes — no materialized K transpose
        s = lax.dot_general(qh, kh, (((1,), (1,)), ((), ())),
                            preferred_element_type=jnp.float32) * scale
        s = s - jnp.max(s, axis=-1, keepdims=True)
        p = jnp.exp(s)
        p = p * pl.reciprocal(jnp.sum(p, axis=-1, keepdims=True), approx=True)
        outs.append(jnp.dot(p, vh, preferred_element_type=jnp.float32))
    o_ref[0] = jnp.concatenate(outs, axis=-1).astype(o_ref.dtype)


# --------------------------- pallas_call wrappers ---------------------------

def pallas_linear(x2d, w, b, activation=None, *, tm=256, tn=512, tk=512):
    """x2d: [M, K], w: [K, N] (stored [in, out]), b: [N] -> [M, N]."""
    M, K = x2d.shape
    N = w.shape[1]
    out_dtype = x2d.dtype
    tm = _pick_tile(M, tm, 8)
    tn = _pick_tile(N, tn, 128)
    tk = _pick_tile(K, tk, 128)
    kernel = functools.partial(_linear_kernel, activation=activation)
    return pl.pallas_call(
        kernel,
        out_shape=jax.ShapeDtypeStruct((M, N), out_dtype),
        grid=(M // tm, N // tn, K // tk),
        in_specs=[
            pl.BlockSpec((tm, tk), lambda i, j, k: (i, k)),
            pl.BlockSpec((tk, tn), lambda i, j, k: (k, j)),
            pl.BlockSpec((1, tn), lambda i, j, k: (0, j)),
        ],
        out_specs=pl.BlockSpec((tm, tn), lambda i, j, k: (i, j)),
        scratch_shapes=[pltpu.VMEM((tm, tn), jnp.float32)],
        compiler_params=pltpu.CompilerParams(
            dimension_semantics=("parallel", "parallel", "arbitrary")),
    )(x2d.astype(MM_DTYPE), w.astype(MM_DTYPE), b.reshape(1, N))


def pallas_linear_res_ln(x2d, w, b, res2d, g, beta, *, tm=256, tk=512):
    """LayerNorm(res + x @ w + b): matmul with fused add+LN epilogue.
    x2d: [M, K], w: [K, N], res2d: [M, N], g/beta/b: [N]."""
    M, K = x2d.shape
    N = w.shape[1]
    tm = _pick_tile(M, tm, 8)
    tk = _pick_tile(K, tk, 128)
    return pl.pallas_call(
        _linear_res_ln_kernel,
        out_shape=jax.ShapeDtypeStruct((M, N), res2d.dtype),
        grid=(M // tm, K // tk),
        in_specs=[
            pl.BlockSpec((tm, tk), lambda i, k: (i, k)),
            pl.BlockSpec((tk, N), lambda i, k: (k, 0)),
            pl.BlockSpec((1, N), lambda i, k: (0, 0)),
            pl.BlockSpec((tm, N), lambda i, k: (i, 0)),
            pl.BlockSpec((1, N), lambda i, k: (0, 0)),
            pl.BlockSpec((1, N), lambda i, k: (0, 0)),
        ],
        out_specs=pl.BlockSpec((tm, N), lambda i, k: (i, 0)),
        scratch_shapes=[pltpu.VMEM((tm, N), jnp.float32)],
        compiler_params=pltpu.CompilerParams(
            dimension_semantics=("parallel", "arbitrary")),
    )(x2d.astype(MM_DTYPE), w.astype(MM_DTYPE), b.reshape(1, N),
      res2d, g.reshape(1, N), beta.reshape(1, N))


def pallas_layernorm_chain(x2d, gb_pairs, *, tm=256):
    """Apply one or more LayerNorms back-to-back in a single kernel.
    x2d: [M, E], gb_pairs: list of (gamma, beta) each [E]."""
    M, E = x2d.shape
    tm = _pick_tile(M, tm, 8)
    n_ln = len(gb_pairs)
    gb_flat = []
    for g, b in gb_pairs:
        gb_flat += [g.reshape(1, E), b.reshape(1, E)]
    in_specs = [pl.BlockSpec((tm, E), lambda i: (i, 0))]
    in_specs += [pl.BlockSpec((1, E), lambda i: (0, 0))] * (2 * n_ln)
    return pl.pallas_call(
        functools.partial(_ln_chain_kernel, n_ln=n_ln),
        out_shape=jax.ShapeDtypeStruct((M, E), x2d.dtype),
        grid=(M // tm,),
        in_specs=in_specs,
        out_specs=pl.BlockSpec((tm, E), lambda i: (i, 0)),
        compiler_params=pltpu.CompilerParams(dimension_semantics=("parallel",)),
    )(x2d, *gb_flat)


def pallas_attention(q, k, v, *, n_head, tq=256):
    """q: [B, Tq, E], k/v: [B, Tk, E] -> [B, Tq, E]. Heads handled inside the
    kernel; grid is (B, Tq-tiles) so both axes are megacore-parallel."""
    B, Tq, E = q.shape
    Tk = k.shape[1]
    scale = 1.0 / math.sqrt(E // n_head)
    tq = _pick_tile(Tq, tq, 8)
    kernel = functools.partial(_attn_kernel, n_head=n_head, scale=scale)
    return pl.pallas_call(
        kernel,
        out_shape=jax.ShapeDtypeStruct((B, Tq, E), q.dtype),
        grid=(B, Tq // tq),
        in_specs=[
            pl.BlockSpec((1, tq, E), lambda b, t: (b, t, 0)),
            pl.BlockSpec((1, Tk, E), lambda b, t: (b, 0, 0)),
            pl.BlockSpec((1, Tk, E), lambda b, t: (b, 0, 0)),
        ],
        out_specs=pl.BlockSpec((1, tq, E), lambda b, t: (b, t, 0)),
        compiler_params=pltpu.CompilerParams(
            dimension_semantics=("parallel", "parallel")),
    )(q, k, v)


# ------------------------------ model (glue) --------------------------------

def _self_attention_core(x, p, n_head):
    """Fused QKV projection + attention.  Output projection is fused with the
    residual+LN by the caller."""
    B, T, E = x.shape
    qkv = pallas_linear(x.reshape(B * T, E), p["w_qkv"], p["b_qkv"])
    qkv = qkv.reshape(B, T, 3 * E)
    q, k, v = qkv[..., :E], qkv[..., E:2 * E], qkv[..., 2 * E:]
    return pallas_attention(q, k, v, n_head=n_head)


def _cross_attention_core(x, mem, p, n_head):
    """Q projection of x + fused KV projection of memory + attention."""
    B, T, E = x.shape
    S = mem.shape[1]
    q = pallas_linear(x.reshape(B * T, E), p["wq"], p["bq"]).reshape(B, T, E)
    kv = pallas_linear(mem.reshape(B * S, E), p["w_kv"], p["b_kv"])
    kv = kv.reshape(B, S, 2 * E)
    k, v = kv[..., :E], kv[..., E:]
    return pallas_attention(q, k, v, n_head=n_head)


def gpt_forward(params, x_ids, memory, *, n_head):
    # token-embedding gather + learned positional embedding (XLA glue, not hot path)
    B, T = x_ids.shape
    E = params["token_emb"].shape[1]
    x = jnp.take(params["token_emb"], x_ids, axis=0) + params["pos_emb"][:, :T, :]

    # nn.Transformer encoder with 0 layers still applies its final LayerNorm to src
    S = memory.shape[1]
    mem = pallas_layernorm_chain(
        memory.reshape(B * S, E),
        [(params["enc_norm_w"], params["enc_norm_b"])]).reshape(B, S, E)

    for layer in params["layers"]:
        # self-attention block (post-norm): out-proj + residual + norm1 fused
        sa = _self_attention_core(x, layer["sa"], n_head)
        x = pallas_linear_res_ln(
            sa.reshape(B * T, E), layer["sa"]["wo"], layer["sa"]["bo"],
            x.reshape(B * T, E), layer["norm1_w"], layer["norm1_b"]
        ).reshape(B, T, E)

        # cross-attention block: out-proj + residual + norm2 fused
        ca = _cross_attention_core(x, mem, layer["ca"], n_head)
        x = pallas_linear_res_ln(
            ca.reshape(B * T, E), layer["ca"]["wo"], layer["ca"]["bo"],
            x.reshape(B * T, E), layer["norm2_w"], layer["norm2_b"]
        ).reshape(B, T, E)

        # feed-forward block: lin1+gelu fused, lin2 + residual + norm3 fused
        h = pallas_linear(x.reshape(B * T, E), layer["lin1_w"], layer["lin1_b"],
                          activation="gelu")
        x = pallas_linear_res_ln(
            h, layer["lin2_w"], layer["lin2_b"],
            x.reshape(B * T, E), layer["norm3_w"], layer["norm3_b"]
        ).reshape(B, T, E)

    # decoder final norm and ln_f fused into one two-LN kernel, then head
    x2d = pallas_layernorm_chain(
        x.reshape(B * T, E),
        [(params["dec_norm_w"], params["dec_norm_b"]),
         (params["ln_f_w"], params["ln_f_b"])])
    y = pallas_linear(x2d, params["head_w"], params["head_b"])
    return y.reshape(B, T, params["head_w"].shape[1])


# ------------------------------ parameter init -------------------------------

def _keygen(key):
    i = 0
    while True:
        i += 1
        yield jax.random.fold_in(key, i)


def init_params(key, n_vocab, n_embd, n_layer, n_head):
    E = n_embd
    d_ff = 4 * E
    kg = _keygen(key)

    def w(din, dout):
        return jax.random.normal(next(kg), (din, dout), jnp.float32) * 0.02

    def zeros(*shape):
        return jnp.zeros(shape, jnp.float32)

    def ones(*shape):
        return jnp.ones(shape, jnp.float32)

    def self_attn_params():
        # nn.MultiheadAttention in_proj fused as [E, 3E] (stored [in, out])
        return dict(w_qkv=w(E, 3 * E), b_qkv=zeros(3 * E),
                    wo=w(E, E), bo=zeros(E))

    def cross_attn_params():
        # Q from tgt, fused K|V from memory
        return dict(wq=w(E, E), bq=zeros(E),
                    w_kv=w(E, 2 * E), b_kv=zeros(2 * E),
                    wo=w(E, E), bo=zeros(E))

    layers = []
    for _ in range(n_layer):
        layers.append(dict(
            sa=self_attn_params(),
            ca=cross_attn_params(),
            norm1_w=ones(E), norm1_b=zeros(E),
            norm2_w=ones(E), norm2_b=zeros(E),
            norm3_w=ones(E), norm3_b=zeros(E),
            lin1_w=w(E, d_ff), lin1_b=zeros(d_ff),
            lin2_w=w(d_ff, E), lin2_b=zeros(E),
        ))

    return dict(
        token_emb=w(n_vocab, E),
        pos_emb=zeros(1, 1024, E),          # nn.Parameter(torch.zeros(1,1024,E))
        enc_norm_w=ones(E), enc_norm_b=zeros(E),
        layers=layers,
        dec_norm_w=ones(E), dec_norm_b=zeros(E),
        ln_f_w=ones(E), ln_f_b=zeros(E),
        head_w=w(E, E), head_b=zeros(E),
    )


# ----------------------------------- main ------------------------------------

if __name__ == "__main__":
    # small, module-consistent hyperparameters (GPT(n_vocab, n_embd, n_layer, n_head))
    n_vocab, n_embd, n_layer, n_head = 64, 128, 2, 4
    B, T, S = 2, 8, 16

    key = jax.random.PRNGKey(0)
    params = init_params(key, n_vocab, n_embd, n_layer, n_head)

    kx, km = jax.random.split(jax.random.fold_in(key, 12345))
    x_ids = jax.random.randint(kx, (B, T), 0, n_vocab, dtype=jnp.int32)   # token ids
    memory = jax.random.normal(km, (B, S, n_embd), dtype=jnp.float32)     # encoder memory

    fwd = jax.jit(gpt_forward, static_argnames=("n_head",))
    y = fwd(params, x_ids, memory, n_head=n_head)
    y = jax.block_until_ready(y)

    assert y.shape == (B, T, n_embd), y.shape
    assert jnp.all(jnp.isfinite(y))
    print("KERNEL_OK")
</pallas_src>

<mosaic_0001>
module attributes {stable_mosaic.version = 11 : i64} {
  func.func @_attn_kernel(%arg0: i32, %arg1: i32, %arg2: memref<1x8x128xf32, #tpu.memory_space<vmem>>, %arg3: memref<1x8x128xf32, #tpu.memory_space<vmem>>, %arg4: memref<1x8x128xf32, #tpu.memory_space<vmem>>, %arg5: memref<1x8x128xf32, #tpu.memory_space<vmem>>) attributes {dimension_semantics = [#tpu.dimension_semantics<parallel>, #tpu.dimension_semantics<parallel>], iteration_bounds = array<i64: 2, 1>, scalar_prefetch = 0 : i64, scratch_operands = 0 : i64, tpu.core_type = #tpu.core_type<tc>, window_params = [{transform_indices = @transform_0, window_bounds = array<i64: 1, 8, 128>}, {transform_indices = @transform_1, window_bounds = array<i64: 1, 8, 128>}, {transform_indices = @transform_2, window_bounds = array<i64: 1, 8, 128>}, {transform_indices = @transform_3, window_bounds = array<i64: 1, 8, 128>}]} {
    %c0 = arith.constant 0 : index
    %c0_0 = arith.constant 0 : index
    %c0_1 = arith.constant 0 : index
    %0 = vector.load %arg2[%c0, %c0_0, %c0_1] : memref<1x8x128xf32, #tpu.memory_space<vmem>>, vector<1x8x128xf32>
    %1 = vector.shape_cast %0 : vector<1x8x128xf32> to vector<8x128xf32>
    %c0_2 = arith.constant 0 : index
    %c0_3 = arith.constant 0 : index
    %c0_4 = arith.constant 0 : index
    %2 = vector.load %arg3[%c0_2, %c0_3, %c0_4] : memref<1x8x128xf32, #tpu.memory_space<vmem>>, vector<1x8x128xf32>
    %3 = vector.shape_cast %2 : vector<1x8x128xf32> to vector<8x128xf32>
    %c0_5 = arith.constant 0 : index
    %c0_6 = arith.constant 0 : index
    %c0_7 = arith.constant 0 : index
    %4 = vector.load %arg4[%c0_5, %c0_6, %c0_7] : memref<1x8x128xf32, #tpu.memory_space<vmem>>, vector<1x8x128xf32>
    %5 = vector.shape_cast %4 : vector<1x8x128xf32> to vector<8x128xf32>
    %6 = vector.extract_strided_slice %1 {offsets = [0, 0], sizes = [8, 32], strides = [1, 1]} : vector<8x128xf32> to vector<8x32xf32>
    %7 = vector.extract_strided_slice %3 {offsets = [0, 0], sizes = [8, 32], strides = [1, 1]} : vector<8x128xf32> to vector<8x32xf32>
    %8 = vector.extract_strided_slice %5 {offsets = [0, 0], sizes = [8, 32], strides = [1, 1]} : vector<8x128xf32> to vector<8x32xf32>
    %cst = arith.constant dense<0.000000e+00> : vector<8x8xf32>
    %9 = tpu.matmul %6, %7, %cst {dimension_numbers = #tpu.dot_dimension_numbers<[1], [1], [0], [0], [0, 0, 1, 0], [], []>} : vector<8x32xf32>, vector<8x32xf32>, vector<8x8xf32> -> vector<8x8xf32>
    %cst_8 = arith.constant 0.176776692 : f32
    %10 = vector.broadcast %cst_8 : f32 to vector<8x8xf32>
    %11 = arith.mulf %9, %10 : vector<8x8xf32>
    %cst_9 = arith.constant dense<0xFF800000> : vector<8xf32>
    %12 = vector.multi_reduction <maximumf>, %11, %cst_9 [1] : vector<8x8xf32> to vector<8xf32>
    %13 = vector.shape_cast %12 : vector<8xf32> to vector<8x1xf32>
    %14 = vector.broadcast %13 : vector<8x1xf32> to vector<8x8xf32>
    %15 = arith.subf %11, %14 : vector<8x8xf32>
    %16 = math.exp %15 : vector<8x8xf32>
    %cst_10 = arith.constant dense<0.000000e+00> : vector<8xf32>
    %17 = vector.multi_reduction <add>, %16, %cst_10 [1] : vector<8x8xf32> to vector<8xf32>
    %18 = vector.shape_cast %17 : vector<8xf32> to vector<8x1xf32>
    %19 = tpu.reciprocal %18 {approx = true} : vector<8x1xf32> -> vector<8x1xf32>
    %20 = vector.broadcast %19 : vector<8x1xf32> to vector<8x8xf32>
    %21 = arith.mulf %16, %20 : vector<8x8xf32>
    %cst_11 = arith.constant dense<0.000000e+00> : vector<8x32xf32>
    %22 = tpu.matmul %21, %8, %cst_11 {dimension_numbers = #tpu.dot_dimension_numbers<[1], [0], [0], [1], [0, 0, 1, 1], [], []>} : vector<8x8xf32>, vector<8x32xf32>, vector<8x32xf32> -> vector<8x32xf32>
    %23 = vector.extract_strided_slice %1 {offsets = [0, 32], sizes = [8, 32], strides = [1, 1]} : vector<8x128xf32> to vector<8x32xf32>
    %24 = vector.extract_strided_slice %3 {offsets = [0, 32], sizes = [8, 32], strides = [1, 1]} : vector<8x128xf32> to vector<8x32xf32>
    %25 = vector.extract_strided_slice %5 {offsets = [0, 32], sizes = [8, 32], strides = [1, 1]} : vector<8x128xf32> to vector<8x32xf32>
    %cst_12 = arith.constant dense<0.000000e+00> : vector<8x8xf32>
    %26 = tpu.matmul %23, %24, %cst_12 {dimension_numbers = #tpu.dot_dimension_numbers<[1], [1], [0], [0], [0, 0, 1, 0], [], []>} : vector<8x32xf32>, vector<8x32xf32>, vector<8x8xf32> -> vector<8x8xf32>
    %cst_13 = arith.constant 0.176776692 : f32
    %27 = vector.broadcast %cst_13 : f32 to vector<8x8xf32>
    %28 = arith.mulf %26, %27 : vector<8x8xf32>
    %cst_14 = arith.constant dense<0xFF800000> : vector<8xf32>
    %29 = vector.multi_reduction <maximumf>, %28, %cst_14 [1] : vector<8x8xf32> to vector<8xf32>
    %30 = vector.shape_cast %29 : vector<8xf32> to vector<8x1xf32>
    %31 = vector.broadcast %30 : vector<8x1xf32> to vector<8x8xf32>
    %32 = arith.subf %28, %31 : vector<8x8xf32>
    %33 = math.exp %32 : vector<8x8xf32>
    %cst_15 = arith.constant dense<0.000000e+00> : vector<8xf32>
    %34 = vector.multi_reduction <add>, %33, %cst_15 [1] : vector<8x8xf32> to vector<8xf32>
    %35 = vector.shape_cast %34 : vector<8xf32> to vector<8x1xf32>
    %36 = tpu.reciprocal %35 {approx = true} : vector<8x1xf32> -> vector<8x1xf32>
    %37 = vector.broadcast %36 : vector<8x1xf32> to vector<8x8xf32>
    %38 = arith.mulf %33, %37 : vector<8x8xf32>
    %cst_16 = arith.constant dense<0.000000e+00> : vector<8x32xf32>
    %39 = tpu.matmul %38, %25, %cst_16 {dimension_numbers = #tpu.dot_dimension_numbers<[1], [0], [0], [1], [0, 0, 1, 1], [], []>} : vector<8x8xf32>, vector<8x32xf32>, vector<8x32xf32> -> vector<8x32xf32>
    %40 = vector.extract_strided_slice %1 {offsets = [0, 64], sizes = [8, 32], strides = [1, 1]} : vector<8x128xf32> to vector<8x32xf32>
    %41 = vector.extract_strided_slice %3 {offsets = [0, 64], sizes = [8, 32], strides = [1, 1]} : vector<8x128xf32> to vector<8x32xf32>
    %42 = vector.extract_strided_slice %5 {offsets = [0, 64], sizes = [8, 32], strides = [1, 1]} : vector<8x128xf32> to vector<8x32xf32>
    %cst_17 = arith.constant dense<0.000000e+00> : vector<8x8xf32>
    %43 = tpu.matmul %40, %41, %cst_17 {dimension_numbers = #tpu.dot_dimension_numbers<[1], [1], [0], [0], [0, 0, 1, 0], [], []>} : vector<8x32xf32>, vector<8x32xf32>, vector<8x8xf32> -> vector<8x8xf32>
    %cst_18 = arith.constant 0.176776692 : f32
    %44 = vector.broadcast %cst_18 : f32 to vector<8x8xf32>
    %45 = arith.mulf %43, %44 : vector<8x8xf32>
    %cst_19 = arith.constant dense<0xFF800000> : vector<8xf32>
    %46 = vector.multi_reduction <maximumf>, %45, %cst_19 [1] : vector<8x8xf32> to vector<8xf32>
    %47 = vector.shape_cast %46 : vector<8xf32> to vector<8x1xf32>
    %48 = vector.broadcast %47 : vector<8x1xf32> to vector<8x8xf32>
    %49 = arith.subf %45, %48 : vector<8x8xf32>
    %50 = math.exp %49 : vector<8x8xf32>
    %cst_20 = arith.constant dense<0.000000e+00> : vector<8xf32>
    %51 = vector.multi_reduction <add>, %50, %cst_20 [1] : vector<8x8xf32> to vector<8xf32>
    %52 = vector.shape_cast %51 : vector<8xf32> to vector<8x1xf32>
    %53 = tpu.reciprocal %52 {approx = true} : vector<8x1xf32> -> vector<8x1xf32>
    %54 = vector.broadcast %53 : vector<8x1xf32> to vector<8x8xf32>
    %55 = arith.mulf %50, %54 : vector<8x8xf32>
    %cst_21 = arith.constant dense<0.000000e+00> : vector<8x32xf32>
    %56 = tpu.matmul %55, %42, %cst_21 {dimension_numbers = #tpu.dot_dimension_numbers<[1], [0], [0], [1], [0, 0, 1, 1], [], []>} : vector<8x8xf32>, vector<8x32xf32>, vector<8x32xf32> -> vector<8x32xf32>
    %57 = vector.extract_strided_slice %1 {offsets = [0, 96], sizes = [8, 32], strides = [1, 1]} : vector<8x128xf32> to vector<8x32xf32>
    %58 = vector.extract_strided_slice %3 {offsets = [0, 96], sizes = [8, 32], strides = [1, 1]} : vector<8x128xf32> to vector<8x32xf32>
    %59 = vector.extract_strided_slice %5 {offsets = [0, 96], sizes = [8, 32], strides = [1, 1]} : vector<8x128xf32> to vector<8x32xf32>
    %cst_22 = arith.constant dense<0.000000e+00> : vector<8x8xf32>
    %60 = tpu.matmul %57, %58, %cst_22 {dimension_numbers = #tpu.dot_dimension_numbers<[1], [1], [0], [0], [0, 0, 1, 0], [], []>} : vector<8x32xf32>, vector<8x32xf32>, vector<8x8xf32> -> vector<8x8xf32>
    %cst_23 = arith.constant 0.176776692 : f32
    %61 = vector.broadcast %cst_23 : f32 to vector<8x8xf32>
    %62 = arith.mulf %60, %61 : vector<8x8xf32>
    %cst_24 = arith.constant dense<0xFF800000> : vector<8xf32>
    %63 = vector.multi_reduction <maximumf>, %62, %cst_24 [1] : vector<8x8xf32> to vector<8xf32>
    %64 = vector.shape_cast %63 : vector<8xf32> to vector<8x1xf32>
    %65 = vector.broadcast %64 : vector<8x1xf32> to vector<8x8xf32>
    %66 = arith.subf %62, %65 : vector<8x8xf32>
    %67 = math.exp %66 : vector<8x8xf32>
    %cst_25 = arith.constant dense<0.000000e+00> : vector<8xf32>
    %68 = vector.multi_reduction <add>, %67, %cst_25 [1] : vector<8x8xf32> to vector<8xf32>
    %69 = vector.shape_cast %68 : vector<8xf32> to vector<8x1xf32>
    %70 = tpu.reciprocal %69 {approx = true} : vector<8x1xf32> -> vector<8x1xf32>
    %71 = vector.broadcast %70 : vector<8x1xf32> to vector<8x8xf32>
    %72 = arith.mulf %67, %71 : vector<8x8xf32>
    %cst_26 = arith.constant dense<0.000000e+00> : vector<8x32xf32>
    %73 = tpu.matmul %72, %59, %cst_26 {dimension_numbers = #tpu.dot_dimension_numbers<[1], [0], [0], [1], [0, 0, 1, 1], [], []>} : vector<8x8xf32>, vector<8x32xf32>, vector<8x32xf32> -> vector<8x32xf32>
    %74 = tpu.concatenate %22, %39, %56, %73 in 1 : vector<8x32xf32>, vector<8x32xf32>, vector<8x32xf32>, vector<8x32xf32> -> vector<8x128xf32>
    %c0_27 = arith.constant 0 : index
    %c0_28 = arith.constant 0 : index
    %c0_29 = arith.constant 0 : index
    %75 = vector.load %arg5[%c0_27, %c0_28, %c0_29] : memref<1x8x128xf32, #tpu.memory_space<vmem>>, vector<1x8x128xf32>
    %76 = vector.shape_cast %75 : vector<1x8x128xf32> to vector<8x128xf32>
    %77 = vector.shape_cast %74 : vector<8x128xf32> to vector<1x8x128xf32>
    tpu.vector_store %arg5[%c0_27, %c0_28, %c0_29], %77 {strides = array<i32>} : memref<1x8x128xf32, #tpu.memory_space<vmem>>, vector<1x8x128xf32>,
    return
  }
  func.func @transform_0(%arg0: i32, %arg1: i32) -> (i32, i32, i32) {
    %c0_i32 = arith.constant 0 : i32
    %c0_i32_0 = arith.constant 0 : i32
    return %arg0, %arg1, %c0_i32 : i32, i32, i32
  }
  func.func @transform_1(%arg0: i32, %arg1: i32) -> (i32, i32, i32) {
    %c0_i32 = arith.constant 0 : i32
    %c0_i32_0 = arith.constant 0 : i32
    %c0_i32_1 = arith.constant 0 : i32
    return %arg0, %c0_i32, %c0_i32_0 : i32, i32, i32
  }
  func.func @transform_2(%arg0: i32, %arg1: i32) -> (i32, i32, i32) {
    %c0_i32 = arith.constant 0 : i32
    %c0_i32_0 = arith.constant 0 : i32
    %c0_i32_1 = arith.constant 0 : i32
    return %arg0, %c0_i32, %c0_i32_0 : i32, i32, i32
  }
  func.func @transform_3(%arg0: i32, %arg1: i32) -> (i32, i32, i32) {
    %c0_i32 = arith.constant 0 : i32
    %c0_i32_0 = arith.constant 0 : i32
    return %arg0, %arg1, %c0_i32 : i32, i32, i32
  }
}

module attributes {stable_mosaic.version = 11 : i64} {
  func.func @_linear_res_ln_kernel(%arg0: i32, %arg1: i32, %arg2: memref<16x128xf32, #tpu.memory_space<vmem>>, %arg3: memref<128x128xf32, #tpu.memory_space<vmem>>, %arg4: memref<1x128xf32, #tpu.memory_space<vmem>>, %arg5: memref<16x128xf32, #tpu.memory_space<vmem>>, %arg6: memref<1x128xf32, #tpu.memory_space<vmem>>, %arg7: memref<1x128xf32, #tpu.memory_space<vmem>>, %arg8: memref<16x128xf32, #tpu.memory_space<vmem>>, %arg9: memref<16x128xf32, #tpu.memory_space<vmem>>) attributes {dimension_semantics = [#tpu.dimension_semantics<parallel>, #tpu.dimension_semantics<arbitrary>], iteration_bounds = array<i64: 1, 1>, scalar_prefetch = 0 : i64, scratch_operands = 1 : i64, tpu.core_type = #tpu.core_type<tc>, window_params = [{transform_indices = @transform_0, window_bounds = array<i64: 16, 128>}, {transform_indices = @transform_1, window_bounds = array<i64: 128, 128>}, {pipeline_mode = #tpu.pipeline_mode<synchronous>, transform_indices = @transform_2, window_bounds = array<i64: 1, 128>}, {transform_indices = @transform_3, window_bounds = array<i64: 16, 128>}, {pipeline_mode = #tpu.pipeline_mode<synchronous>, transform_indices = @transform_4, window_bounds = array<i64: 1, 128>}, {pipeline_mode = #tpu.pipeline_mode<synchronous>, transform_indices = @transform_5, window_bounds = array<i64: 1, 128>}, {transform_indices = @transform_6, window_bounds = array<i64: 16, 128>}]} {
    %c0_i32 = arith.constant 0 : i32
    %0 = arith.cmpi eq, %arg1, %c0_i32 : i32
    %1 = arith.extui %0 : i1 to i32
    %c0_i32_0 = arith.constant 0 : i32
    %2 = arith.cmpi ne, %1, %c0_i32_0 : i32
    scf.if %2 {
      %cst_10 = arith.constant 0.000000e+00 : f32
      %12 = vector.broadcast %cst_10 : f32 to vector<16x128xf32>
      %c0_11 = arith.constant 0 : index
      %c0_12 = arith.constant 0 : index
      %13 = vector.load %arg9[%c0_11, %c0_12] : memref<16x128xf32, #tpu.memory_space<vmem>>, vector<16x128xf32>
      tpu.vector_store %arg9[%c0_11, %c0_12], %12 {strides = array<i32>} : memref<16x128xf32, #tpu.memory_space<vmem>>, vector<16x128xf32>,
    } else {
    }
    %c0 = arith.constant 0 : index
    %c0_1 = arith.constant 0 : index
    %3 = vector.load %arg9[%c0, %c0_1] : memref<16x128xf32, #tpu.memory_space<vmem>>, vector<16x128xf32>
    %c0_2 = arith.constant 0 : index
    %c0_3 = arith.constant 0 : index
    %4 = vector.load %arg2[%c0_2, %c0_3] : memref<16x128xf32, #tpu.memory_space<vmem>>, vector<16x128xf32>
    %c0_4 = arith.constant 0 : index
    %c0_5 = arith.constant 0 : index
    %5 = vector.load %arg3[%c0_4, %c0_5] : memref<128x128xf32, #tpu.memory_space<vmem>>, vector<128x128xf32>
    %cst = arith.constant dense<0.000000e+00> : vector<16x128xf32>
    %6 = tpu.matmul %4, %5, %cst {dimension_numbers = #tpu.dot_dimension_numbers<[1], [0], [0], [1], [0, 0, 1, 1], [], []>} : vector<16x128xf32>, vector<128x128xf32>, vector<16x128xf32> -> vector<16x128xf32>
    %7 = arith.addf %3, %6 : vector<16x128xf32>
    %c0_6 = arith.constant 0 : index
    %c0_7 = arith.constant 0 : index
    %8 = vector.load %arg9[%c0_6, %c0_7] : memref<16x128xf32, #tpu.memory_space<vmem>>, vector<16x128xf32>
    tpu.vector_store %arg9[%c0_6, %c0_7], %7 {strides = array<i32>} : memref<16x128xf32, #tpu.memory_space<vmem>>, vector<16x128xf32>,
    %c0_i32_8 = arith.constant 0 : i32
    %9 = arith.cmpi eq, %arg1, %c0_i32_8 : i32
    %10 = arith.extui %9 : i1 to i32
    %c0_i32_9 = arith.constant 0 : i32
    %11 = arith.cmpi ne, %10, %c0_i32_9 : i32
    scf.if %11 {
      %c0_10 = arith.constant 0 : index
      %c0_11 = arith.constant 0 : index
      %12 = vector.load %arg9[%c0_10, %c0_11] : memref<16x128xf32, #tpu.memory_space<vmem>>, vector<16x128xf32>
      %c0_12 = arith.constant 0 : index
      %c0_13 = arith.constant 0 : index
      %13 = vector.load %arg4[%c0_12, %c0_13] : memref<1x128xf32, #tpu.memory_space<vmem>>, vector<1x128xf32>
      %14 = vector.broadcast %13 : vector<1x128xf32> to vector<16x128xf32>
      %15 = arith.addf %12, %14 : vector<16x128xf32>
      %c0_14 = arith.constant 0 : index
      %c0_15 = arith.constant 0 : index
      %16 = vector.load %arg5[%c0_14, %c0_15] : memref<16x128xf32, #tpu.memory_space<vmem>>, vector<16x128xf32>
      %17 = arith.addf %15, %16 : vector<16x128xf32>
      %cst_16 = arith.constant dense<0.000000e+00> : vector<16xf32>
      %18 = vector.multi_reduction <add>, %17, %cst_16 [1] : vector<16x128xf32> to vector<16xf32>
      %19 = vector.shape_cast %18 : vector<16xf32> to vector<16x1xf32>
      %cst_17 = arith.constant 1.280000e+02 : f32
      %20 = vector.broadcast %cst_17 : f32 to vector<16x1xf32>
      %21 = arith.divf %19, %20 : vector<16x1xf32>
      %22 = vector.broadcast %21 : vector<16x1xf32> to vector<16x128xf32>
      %23 = arith.subf %17, %22 : vector<16x128xf32>
      %24 = arith.mulf %23, %23 : vector<16x128xf32>
      %cst_18 = arith.constant dense<0.000000e+00> : vector<16xf32>
      %25 = vector.multi_reduction <add>, %24, %cst_18 [1] : vector<16x128xf32> to vector<16xf32>
      %26 = vector.shape_cast %25 : vector<16xf32> to vector<16x1xf32>
      %cst_19 = arith.constant 1.280000e+02 : f32
      %27 = vector.broadcast %cst_19 : f32 to vector<16x1xf32>
      %28 = arith.divf %26, %27 : vector<16x1xf32>
      %cst_20 = arith.constant 9.99999974E-6 : f32
      %29 = vector.broadcast %cst_20 : f32 to vector<16x1xf32>
      %30 = arith.addf %28, %29 : vector<16x1xf32>
      %31 = math.rsqrt %30 : vector<16x1xf32>
      %32 = vector.broadcast %31 : vector<16x1xf32> to vector<16x128xf32>
      %33 = arith.mulf %23, %32 : vector<16x128xf32>
      %c0_21 = arith.constant 0 : index
      %c0_22 = arith.constant 0 : index
      %34 = vector.load %arg6[%c0_21, %c0_22] : memref<1x128xf32, #tpu.memory_space<vmem>>, vector<1x128xf32>
      %35 = vector.broadcast %34 : vector<1x128xf32> to vector<16x128xf32>
      %36 = arith.mulf %33, %35 : vector<16x128xf32>
      %c0_23 = arith.constant 0 : index
      %c0_24 = arith.constant 0 : index
      %37 = vector.load %arg7[%c0_23, %c0_24] : memref<1x128xf32, #tpu.memory_space<vmem>>, vector<1x128xf32>
      %38 = vector.broadcast %37 : vector<1x128xf32> to vector<16x128xf32>
      %39 = arith.addf %36, %38 : vector<16x128xf32>
      %c0_25 = arith.constant 0 : index
      %c0_26 = arith.constant 0 : index
      %40 = vector.load %arg8[%c0_25, %c0_26] : memref<16x128xf32, #tpu.memory_space<vmem>>, vector<16x128xf32>
      tpu.vector_store %arg8[%c0_25, %c0_26], %39 {strides = array<i32>} : memref<16x128xf32, #tpu.memory_space<vmem>>, vector<16x128xf32>,
    } else {
    }
    return
  }
  func.func @transform_0(%arg0: i32, %arg1: i32) -> (i32, i32) {
    %c0_i32 = arith.constant 0 : i32
    return %arg0, %arg1 : i32, i32
  }
  func.func @transform_1(%arg0: i32, %arg1: i32) -> (i32, i32) {
    %c0_i32 = arith.constant 0 : i32
    %c0_i32_0 = arith.constant 0 : i32
    return %arg1, %c0_i32 : i32, i32
  }
  func.func @transform_2(%arg0: i32, %arg1: i32) -> (i32, i32) {
    %c0_i32 = arith.constant 0 : i32
    %c0_i32_0 = arith.constant 0 : i32
    %c0_i32_1 = arith.constant 0 : i32
    return %c0_i32, %c0_i32_0 : i32, i32
  }
  func.func @transform_3(%arg0: i32, %arg1: i32) -> (i32, i32) {
    %c0_i32 = arith.constant 0 : i32
    %c0_i32_0 = arith.constant 0 : i32
    return %arg0, %c0_i32 : i32, i32
  }
  func.func @transform_4(%arg0: i32, %arg1: i32) -> (i32, i32) {
    %c0_i32 = arith.constant 0 : i32
    %c0_i32_0 = arith.constant 0 : i32
    %c0_i32_1 = arith.constant 0 : i32
    return %c0_i32, %c0_i32_0 : i32, i32
  }
  func.func @transform_5(%arg0: i32, %arg1: i32) -> (i32, i32) {
    %c0_i32 = arith.constant 0 : i32
    %c0_i32_0 = arith.constant 0 : i32
    %c0_i32_1 = arith.constant 0 : i32
    return %c0_i32, %c0_i32_0 : i32, i32
  }
  func.func @transform_6(%arg0: i32, %arg1: i32) -> (i32, i32) {
    %c0_i32 = arith.constant 0 : i32
    %c0_i32_0 = arith.constant 0 : i32
    return %arg0, %c0_i32 : i32, i32
  }
}

module attributes {stable_mosaic.version = 11 : i64} {
  func.func @_linear_kernel(%arg0: i32, %arg1: i32, %arg2: i32, %arg3: memref<16x128xf32, #tpu.memory_space<vmem>>, %arg4: memref<128x384xf32, #tpu.memory_space<vmem>>, %arg5: memref<1x384xf32, #tpu.memory_space<vmem>>, %arg6: memref<16x384xf32, #tpu.memory_space<vmem>>, %arg7: memref<16x384xf32, #tpu.memory_space<vmem>>) attributes {dimension_semantics = [#tpu.dimension_semantics<parallel>, #tpu.dimension_semantics<parallel>, #tpu.dimension_semantics<arbitrary>], iteration_bounds = array<i64: 1, 1, 1>, scalar_prefetch = 0 : i64, scratch_operands = 1 : i64, tpu.core_type = #tpu.core_type<tc>, window_params = [{transform_indices = @transform_0, window_bounds = array<i64: 16, 128>}, {transform_indices = @transform_1, window_bounds = array<i64: 128, 384>}, {transform_indices = @transform_2, window_bounds = array<i64: 1, 384>}, {transform_indices = @transform_3, window_bounds = array<i64: 16, 384>}]} {
    %c0_i32 = arith.constant 0 : i32
    %0 = arith.cmpi eq, %arg2, %c0_i32 : i32
    %1 = arith.extui %0 : i1 to i32
    %c0_i32_0 = arith.constant 0 : i32
    %2 = arith.cmpi ne, %1, %c0_i32_0 : i32
    scf.if %2 {
      %cst_10 = arith.constant 0.000000e+00 : f32
      %12 = vector.broadcast %cst_10 : f32 to vector<16x384xf32>
      %c0_11 = arith.constant 0 : index
      %c0_12 = arith.constant 0 : index
      %13 = vector.load %arg7[%c0_11, %c0_12] : memref<16x384xf32, #tpu.memory_space<vmem>>, vector<16x384xf32>
      tpu.vector_store %arg7[%c0_11, %c0_12], %12 {strides = array<i32>} : memref<16x384xf32, #tpu.memory_space<vmem>>, vector<16x384xf32>,
    } else {
    }
    %c0 = arith.constant 0 : index
    %c0_1 = arith.constant 0 : index
    %3 = vector.load %arg7[%c0, %c0_1] : memref<16x384xf32, #tpu.memory_space<vmem>>, vector<16x384xf32>
    %c0_2 = arith.constant 0 : index
    %c0_3 = arith.constant 0 : index
    %4 = vector.load %arg3[%c0_2, %c0_3] : memref<16x128xf32, #tpu.memory_space<vmem>>, vector<16x128xf32>
    %c0_4 = arith.constant 0 : index
    %c0_5 = arith.constant 0 : index
    %5 = vector.load %arg4[%c0_4, %c0_5] : memref<128x384xf32, #tpu.memory_space<vmem>>, vector<128x384xf32>
    %cst = arith.constant dense<0.000000e+00> : vector<16x384xf32>
    %6 = tpu.matmul %4, %5, %cst {dimension_numbers = #tpu.dot_dimension_numbers<[1], [0], [0], [1], [0, 0, 1, 1], [], []>} : vector<16x128xf32>, vector<128x384xf32>, vector<16x384xf32> -> vector<16x384xf32>
    %7 = arith.addf %3, %6 : vector<16x384xf32>
    %c0_6 = arith.constant 0 : index
    %c0_7 = arith.constant 0 : index
    %8 = vector.load %arg7[%c0_6, %c0_7] : memref<16x384xf32, #tpu.memory_space<vmem>>, vector<16x384xf32>
    tpu.vector_store %arg7[%c0_6, %c0_7], %7 {strides = array<i32>} : memref<16x384xf32, #tpu.memory_space<vmem>>, vector<16x384xf32>,
    %c0_i32_8 = arith.constant 0 : i32
    %9 = arith.cmpi eq, %arg2, %c0_i32_8 : i32
    %10 = arith.extui %9 : i1 to i32
    %c0_i32_9 = arith.constant 0 : i32
    %11 = arith.cmpi ne, %10, %c0_i32_9 : i32
    scf.if %11 {
      %c0_10 = arith.constant 0 : index
      %c0_11 = arith.constant 0 : index
      %12 = vector.load %arg7[%c0_10, %c0_11] : memref<16x384xf32, #tpu.memory_space<vmem>>, vector<16x384xf32>
      %c0_12 = arith.constant 0 : index
      %c0_13 = arith.constant 0 : index
      %13 = vector.load %arg5[%c0_12, %c0_13] : memref<1x384xf32, #tpu.memory_space<vmem>>, vector<1x384xf32>
      %14 = vector.broadcast %13 : vector<1x384xf32> to vector<16x384xf32>
      %15 = arith.addf %12, %14 : vector<16x384xf32>
      %c0_14 = arith.constant 0 : index
      %c0_15 = arith.constant 0 : index
      %16 = vector.load %arg6[%c0_14, %c0_15] : memref<16x384xf32, #tpu.memory_space<vmem>>, vector<16x384xf32>
      tpu.vector_store %arg6[%c0_14, %c0_15], %15 {strides = array<i32>} : memref<16x384xf32, #tpu.memory_space<vmem>>, vector<16x384xf32>,
    } else {
    }
    return
  }
  func.func @transform_0(%arg0: i32, %arg1: i32, %arg2: i32) -> (i32, i32) {
    %c0_i32 = arith.constant 0 : i32
    return %arg0, %arg2 : i32, i32
  }
  func.func @transform_1(%arg0: i32, %arg1: i32, %arg2: i32) -> (i32, i32) {
    %c0_i32 = arith.constant 0 : i32
    return %arg2, %arg1 : i32, i32
  }
  func.func @transform_2(%arg0: i32, %arg1: i32, %arg2: i32) -> (i32, i32) {
    %c0_i32 = arith.constant 0 : i32
    %c0_i32_0 = arith.constant 0 : i32
    return %c0_i32, %arg1 : i32, i32
  }
  func.func @transform_3(%arg0: i32, %arg1: i32, %arg2: i32) -> (i32, i32) {
    %c0_i32 = arith.constant 0 : i32
    return %arg0, %arg1 : i32, i32
  }
}

module attributes {stable_mosaic.version = 11 : i64} {
  func.func @_linear_kernel(%arg0: i32, %arg1: i32, %arg2: i32, %arg3: memref<16x128xf32, #tpu.memory_space<vmem>>, %arg4: memref<128x128xf32, #tpu.memory_space<vmem>>, %arg5: memref<1x128xf32, #tpu.memory_space<vmem>>, %arg6: memref<16x128xf32, #tpu.memory_space<vmem>>, %arg7: memref<16x128xf32, #tpu.memory_space<vmem>>) attributes {dimension_semantics = [#tpu.dimension_semantics<parallel>, #tpu.dimension_semantics<parallel>, #tpu.dimension_semantics<arbitrary>], iteration_bounds = array<i64: 1, 1, 1>, scalar_prefetch = 0 : i64, scratch_operands = 1 : i64, tpu.core_type = #tpu.core_type<tc>, window_params = [{transform_indices = @transform_0, window_bounds = array<i64: 16, 128>}, {transform_indices = @transform_1, window_bounds = array<i64: 128, 128>}, {transform_indices = @transform_2, window_bounds = array<i64: 1, 128>}, {transform_indices = @transform_3, window_bounds = array<i64: 16, 128>}]} {
    %c0_i32 = arith.constant 0 : i32
    %0 = arith.cmpi eq, %arg2, %c0_i32 : i32
    %1 = arith.extui %0 : i1 to i32
    %c0_i32_0 = arith.constant 0 : i32
    %2 = arith.cmpi ne, %1, %c0_i32_0 : i32
    scf.if %2 {
      %cst_10 = arith.constant 0.000000e+00 : f32
      %12 = vector.broadcast %cst_10 : f32 to vector<16x128xf32>
      %c0_11 = arith.constant 0 : index
      %c0_12 = arith.constant 0 : index
      %13 = vector.load %arg7[%c0_11, %c0_12] : memref<16x128xf32, #tpu.memory_space<vmem>>, vector<16x128xf32>
      tpu.vector_store %arg7[%c0_11, %c0_12], %12 {strides = array<i32>} : memref<16x128xf32, #tpu.memory_space<vmem>>, vector<16x128xf32>,
    } else {
    }
    %c0 = arith.constant 0 : index
    %c0_1 = arith.constant 0 : index
    %3 = vector.load %arg7[%c0, %c0_1] : memref<16x128xf32, #tpu.memory_space<vmem>>, vector<16x128xf32>
    %c0_2 = arith.constant 0 : index
    %c0_3 = arith.constant 0 : index
    %4 = vector.load %arg3[%c0_2, %c0_3] : memref<16x128xf32, #tpu.memory_space<vmem>>, vector<16x128xf32>
    %c0_4 = arith.constant 0 : index
    %c0_5 = arith.constant 0 : index
    %5 = vector.load %arg4[%c0_4, %c0_5] : memref<128x128xf32, #tpu.memory_space<vmem>>, vector<128x128xf32>
    %cst = arith.constant dense<0.000000e+00> : vector<16x128xf32>
    %6 = tpu.matmul %4, %5, %cst {dimension_numbers = #tpu.dot_dimension_numbers<[1], [0], [0], [1], [0, 0, 1, 1], [], []>} : vector<16x128xf32>, vector<128x128xf32>, vector<16x128xf32> -> vector<16x128xf32>
    %7 = arith.addf %3, %6 : vector<16x128xf32>
    %c0_6 = arith.constant 0 : index
    %c0_7 = arith.constant 0 : index
    %8 = vector.load %arg7[%c0_6, %c0_7] : memref<16x128xf32, #tpu.memory_space<vmem>>, vector<16x128xf32>
    tpu.vector_store %arg7[%c0_6, %c0_7], %7 {strides = array<i32>} : memref<16x128xf32, #tpu.memory_space<vmem>>, vector<16x128xf32>,
    %c0_i32_8 = arith.constant 0 : i32
    %9 = arith.cmpi eq, %arg2, %c0_i32_8 : i32
    %10 = arith.extui %9 : i1 to i32
    %c0_i32_9 = arith.constant 0 : i32
    %11 = arith.cmpi ne, %10, %c0_i32_9 : i32
    scf.if %11 {
      %c0_10 = arith.constant 0 : index
      %c0_11 = arith.constant 0 : index
      %12 = vector.load %arg7[%c0_10, %c0_11] : memref<16x128xf32, #tpu.memory_space<vmem>>, vector<16x128xf32>
      %c0_12 = arith.constant 0 : index
      %c0_13 = arith.constant 0 : index
      %13 = vector.load %arg5[%c0_12, %c0_13] : memref<1x128xf32, #tpu.memory_space<vmem>>, vector<1x128xf32>
      %14 = vector.broadcast %13 : vector<1x128xf32> to vector<16x128xf32>
      %15 = arith.addf %12, %14 : vector<16x128xf32>
      %c0_14 = arith.constant 0 : index
      %c0_15 = arith.constant 0 : index
      %16 = vector.load %arg6[%c0_14, %c0_15] : memref<16x128xf32, #tpu.memory_space<vmem>>, vector<16x128xf32>
      tpu.vector_store %arg6[%c0_14, %c0_15], %15 {strides = array<i32>} : memref<16x128xf32, #tpu.memory_space<vmem>>, vector<16x128xf32>,
    } else {
    }
    return
  }
  func.func @transform_0(%arg0: i32, %arg1: i32, %arg2: i32) -> (i32, i32) {
    %c0_i32 = arith.constant 0 : i32
    return %arg0, %arg2 : i32, i32
  }
  func.func @transform_1(%arg0: i32, %arg1: i32, %arg2: i32) -> (i32, i32) {
    %c0_i32 = arith.constant 0 : i32
    return %arg2, %arg1 : i32, i32
  }
  func.func @transform_2(%arg0: i32, %arg1: i32, %arg2: i32) -> (i32, i32) {
    %c0_i32 = arith.constant 0 : i32
    %c0_i32_0 = arith.constant 0 : i32
    return %c0_i32, %arg1 : i32, i32
  }
  func.func @transform_3(%arg0: i32, %arg1: i32, %arg2: i32) -> (i32, i32) {
    %c0_i32 = arith.constant 0 : i32
    return %arg0, %arg1 : i32, i32
  }
}

module attributes {stable_mosaic.version = 11 : i64} {
  func.func @_linear_kernel(%arg0: i32, %arg1: i32, %arg2: i32, %arg3: memref<32x128xf32, #tpu.memory_space<vmem>>, %arg4: memref<128x256xf32, #tpu.memory_space<vmem>>, %arg5: memref<1x256xf32, #tpu.memory_space<vmem>>, %arg6: memref<32x256xf32, #tpu.memory_space<vmem>>, %arg7: memref<32x256xf32, #tpu.memory_space<vmem>>) attributes {dimension_semantics = [#tpu.dimension_semantics<parallel>, #tpu.dimension_semantics<parallel>, #tpu.dimension_semantics<arbitrary>], iteration_bounds = array<i64: 1, 1, 1>, scalar_prefetch = 0 : i64, scratch_operands = 1 : i64, tpu.core_type = #tpu.core_type<tc>, window_params = [{transform_indices = @transform_0, window_bounds = array<i64: 32, 128>}, {transform_indices = @transform_1, window_bounds = array<i64: 128, 256>}, {transform_indices = @transform_2, window_bounds = array<i64: 1, 256>}, {transform_indices = @transform_3, window_bounds = array<i64: 32, 256>}]} {
    %c0_i32 = arith.constant 0 : i32
    %0 = arith.cmpi eq, %arg2, %c0_i32 : i32
    %1 = arith.extui %0 : i1 to i32
    %c0_i32_0 = arith.constant 0 : i32
    %2 = arith.cmpi ne, %1, %c0_i32_0 : i32
    scf.if %2 {
      %cst_10 = arith.constant 0.000000e+00 : f32
      %12 = vector.broadcast %cst_10 : f32 to vector<32x256xf32>
      %c0_11 = arith.constant 0 : index
      %c0_12 = arith.constant 0 : index
      %13 = vector.load %arg7[%c0_11, %c0_12] : memref<32x256xf32, #tpu.memory_space<vmem>>, vector<32x256xf32>
      tpu.vector_store %arg7[%c0_11, %c0_12], %12 {strides = array<i32>} : memref<32x256xf32, #tpu.memory_space<vmem>>, vector<32x256xf32>,
    } else {
    }
    %c0 = arith.constant 0 : index
    %c0_1 = arith.constant 0 : index
    %3 = vector.load %arg7[%c0, %c0_1] : memref<32x256xf32, #tpu.memory_space<vmem>>, vector<32x256xf32>
    %c0_2 = arith.constant 0 : index
    %c0_3 = arith.constant 0 : index
    %4 = vector.load %arg3[%c0_2, %c0_3] : memref<32x128xf32, #tpu.memory_space<vmem>>, vector<32x128xf32>
    %c0_4 = arith.constant 0 : index
    %c0_5 = arith.constant 0 : index
    %5 = vector.load %arg4[%c0_4, %c0_5] : memref<128x256xf32, #tpu.memory_space<vmem>>, vector<128x256xf32>
    %cst = arith.constant dense<0.000000e+00> : vector<32x256xf32>
    %6 = tpu.matmul %4, %5, %cst {dimension_numbers = #tpu.dot_dimension_numbers<[1], [0], [0], [1], [0, 0, 1, 1], [], []>} : vector<32x128xf32>, vector<128x256xf32>, vector<32x256xf32> -> vector<32x256xf32>
    %7 = arith.addf %3, %6 : vector<32x256xf32>
    %c0_6 = arith.constant 0 : index
    %c0_7 = arith.constant 0 : index
    %8 = vector.load %arg7[%c0_6, %c0_7] : memref<32x256xf32, #tpu.memory_space<vmem>>, vector<32x256xf32>
    tpu.vector_store %arg7[%c0_6, %c0_7], %7 {strides = array<i32>} : memref<32x256xf32, #tpu.memory_space<vmem>>, vector<32x256xf32>,
    %c0_i32_8 = arith.constant 0 : i32
    %9 = arith.cmpi eq, %arg2, %c0_i32_8 : i32
    %10 = arith.extui %9 : i1 to i32
    %c0_i32_9 = arith.constant 0 : i32
    %11 = arith.cmpi ne, %10, %c0_i32_9 : i32
    scf.if %11 {
      %c0_10 = arith.constant 0 : index
      %c0_11 = arith.constant 0 : index
      %12 = vector.load %arg7[%c0_10, %c0_11] : memref<32x256xf32, #tpu.memory_space<vmem>>, vector<32x256xf32>
      %c0_12 = arith.constant 0 : index
      %c0_13 = arith.constant 0 : index
      %13 = vector.load %arg5[%c0_12, %c0_13] : memref<1x256xf32, #tpu.memory_space<vmem>>, vector<1x256xf32>
      %14 = vector.broadcast %13 : vector<1x256xf32> to vector<32x256xf32>
      %15 = arith.addf %12, %14 : vector<32x256xf32>
      %c0_14 = arith.constant 0 : index
      %c0_15 = arith.constant 0 : index
      %16 = vector.load %arg6[%c0_14, %c0_15] : memref<32x256xf32, #tpu.memory_space<vmem>>, vector<32x256xf32>
      tpu.vector_store %arg6[%c0_14, %c0_15], %15 {strides = array<i32>} : memref<32x256xf32, #tpu.memory_space<vmem>>, vector<32x256xf32>,
    } else {
    }
    return
  }
  func.func @transform_0(%arg0: i32, %arg1: i32, %arg2: i32) -> (i32, i32) {
    %c0_i32 = arith.constant 0 : i32
    return %arg0, %arg2 : i32, i32
  }
  func.func @transform_1(%arg0: i32, %arg1: i32, %arg2: i32) -> (i32, i32) {
    %c0_i32 = arith.constant 0 : i32
    return %arg2, %arg1 : i32, i32
  }
  func.func @transform_2(%arg0: i32, %arg1: i32, %arg2: i32) -> (i32, i32) {
    %c0_i32 = arith.constant 0 : i32
    %c0_i32_0 = arith.constant 0 : i32
    return %c0_i32, %arg1 : i32, i32
  }
  func.func @transform_3(%arg0: i32, %arg1: i32, %arg2: i32) -> (i32, i32) {
    %c0_i32 = arith.constant 0 : i32
    return %arg0, %arg1 : i32, i32
  }
}

module attributes {stable_mosaic.version = 11 : i64} {
  func.func @_attn_kernel(%arg0: i32, %arg1: i32, %arg2: memref<1x8x128xf32, #tpu.memory_space<vmem>>, %arg3: memref<1x16x128xf32, #tpu.memory_space<vmem>>, %arg4: memref<1x16x128xf32, #tpu.memory_space<vmem>>, %arg5: memref<1x8x128xf32, #tpu.memory_space<vmem>>) attributes {dimension_semantics = [#tpu.dimension_semantics<parallel>, #tpu.dimension_semantics<parallel>], iteration_bounds = array<i64: 2, 1>, scalar_prefetch = 0 : i64, scratch_operands = 0 : i64, tpu.core_type = #tpu.core_type<tc>, window_params = [{transform_indices = @transform_0, window_bounds = array<i64: 1, 8, 128>}, {transform_indices = @transform_1, window_bounds = array<i64: 1, 16, 128>}, {transform_indices = @transform_2, window_bounds = array<i64: 1, 16, 128>}, {transform_indices = @transform_3, window_bounds = array<i64: 1, 8, 128>}]} {
    %c0 = arith.constant 0 : index
    %c0_0 = arith.constant 0 : index
    %c0_1 = arith.constant 0 : index
    %0 = vector.load %arg2[%c0, %c0_0, %c0_1] : memref<1x8x128xf32, #tpu.memory_space<vmem>>, vector<1x8x128xf32>
    %1 = vector.shape_cast %0 : vector<1x8x128xf32> to vector<8x128xf32>
    %c0_2 = arith.constant 0 : index
    %c0_3 = arith.constant 0 : index
    %c0_4 = arith.constant 0 : index
    %2 = vector.load %arg3[%c0_2, %c0_3, %c0_4] : memref<1x16x128xf32, #tpu.memory_space<vmem>>, vector<1x16x128xf32>
    %3 = vector.shape_cast %2 : vector<1x16x128xf32> to vector<16x128xf32>
    %c0_5 = arith.constant 0 : index
    %c0_6 = arith.constant 0 : index
    %c0_7 = arith.constant 0 : index
    %4 = vector.load %arg4[%c0_5, %c0_6, %c0_7] : memref<1x16x128xf32, #tpu.memory_space<vmem>>, vector<1x16x128xf32>
    %5 = vector.shape_cast %4 : vector<1x16x128xf32> to vector<16x128xf32>
    %6 = vector.extract_strided_slice %1 {offsets = [0, 0], sizes = [8, 32], strides = [1, 1]} : vector<8x128xf32> to vector<8x32xf32>
    %7 = vector.extract_strided_slice %3 {offsets = [0, 0], sizes = [16, 32], strides = [1, 1]} : vector<16x128xf32> to vector<16x32xf32>
    %8 = vector.extract_strided_slice %5 {offsets = [0, 0], sizes = [16, 32], strides = [1, 1]} : vector<16x128xf32> to vector<16x32xf32>
    %cst = arith.constant dense<0.000000e+00> : vector<8x16xf32>
    %9 = tpu.matmul %6, %7, %cst {dimension_numbers = #tpu.dot_dimension_numbers<[1], [1], [0], [0], [0, 0, 1, 0], [], []>} : vector<8x32xf32>, vector<16x32xf32>, vector<8x16xf32> -> vector<8x16xf32>
    %cst_8 = arith.constant 0.176776692 : f32
    %10 = vector.broadcast %cst_8 : f32 to vector<8x16xf32>
    %11 = arith.mulf %9, %10 : vector<8x16xf32>
    %cst_9 = arith.constant dense<0xFF800000> : vector<8xf32>
    %12 = vector.multi_reduction <maximumf>, %11, %cst_9 [1] : vector<8x16xf32> to vector<8xf32>
    %13 = vector.shape_cast %12 : vector<8xf32> to vector<8x1xf32>
    %14 = vector.broadcast %13 : vector<8x1xf32> to vector<8x16xf32>
    %15 = arith.subf %11, %14 : vector<8x16xf32>
    %16 = math.exp %15 : vector<8x16xf32>
    %cst_10 = arith.constant dense<0.000000e+00> : vector<8xf32>
    %17 = vector.multi_reduction <add>, %16, %cst_10 [1] : vector<8x16xf32> to vector<8xf32>
    %18 = vector.shape_cast %17 : vector<8xf32> to vector<8x1xf32>
    %19 = tpu.reciprocal %18 {approx = true} : vector<8x1xf32> -> vector<8x1xf32>
    %20 = vector.broadcast %19 : vector<8x1xf32> to vector<8x16xf32>
    %21 = arith.mulf %16, %20 : vector<8x16xf32>
    %cst_11 = arith.constant dense<0.000000e+00> : vector<8x32xf32>
    %22 = tpu.matmul %21, %8, %cst_11 {dimension_numbers = #tpu.dot_dimension_numbers<[1], [0], [0], [1], [0, 0, 1, 1], [], []>} : vector<8x16xf32>, vector<16x32xf32>, vector<8x32xf32> -> vector<8x32xf32>
    %23 = vector.extract_strided_slice %1 {offsets = [0, 32], sizes = [8, 32], strides = [1, 1]} : vector<8x128xf32> to vector<8x32xf32>
    %24 = vector.extract_strided_slice %3 {offsets = [0, 32], sizes = [16, 32], strides = [1, 1]} : vector<16x128xf32> to vector<16x32xf32>
    %25 = vector.extract_strided_slice %5 {offsets = [0, 32], sizes = [16, 32], strides = [1, 1]} : vector<16x128xf32> to vector<16x32xf32>
    %cst_12 = arith.constant dense<0.000000e+00> : vector<8x16xf32>
    %26 = tpu.matmul %23, %24, %cst_12 {dimension_numbers = #tpu.dot_dimension_numbers<[1], [1], [0], [0], [0, 0, 1, 0], [], []>} : vector<8x32xf32>, vector<16x32xf32>, vector<8x16xf32> -> vector<8x16xf32>
    %cst_13 = arith.constant 0.176776692 : f32
    %27 = vector.broadcast %cst_13 : f32 to vector<8x16xf32>
    %28 = arith.mulf %26, %27 : vector<8x16xf32>
    %cst_14 = arith.constant dense<0xFF800000> : vector<8xf32>
    %29 = vector.multi_reduction <maximumf>, %28, %cst_14 [1] : vector<8x16xf32> to vector<8xf32>
    %30 = vector.shape_cast %29 : vector<8xf32> to vector<8x1xf32>
    %31 = vector.broadcast %30 : vector<8x1xf32> to vector<8x16xf32>
    %32 = arith.subf %28, %31 : vector<8x16xf32>
    %33 = math.exp %32 : vector<8x16xf32>
    %cst_15 = arith.constant dense<0.000000e+00> : vector<8xf32>
    %34 = vector.multi_reduction <add>, %33, %cst_15 [1] : vector<8x16xf32> to vector<8xf32>
    %35 = vector.shape_cast %34 : vector<8xf32> to vector<8x1xf32>
    %36 = tpu.reciprocal %35 {approx = true} : vector<8x1xf32> -> vector<8x1xf32>
    %37 = vector.broadcast %36 : vector<8x1xf32> to vector<8x16xf32>
    %38 = arith.mulf %33, %37 : vector<8x16xf32>
    %cst_16 = arith.constant dense<0.000000e+00> : vector<8x32xf32>
    %39 = tpu.matmul %38, %25, %cst_16 {dimension_numbers = #tpu.dot_dimension_numbers<[1], [0], [0], [1], [0, 0, 1, 1], [], []>} : vector<8x16xf32>, vector<16x32xf32>, vector<8x32xf32> -> vector<8x32xf32>
    %40 = vector.extract_strided_slice %1 {offsets = [0, 64], sizes = [8, 32], strides = [1, 1]} : vector<8x128xf32> to vector<8x32xf32>
    %41 = vector.extract_strided_slice %3 {offsets = [0, 64], sizes = [16, 32], strides = [1, 1]} : vector<16x128xf32> to vector<16x32xf32>
    %42 = vector.extract_strided_slice %5 {offsets = [0, 64], sizes = [16, 32], strides = [1, 1]} : vector<16x128xf32> to vector<16x32xf32>
    %cst_17 = arith.constant dense<0.000000e+00> : vector<8x16xf32>
    %43 = tpu.matmul %40, %41, %cst_17 {dimension_numbers = #tpu.dot_dimension_numbers<[1], [1], [0], [0], [0, 0, 1, 0], [], []>} : vector<8x32xf32>, vector<16x32xf32>, vector<8x16xf32> -> vector<8x16xf32>
    %cst_18 = arith.constant 0.176776692 : f32
    %44 = vector.broadcast %cst_18 : f32 to vector<8x16xf32>
    %45 = arith.mulf %43, %44 : vector<8x16xf32>
    %cst_19 = arith.constant dense<0xFF800000> : vector<8xf32>
    %46 = vector.multi_reduction <maximumf>, %45, %cst_19 [1] : vector<8x16xf32> to vector<8xf32>
    %47 = vector.shape_cast %46 : vector<8xf32> to vector<8x1xf32>
    %48 = vector.broadcast %47 : vector<8x1xf32> to vector<8x16xf32>
    %49 = arith.subf %45, %48 : vector<8x16xf32>
    %50 = math.exp %49 : vector<8x16xf32>
    %cst_20 = arith.constant dense<0.000000e+00> : vector<8xf32>
    %51 = vector.multi_reduction <add>, %50, %cst_20 [1] : vector<8x16xf32> to vector<8xf32>
    %52 = vector.shape_cast %51 : vector<8xf32> to vector<8x1xf32>
    %53 = tpu.reciprocal %52 {approx = true} : vector<8x1xf32> -> vector<8x1xf32>
    %54 = vector.broadcast %53 : vector<8x1xf32> to vector<8x16xf32>
    %55 = arith.mulf %50, %54 : vector<8x16xf32>
    %cst_21 = arith.constant dense<0.000000e+00> : vector<8x32xf32>
    %56 = tpu.matmul %55, %42, %cst_21 {dimension_numbers = #tpu.dot_dimension_numbers<[1], [0], [0], [1], [0, 0, 1, 1], [], []>} : vector<8x16xf32>, vector<16x32xf32>, vector<8x32xf32> -> vector<8x32xf32>
    %57 = vector.extract_strided_slice %1 {offsets = [0, 96], sizes = [8, 32], strides = [1, 1]} : vector<8x128xf32> to vector<8x32xf32>
    %58 = vector.extract_strided_slice %3 {offsets = [0, 96], sizes = [16, 32], strides = [1, 1]} : vector<16x128xf32> to vector<16x32xf32>
    %59 = vector.extract_strided_slice %5 {offsets = [0, 96], sizes = [16, 32], strides = [1, 1]} : vector<16x128xf32> to vector<16x32xf32>
    %cst_22 = arith.constant dense<0.000000e+00> : vector<8x16xf32>
    %60 = tpu.matmul %57, %58, %cst_22 {dimension_numbers = #tpu.dot_dimension_numbers<[1], [1], [0], [0], [0, 0, 1, 0], [], []>} : vector<8x32xf32>, vector<16x32xf32>, vector<8x16xf32> -> vector<8x16xf32>
    %cst_23 = arith.constant 0.176776692 : f32
    %61 = vector.broadcast %cst_23 : f32 to vector<8x16xf32>
    %62 = arith.mulf %60, %61 : vector<8x16xf32>
    %cst_24 = arith.constant dense<0xFF800000> : vector<8xf32>
    %63 = vector.multi_reduction <maximumf>, %62, %cst_24 [1] : vector<8x16xf32> to vector<8xf32>
    %64 = vector.shape_cast %63 : vector<8xf32> to vector<8x1xf32>
    %65 = vector.broadcast %64 : vector<8x1xf32> to vector<8x16xf32>
    %66 = arith.subf %62, %65 : vector<8x16xf32>
    %67 = math.exp %66 : vector<8x16xf32>
    %cst_25 = arith.constant dense<0.000000e+00> : vector<8xf32>
    %68 = vector.multi_reduction <add>, %67, %cst_25 [1] : vector<8x16xf32> to vector<8xf32>
    %69 = vector.shape_cast %68 : vector<8xf32> to vector<8x1xf32>
    %70 = tpu.reciprocal %69 {approx = true} : vector<8x1xf32> -> vector<8x1xf32>
    %71 = vector.broadcast %70 : vector<8x1xf32> to vector<8x16xf32>
    %72 = arith.mulf %67, %71 : vector<8x16xf32>
    %cst_26 = arith.constant dense<0.000000e+00> : vector<8x32xf32>
    %73 = tpu.matmul %72, %59, %cst_26 {dimension_numbers = #tpu.dot_dimension_numbers<[1], [0], [0], [1], [0, 0, 1, 1], [], []>} : vector<8x16xf32>, vector<16x32xf32>, vector<8x32xf32> -> vector<8x32xf32>
    %74 = tpu.concatenate %22, %39, %56, %73 in 1 : vector<8x32xf32>, vector<8x32xf32>, vector<8x32xf32>, vector<8x32xf32> -> vector<8x128xf32>
    %c0_27 = arith.constant 0 : index
    %c0_28 = arith.constant 0 : index
    %c0_29 = arith.constant 0 : index
    %75 = vector.load %arg5[%c0_27, %c0_28, %c0_29] : memref<1x8x128xf32, #tpu.memory_space<vmem>>, vector<1x8x128xf32>
    %76 = vector.shape_cast %75 : vector<1x8x128xf32> to vector<8x128xf32>
    %77 = vector.shape_cast %74 : vector<8x128xf32> to vector<1x8x128xf32>
    tpu.vector_store %arg5[%c0_27, %c0_28, %c0_29], %77 {strides = array<i32>} : memref<1x8x128xf32, #tpu.memory_space<vmem>>, vector<1x8x128xf32>,
    return
  }
  func.func @transform_0(%arg0: i32, %arg1: i32) -> (i32, i32, i32) {
    %c0_i32 = arith.constant 0 : i32
    %c0_i32_0 = arith.constant 0 : i32
    return %arg0, %arg1, %c0_i32 : i32, i32, i32
  }
  func.func @transform_1(%arg0: i32, %arg1: i32) -> (i32, i32, i32) {
    %c0_i32 = arith.constant 0 : i32
    %c0_i32_0 = arith.constant 0 : i32
    %c0_i32_1 = arith.constant 0 : i32
    return %arg0, %c0_i32, %c0_i32_0 : i32, i32, i32
  }
  func.func @transform_2(%arg0: i32, %arg1: i32) -> (i32, i32, i32) {
    %c0_i32 = arith.constant 0 : i32
    %c0_i32_0 = arith.constant 0 : i32
    %c0_i32_1 = arith.constant 0 : i32
    return %arg0, %c0_i32, %c0_i32_0 : i32, i32, i32
  }
  func.func @transform_3(%arg0: i32, %arg1: i32) -> (i32, i32, i32) {
    %c0_i32 = arith.constant 0 : i32
    %c0_i32_0 = arith.constant 0 : i32
    return %arg0, %arg1, %c0_i32 : i32, i32, i32
  }
}

module attributes {stable_mosaic.version = 11 : i64} {
  func.func @_ln_chain_kernel(%arg0: i32, %arg1: memref<32x128xf32, #tpu.memory_space<vmem>>, %arg2: memref<1x128xf32, #tpu.memory_space<vmem>>, %arg3: memref<1x128xf32, #tpu.memory_space<vmem>>, %arg4: memref<32x128xf32, #tpu.memory_space<vmem>>) attributes {dimension_semantics = [#tpu.dimension_semantics<parallel>], iteration_bounds = array<i64: 1>, scalar_prefetch = 0 : i64, scratch_operands = 0 : i64, tpu.core_type = #tpu.core_type<tc>, window_params = [{transform_indices = @transform_0, window_bounds = array<i64: 32, 128>}, {pipeline_mode = #tpu.pipeline_mode<synchronous>, transform_indices = @transform_1, window_bounds = array<i64: 1, 128>}, {pipeline_mode = #tpu.pipeline_mode<synchronous>, transform_indices = @transform_2, window_bounds = array<i64: 1, 128>}, {transform_indices = @transform_3, window_bounds = array<i64: 32, 128>}]} {
    %c0 = arith.constant 0 : index
    %c0_0 = arith.constant 0 : index
    %0 = vector.load %arg1[%c0, %c0_0] : memref<32x128xf32, #tpu.memory_space<vmem>>, vector<32x128xf32>
    %c0_1 = arith.constant 0 : index
    %c0_2 = arith.constant 0 : index
    %1 = vector.load %arg2[%c0_1, %c0_2] : memref<1x128xf32, #tpu.memory_space<vmem>>, vector<1x128xf32>
    %c0_3 = arith.constant 0 : index
    %c0_4 = arith.constant 0 : index
    %2 = vector.load %arg3[%c0_3, %c0_4] : memref<1x128xf32, #tpu.memory_space<vmem>>, vector<1x128xf32>
    %cst = arith.constant dense<0.000000e+00> : vector<32xf32>
    %3 = vector.multi_reduction <add>, %0, %cst [1] : vector<32x128xf32> to vector<32xf32>
    %4 = vector.shape_cast %3 : vector<32xf32> to vector<32x1xf32>
    %cst_5 = arith.constant 1.280000e+02 : f32
    %5 = vector.broadcast %cst_5 : f32 to vector<32x1xf32>
    %6 = arith.divf %4, %5 : vector<32x1xf32>
    %7 = vector.broadcast %6 : vector<32x1xf32> to vector<32x128xf32>
    %8 = arith.subf %0, %7 : vector<32x128xf32>
    %9 = arith.mulf %8, %8 : vector<32x128xf32>
    %cst_6 = arith.constant dense<0.000000e+00> : vector<32xf32>
    %10 = vector.multi_reduction <add>, %9, %cst_6 [1] : vector<32x128xf32> to vector<32xf32>
    %11 = vector.shape_cast %10 : vector<32xf32> to vector<32x1xf32>
    %cst_7 = arith.constant 1.280000e+02 : f32
    %12 = vector.broadcast %cst_7 : f32 to vector<32x1xf32>
    %13 = arith.divf %11, %12 : vector<32x1xf32>
    %cst_8 = arith.constant 9.99999974E-6 : f32
    %14 = vector.broadcast %cst_8 : f32 to vector<32x1xf32>
    %15 = arith.addf %13, %14 : vector<32x1xf32>
    %16 = math.rsqrt %15 : vector<32x1xf32>
    %17 = vector.broadcast %16 : vector<32x1xf32> to vector<32x128xf32>
    %18 = arith.mulf %8, %17 : vector<32x128xf32>
    %19 = vector.broadcast %1 : vector<1x128xf32> to vector<32x128xf32>
    %20 = arith.mulf %18, %19 : vector<32x128xf32>
    %21 = vector.broadcast %2 : vector<1x128xf32> to vector<32x128xf32>
    %22 = arith.addf %20, %21 : vector<32x128xf32>
    %c0_9 = arith.constant 0 : index
    %c0_10 = arith.constant 0 : index
    %23 = vector.load %arg4[%c0_9, %c0_10] : memref<32x128xf32, #tpu.memory_space<vmem>>, vector<32x128xf32>
    tpu.vector_store %arg4[%c0_9, %c0_10], %22 {strides = array<i32>} : memref<32x128xf32, #tpu.memory_space<vmem>>, vector<32x128xf32>,
    return
  }
  func.func @transform_0(%arg0: i32) -> (i32, i32) {
    %c0_i32 = arith.constant 0 : i32
    %c0_i32_0 = arith.constant 0 : i32
    return %arg0, %c0_i32 : i32, i32
  }
  func.func @transform_1(%arg0: i32) -> (i32, i32) {
    %c0_i32 = arith.constant 0 : i32
    %c0_i32_0 = arith.constant 0 : i32
    %c0_i32_1 = arith.constant 0 : i32
    return %c0_i32, %c0_i32_0 : i32, i32
  }
  func.func @transform_2(%arg0: i32) -> (i32, i32) {
    %c0_i32 = arith.constant 0 : i32
    %c0_i32_0 = arith.constant 0 : i32
    %c0_i32_1 = arith.constant 0 : i32
    return %c0_i32, %c0_i32_0 : i32, i32
  }
  func.func @transform_3(%arg0: i32) -> (i32, i32) {
    %c0_i32 = arith.constant 0 : i32
    %c0_i32_0 = arith.constant 0 : i32
    return %arg0, %c0_i32 : i32, i32
  }
}

module attributes {stable_mosaic.version = 11 : i64} {
  func.func @_linear_kernel(%arg0: i32, %arg1: i32, %arg2: i32, %arg3: memref<16x128xf32, #tpu.memory_space<vmem>>, %arg4: memref<128x512xf32, #tpu.memory_space<vmem>>, %arg5: memref<1x512xf32, #tpu.memory_space<vmem>>, %arg6: memref<16x512xf32, #tpu.memory_space<vmem>>, %arg7: memref<16x512xf32, #tpu.memory_space<vmem>>) attributes {dimension_semantics = [#tpu.dimension_semantics<parallel>, #tpu.dimension_semantics<parallel>, #tpu.dimension_semantics<arbitrary>], iteration_bounds = array<i64: 1, 1, 1>, scalar_prefetch = 0 : i64, scratch_operands = 1 : i64, tpu.core_type = #tpu.core_type<tc>, window_params = [{transform_indices = @transform_0, window_bounds = array<i64: 16, 128>}, {transform_indices = @transform_1, window_bounds = array<i64: 128, 512>}, {transform_indices = @transform_2, window_bounds = array<i64: 1, 512>}, {transform_indices = @transform_3, window_bounds = array<i64: 16, 512>}]} {
    %c0_i32 = arith.constant 0 : i32
    %0 = arith.cmpi eq, %arg2, %c0_i32 : i32
    %1 = arith.extui %0 : i1 to i32
    %c0_i32_0 = arith.constant 0 : i32
    %2 = arith.cmpi ne, %1, %c0_i32_0 : i32
    scf.if %2 {
      %cst_10 = arith.constant 0.000000e+00 : f32
      %12 = vector.broadcast %cst_10 : f32 to vector<16x512xf32>
      %c0_11 = arith.constant 0 : index
      %c0_12 = arith.constant 0 : index
      %13 = vector.load %arg7[%c0_11, %c0_12] : memref<16x512xf32, #tpu.memory_space<vmem>>, vector<16x512xf32>
      tpu.vector_store %arg7[%c0_11, %c0_12], %12 {strides = array<i32>} : memref<16x512xf32, #tpu.memory_space<vmem>>, vector<16x512xf32>,
    } else {
    }
    %c0 = arith.constant 0 : index
    %c0_1 = arith.constant 0 : index
    %3 = vector.load %arg7[%c0, %c0_1] : memref<16x512xf32, #tpu.memory_space<vmem>>, vector<16x512xf32>
    %c0_2 = arith.constant 0 : index
    %c0_3 = arith.constant 0 : index
    %4 = vector.load %arg3[%c0_2, %c0_3] : memref<16x128xf32, #tpu.memory_space<vmem>>, vector<16x128xf32>
    %c0_4 = arith.constant 0 : index
    %c0_5 = arith.constant 0 : index
    %5 = vector.load %arg4[%c0_4, %c0_5] : memref<128x512xf32, #tpu.memory_space<vmem>>, vector<128x512xf32>
    %cst = arith.constant dense<0.000000e+00> : vector<16x512xf32>
    %6 = tpu.matmul %4, %5, %cst {dimension_numbers = #tpu.dot_dimension_numbers<[1], [0], [0], [1], [0, 0, 1, 1], [], []>} : vector<16x128xf32>, vector<128x512xf32>, vector<16x512xf32> -> vector<16x512xf32>
    %7 = arith.addf %3, %6 : vector<16x512xf32>
    %c0_6 = arith.constant 0 : index
    %c0_7 = arith.constant 0 : index
    %8 = vector.load %arg7[%c0_6, %c0_7] : memref<16x512xf32, #tpu.memory_space<vmem>>, vector<16x512xf32>
    tpu.vector_store %arg7[%c0_6, %c0_7], %7 {strides = array<i32>} : memref<16x512xf32, #tpu.memory_space<vmem>>, vector<16x512xf32>,
    %c0_i32_8 = arith.constant 0 : i32
    %9 = arith.cmpi eq, %arg2, %c0_i32_8 : i32
    %10 = arith.extui %9 : i1 to i32
    %c0_i32_9 = arith.constant 0 : i32
    %11 = arith.cmpi ne, %10, %c0_i32_9 : i32
    scf.if %11 {
      %c0_10 = arith.constant 0 : index
      %c0_11 = arith.constant 0 : index
      %12 = vector.load %arg7[%c0_10, %c0_11] : memref<16x512xf32, #tpu.memory_space<vmem>>, vector<16x512xf32>
      %c0_12 = arith.constant 0 : index
      %c0_13 = arith.constant 0 : index
      %13 = vector.load %arg5[%c0_12, %c0_13] : memref<1x512xf32, #tpu.memory_space<vmem>>, vector<1x512xf32>
      %14 = vector.broadcast %13 : vector<1x512xf32> to vector<16x512xf32>
      %15 = arith.addf %12, %14 : vector<16x512xf32>
      %cst_14 = arith.constant 5.000000e-01 : f32
      %16 = vector.broadcast %cst_14 : f32 to vector<16x512xf32>
      %17 = arith.mulf %16, %15 : vector<16x512xf32>
      %cst_15 = arith.constant 0.707106769 : f32
      %18 = vector.broadcast %cst_15 : f32 to vector<16x512xf32>
      %19 = arith.mulf %15, %18 : vector<16x512xf32>
      %20 = math.erf %19 : vector<16x512xf32>
      %cst_16 = arith.constant 1.000000e+00 : f32
      %21 = vector.broadcast %cst_16 : f32 to vector<16x512xf32>
      %22 = arith.addf %21, %20 : vector<16x512xf32>
      %23 = arith.mulf %17, %22 : vector<16x512xf32>
      %c0_17 = arith.constant 0 : index
      %c0_18 = arith.constant 0 : index
      %24 = vector.load %arg6[%c0_17, %c0_18] : memref<16x512xf32, #tpu.memory_space<vmem>>, vector<16x512xf32>
      tpu.vector_store %arg6[%c0_17, %c0_18], %23 {strides = array<i32>} : memref<16x512xf32, #tpu.memory_space<vmem>>, vector<16x512xf32>,
    } else {
    }
    return
  }
  func.func @transform_0(%arg0: i32, %arg1: i32, %arg2: i32) -> (i32, i32) {
    %c0_i32 = arith.constant 0 : i32
    return %arg0, %arg2 : i32, i32
  }
  func.func @transform_1(%arg0: i32, %arg1: i32, %arg2: i32) -> (i32, i32) {
    %c0_i32 = arith.constant 0 : i32
    return %arg2, %arg1 : i32, i32
  }
  func.func @transform_2(%arg0: i32, %arg1: i32, %arg2: i32) -> (i32, i32) {
    %c0_i32 = arith.constant 0 : i32
    %c0_i32_0 = arith.constant 0 : i32
    return %c0_i32, %arg1 : i32, i32
  }
  func.func @transform_3(%arg0: i32, %arg1: i32, %arg2: i32) -> (i32, i32) {
    %c0_i32 = arith.constant 0 : i32
    return %arg0, %arg1 : i32, i32
  }
}

module attributes {stable_mosaic.version = 11 : i64} {
  func.func @_linear_res_ln_kernel(%arg0: i32, %arg1: i32, %arg2: memref<16x512xf32, #tpu.memory_space<vmem>>, %arg3: memref<512x128xf32, #tpu.memory_space<vmem>>, %arg4: memref<1x128xf32, #tpu.memory_space<vmem>>, %arg5: memref<16x128xf32, #tpu.memory_space<vmem>>, %arg6: memref<1x128xf32, #tpu.memory_space<vmem>>, %arg7: memref<1x128xf32, #tpu.memory_space<vmem>>, %arg8: memref<16x128xf32, #tpu.memory_space<vmem>>, %arg9: memref<16x128xf32, #tpu.memory_space<vmem>>) attributes {dimension_semantics = [#tpu.dimension_semantics<parallel>, #tpu.dimension_semantics<arbitrary>], iteration_bounds = array<i64: 1, 1>, scalar_prefetch = 0 : i64, scratch_operands = 1 : i64, tpu.core_type = #tpu.core_type<tc>, window_params = [{transform_indices = @transform_0, window_bounds = array<i64: 16, 512>}, {transform_indices = @transform_1, window_bounds = array<i64: 512, 128>}, {pipeline_mode = #tpu.pipeline_mode<synchronous>, transform_indices = @transform_2, window_bounds = array<i64: 1, 128>}, {transform_indices = @transform_3, window_bounds = array<i64: 16, 128>}, {pipeline_mode = #tpu.pipeline_mode<synchronous>, transform_indices = @transform_4, window_bounds = array<i64: 1, 128>}, {pipeline_mode = #tpu.pipeline_mode<synchronous>, transform_indices = @transform_5, window_bounds = array<i64: 1, 128>}, {transform_indices = @transform_6, window_bounds = array<i64: 16, 128>}]} {
    %c0_i32 = arith.constant 0 : i32
    %0 = arith.cmpi eq, %arg1, %c0_i32 : i32
    %1 = arith.extui %0 : i1 to i32
    %c0_i32_0 = arith.constant 0 : i32
    %2 = arith.cmpi ne, %1, %c0_i32_0 : i32
    scf.if %2 {
      %cst_10 = arith.constant 0.000000e+00 : f32
      %12 = vector.broadcast %cst_10 : f32 to vector<16x128xf32>
      %c0_11 = arith.constant 0 : index
      %c0_12 = arith.constant 0 : index
      %13 = vector.load %arg9[%c0_11, %c0_12] : memref<16x128xf32, #tpu.memory_space<vmem>>, vector<16x128xf32>
      tpu.vector_store %arg9[%c0_11, %c0_12], %12 {strides = array<i32>} : memref<16x128xf32, #tpu.memory_space<vmem>>, vector<16x128xf32>,
    } else {
    }
    %c0 = arith.constant 0 : index
    %c0_1 = arith.constant 0 : index
    %3 = vector.load %arg9[%c0, %c0_1] : memref<16x128xf32, #tpu.memory_space<vmem>>, vector<16x128xf32>
    %c0_2 = arith.constant 0 : index
    %c0_3 = arith.constant 0 : index
    %4 = vector.load %arg2[%c0_2, %c0_3] : memref<16x512xf32, #tpu.memory_space<vmem>>, vector<16x512xf32>
    %c0_4 = arith.constant 0 : index
    %c0_5 = arith.constant 0 : index
    %5 = vector.load %arg3[%c0_4, %c0_5] : memref<512x128xf32, #tpu.memory_space<vmem>>, vector<512x128xf32>
    %cst = arith.constant dense<0.000000e+00> : vector<16x128xf32>
    %6 = tpu.matmul %4, %5, %cst {dimension_numbers = #tpu.dot_dimension_numbers<[1], [0], [0], [1], [0, 0, 1, 1], [], []>} : vector<16x512xf32>, vector<512x128xf32>, vector<16x128xf32> -> vector<16x128xf32>
    %7 = arith.addf %3, %6 : vector<16x128xf32>
    %c0_6 = arith.constant 0 : index
    %c0_7 = arith.constant 0 : index
    %8 = vector.load %arg9[%c0_6, %c0_7] : memref<16x128xf32, #tpu.memory_space<vmem>>, vector<16x128xf32>
    tpu.vector_store %arg9[%c0_6, %c0_7], %7 {strides = array<i32>} : memref<16x128xf32, #tpu.memory_space<vmem>>, vector<16x128xf32>,
    %c0_i32_8 = arith.constant 0 : i32
    %9 = arith.cmpi eq, %arg1, %c0_i32_8 : i32
    %10 = arith.extui %9 : i1 to i32
    %c0_i32_9 = arith.constant 0 : i32
    %11 = arith.cmpi ne, %10, %c0_i32_9 : i32
    scf.if %11 {
      %c0_10 = arith.constant 0 : index
      %c0_11 = arith.constant 0 : index
      %12 = vector.load %arg9[%c0_10, %c0_11] : memref<16x128xf32, #tpu.memory_space<vmem>>, vector<16x128xf32>
      %c0_12 = arith.constant 0 : index
      %c0_13 = arith.constant 0 : index
      %13 = vector.load %arg4[%c0_12, %c0_13] : memref<1x128xf32, #tpu.memory_space<vmem>>, vector<1x128xf32>
      %14 = vector.broadcast %13 : vector<1x128xf32> to vector<16x128xf32>
      %15 = arith.addf %12, %14 : vector<16x128xf32>
      %c0_14 = arith.constant 0 : index
      %c0_15 = arith.constant 0 : index
      %16 = vector.load %arg5[%c0_14, %c0_15] : memref<16x128xf32, #tpu.memory_space<vmem>>, vector<16x128xf32>
      %17 = arith.addf %15, %16 : vector<16x128xf32>
      %cst_16 = arith.constant dense<0.000000e+00> : vector<16xf32>
      %18 = vector.multi_reduction <add>, %17, %cst_16 [1] : vector<16x128xf32> to vector<16xf32>
      %19 = vector.shape_cast %18 : vector<16xf32> to vector<16x1xf32>
      %cst_17 = arith.constant 1.280000e+02 : f32
      %20 = vector.broadcast %cst_17 : f32 to vector<16x1xf32>
      %21 = arith.divf %19, %20 : vector<16x1xf32>
      %22 = vector.broadcast %21 : vector<16x1xf32> to vector<16x128xf32>
      %23 = arith.subf %17, %22 : vector<16x128xf32>
      %24 = arith.mulf %23, %23 : vector<16x128xf32>
      %cst_18 = arith.constant dense<0.000000e+00> : vector<16xf32>
      %25 = vector.multi_reduction <add>, %24, %cst_18 [1] : vector<16x128xf32> to vector<16xf32>
      %26 = vector.shape_cast %25 : vector<16xf32> to vector<16x1xf32>
      %cst_19 = arith.constant 1.280000e+02 : f32
      %27 = vector.broadcast %cst_19 : f32 to vector<16x1xf32>
      %28 = arith.divf %26, %27 : vector<16x1xf32>
      %cst_20 = arith.constant 9.99999974E-6 : f32
      %29 = vector.broadcast %cst_20 : f32 to vector<16x1xf32>
      %30 = arith.addf %28, %29 : vector<16x1xf32>
      %31 = math.rsqrt %30 : vector<16x1xf32>
      %32 = vector.broadcast %31 : vector<16x1xf32> to vector<16x128xf32>
      %33 = arith.mulf %23, %32 : vector<16x128xf32>
      %c0_21 = arith.constant 0 : index
      %c0_22 = arith.constant 0 : index
      %34 = vector.load %arg6[%c0_21, %c0_22] : memref<1x128xf32, #tpu.memory_space<vmem>>, vector<1x128xf32>
      %35 = vector.broadcast %34 : vector<1x128xf32> to vector<16x128xf32>
      %36 = arith.mulf %33, %35 : vector<16x128xf32>
      %c0_23 = arith.constant 0 : index
      %c0_24 = arith.constant 0 : index
      %37 = vector.load %arg7[%c0_23, %c0_24] : memref<1x128xf32, #tpu.memory_space<vmem>>, vector<1x128xf32>
      %38 = vector.broadcast %37 : vector<1x128xf32> to vector<16x128xf32>
      %39 = arith.addf %36, %38 : vector<16x128xf32>
      %c0_25 = arith.constant 0 : index
      %c0_26 = arith.constant 0 : index
      %40 = vector.load %arg8[%c0_25, %c0_26] : memref<16x128xf32, #tpu.memory_space<vmem>>, vector<16x128xf32>
      tpu.vector_store %arg8[%c0_25, %c0_26], %39 {strides = array<i32>} : memref<16x128xf32, #tpu.memory_space<vmem>>, vector<16x128xf32>,
    } else {
    }
    return
  }
  func.func @transform_0(%arg0: i32, %arg1: i32) -> (i32, i32) {
    %c0_i32 = arith.constant 0 : i32
    return %arg0, %arg1 : i32, i32
  }
  func.func @transform_1(%arg0: i32, %arg1: i32) -> (i32, i32) {
    %c0_i32 = arith.constant 0 : i32
    %c0_i32_0 = arith.constant 0 : i32
    return %arg1, %c0_i32 : i32, i32
  }
  func.func @transform_2(%arg0: i32, %arg1: i32) -> (i32, i32) {
    %c0_i32 = arith.constant 0 : i32
    %c0_i32_0 = arith.constant 0 : i32
    %c0_i32_1 = arith.constant 0 : i32
    return %c0_i32, %c0_i32_0 : i32, i32
  }
  func.func @transform_3(%arg0: i32, %arg1: i32) -> (i32, i32) {
    %c0_i32 = arith.constant 0 : i32
    %c0_i32_0 = arith.constant 0 : i32
    return %arg0, %c0_i32 : i32, i32
  }
  func.func @transform_4(%arg0: i32, %arg1: i32) -> (i32, i32) {
    %c0_i32 = arith.constant 0 : i32
    %c0_i32_0 = arith.constant 0 : i32
    %c0_i32_1 = arith.constant 0 : i32
    return %c0_i32, %c0_i32_0 : i32, i32
  }
  func.func @transform_5(%arg0: i32, %arg1: i32) -> (i32, i32) {
    %c0_i32 = arith.constant 0 : i32
    %c0_i32_0 = arith.constant 0 : i32
    %c0_i32_1 = arith.constant 0 : i32
    return %c0_i32, %c0_i32_0 : i32, i32
  }
  func.func @transform_6(%arg0: i32, %arg1: i32) -> (i32, i32) {
    %c0_i32 = arith.constant 0 : i32
    %c0_i32_0 = arith.constant 0 : i32
    return %arg0, %c0_i32 : i32, i32
  }
}

module attributes {stable_mosaic.version = 11 : i64} {
  func.func @_ln_chain_kernel(%arg0: i32, %arg1: memref<16x128xf32, #tpu.memory_space<vmem>>, %arg2: memref<1x128xf32, #tpu.memory_space<vmem>>, %arg3: memref<1x128xf32, #tpu.memory_space<vmem>>, %arg4: memref<1x128xf32, #tpu.memory_space<vmem>>, %arg5: memref<1x128xf32, #tpu.memory_space<vmem>>, %arg6: memref<16x128xf32, #tpu.memory_space<vmem>>) attributes {dimension_semantics = [#tpu.dimension_semantics<parallel>], iteration_bounds = array<i64: 1>, scalar_prefetch = 0 : i64, scratch_operands = 0 : i64, tpu.core_type = #tpu.core_type<tc>, window_params = [{transform_indices = @transform_0, window_bounds = array<i64: 16, 128>}, {pipeline_mode = #tpu.pipeline_mode<synchronous>, transform_indices = @transform_1, window_bounds = array<i64: 1, 128>}, {pipeline_mode = #tpu.pipeline_mode<synchronous>, transform_indices = @transform_2, window_bounds = array<i64: 1, 128>}, {pipeline_mode = #tpu.pipeline_mode<synchronous>, transform_indices = @transform_3, window_bounds = array<i64: 1, 128>}, {pipeline_mode = #tpu.pipeline_mode<synchronous>, transform_indices = @transform_4, window_bounds = array<i64: 1, 128>}, {transform_indices = @transform_5, window_bounds = array<i64: 16, 128>}]} {
    %c0 = arith.constant 0 : index
    %c0_0 = arith.constant 0 : index
    %0 = vector.load %arg1[%c0, %c0_0] : memref<16x128xf32, #tpu.memory_space<vmem>>, vector<16x128xf32>
    %c0_1 = arith.constant 0 : index
    %c0_2 = arith.constant 0 : index
    %1 = vector.load %arg2[%c0_1, %c0_2] : memref<1x128xf32, #tpu.memory_space<vmem>>, vector<1x128xf32>
    %c0_3 = arith.constant 0 : index
    %c0_4 = arith.constant 0 : index
    %2 = vector.load %arg3[%c0_3, %c0_4] : memref<1x128xf32, #tpu.memory_space<vmem>>, vector<1x128xf32>
    %cst = arith.constant dense<0.000000e+00> : vector<16xf32>
    %3 = vector.multi_reduction <add>, %0, %cst [1] : vector<16x128xf32> to vector<16xf32>
    %4 = vector.shape_cast %3 : vector<16xf32> to vector<16x1xf32>
    %cst_5 = arith.constant 1.280000e+02 : f32
    %5 = vector.broadcast %cst_5 : f32 to vector<16x1xf32>
    %6 = arith.divf %4, %5 : vector<16x1xf32>
    %7 = vector.broadcast %6 : vector<16x1xf32> to vector<16x128xf32>
    %8 = arith.subf %0, %7 : vector<16x128xf32>
    %9 = arith.mulf %8, %8 : vector<16x128xf32>
    %cst_6 = arith.constant dense<0.000000e+00> : vector<16xf32>
    %10 = vector.multi_reduction <add>, %9, %cst_6 [1] : vector<16x128xf32> to vector<16xf32>
    %11 = vector.shape_cast %10 : vector<16xf32> to vector<16x1xf32>
    %cst_7 = arith.constant 1.280000e+02 : f32
    %12 = vector.broadcast %cst_7 : f32 to vector<16x1xf32>
    %13 = arith.divf %11, %12 : vector<16x1xf32>
    %cst_8 = arith.constant 9.99999974E-6 : f32
    %14 = vector.broadcast %cst_8 : f32 to vector<16x1xf32>
    %15 = arith.addf %13, %14 : vector<16x1xf32>
    %16 = math.rsqrt %15 : vector<16x1xf32>
    %17 = vector.broadcast %16 : vector<16x1xf32> to vector<16x128xf32>
    %18 = arith.mulf %8, %17 : vector<16x128xf32>
    %19 = vector.broadcast %1 : vector<1x128xf32> to vector<16x128xf32>
    %20 = arith.mulf %18, %19 : vector<16x128xf32>
    %21 = vector.broadcast %2 : vector<1x128xf32> to vector<16x128xf32>
    %22 = arith.addf %20, %21 : vector<16x128xf32>
    %c0_9 = arith.constant 0 : index
    %c0_10 = arith.constant 0 : index
    %23 = vector.load %arg4[%c0_9, %c0_10] : memref<1x128xf32, #tpu.memory_space<vmem>>, vector<1x128xf32>
    %c0_11 = arith.constant 0 : index
    %c0_12 = arith.constant 0 : index
    %24 = vector.load %arg5[%c0_11, %c0_12] : memref<1x128xf32, #tpu.memory_space<vmem>>, vector<1x128xf32>
    %cst_13 = arith.constant dense<0.000000e+00> : vector<16xf32>
    %25 = vector.multi_reduction <add>, %22, %cst_13 [1] : vector<16x128xf32> to vector<16xf32>
    %26 = vector.shape_cast %25 : vector<16xf32> to vector<16x1xf32>
    %cst_14 = arith.constant 1.280000e+02 : f32
    %27 = vector.broadcast %cst_14 : f32 to vector<16x1xf32>
    %28 = arith.divf %26, %27 : vector<16x1xf32>
    %29 = vector.broadcast %28 : vector<16x1xf32> to vector<16x128xf32>
    %30 = arith.subf %22, %29 : vector<16x128xf32>
    %31 = arith.mulf %30, %30 : vector<16x128xf32>
    %cst_15 = arith.constant dense<0.000000e+00> : vector<16xf32>
    %32 = vector.multi_reduction <add>, %31, %cst_15 [1] : vector<16x128xf32> to vector<16xf32>
    %33 = vector.shape_cast %32 : vector<16xf32> to vector<16x1xf32>
    %cst_16 = arith.constant 1.280000e+02 : f32
    %34 = vector.broadcast %cst_16 : f32 to vector<16x1xf32>
    %35 = arith.divf %33, %34 : vector<16x1xf32>
    %cst_17 = arith.constant 9.99999974E-6 : f32
    %36 = vector.broadcast %cst_17 : f32 to vector<16x1xf32>
    %37 = arith.addf %35, %36 : vector<16x1xf32>
    %38 = math.rsqrt %37 : vector<16x1xf32>
    %39 = vector.broadcast %38 : vector<16x1xf32> to vector<16x128xf32>
    %40 = arith.mulf %30, %39 : vector<16x128xf32>
    %41 = vector.broadcast %23 : vector<1x128xf32> to vector<16x128xf32>
    %42 = arith.mulf %40, %41 : vector<16x128xf32>
    %43 = vector.broadcast %24 : vector<1x128xf32> to vector<16x128xf32>
    %44 = arith.addf %42, %43 : vector<16x128xf32>
    %c0_18 = arith.constant 0 : index
    %c0_19 = arith.constant 0 : index
    %45 = vector.load %arg6[%c0_18, %c0_19] : memref<16x128xf32, #tpu.memory_space<vmem>>, vector<16x128xf32>
    tpu.vector_store %arg6[%c0_18, %c0_19], %44 {strides = array<i32>} : memref<16x128xf32, #tpu.memory_space<vmem>>, vector<16x128xf32>,
    return
  }
  func.func @transform_0(%arg0: i32) -> (i32, i32) {
    %c0_i32 = arith.constant 0 : i32
    %c0_i32_0 = arith.constant 0 : i32
    return %arg0, %c0_i32 : i32, i32
  }
  func.func @transform_1(%arg0: i32) -> (i32, i32) {
    %c0_i32 = arith.constant 0 : i32
    %c0_i32_0 = arith.constant 0 : i32
    %c0_i32_1 = arith.constant 0 : i32
    return %c0_i32, %c0_i32_0 : i32, i32
  }
  func.func @transform_2(%arg0: i32) -> (i32, i32) {
    %c0_i32 = arith.constant 0 : i32
    %c0_i32_0 = arith.constant 0 : i32
    %c0_i32_1 = arith.constant 0 : i32
    return %c0_i32, %c0_i32_0 : i32, i32
  }
  func.func @transform_3(%arg0: i32) -> (i32, i32) {
    %c0_i32 = arith.constant 0 : i32
    %c0_i32_0 = arith.constant 0 : i32
    %c0_i32_1 = arith.constant 0 : i32
    return %c0_i32, %c0_i32_0 : i32, i32
  }
  func.func @transform_4(%arg0: i32) -> (i32, i32) {
    %c0_i32 = arith.constant 0 : i32
    %c0_i32_0 = arith.constant 0 : i32
    %c0_i32_1 = arith.constant 0 : i32
    return %c0_i32, %c0_i32_0 : i32, i32
  }
  func.func @transform_5(%arg0: i32) -> (i32, i32) {
    %c0_i32 = arith.constant 0 : i32
    %c0_i32_0 = arith.constant 0 : i32
    return %arg0, %c0_i32 : i32, i32
  }
}

module attributes {stable_mosaic.version = 11 : i64} {
  func.func @_linear_kernel(%arg0: i32, %arg1: i32, %arg2: i32, %arg3: memref<16x128xf32, #tpu.memory_space<vmem>>, %arg4: memref<128x128xf32, #tpu.memory_space<vmem>>, %arg5: memref<1x128xf32, #tpu.memory_space<vmem>>, %arg6: memref<16x128xf32, #tpu.memory_space<vmem>>, %arg7: memref<16x128xf32, #tpu.memory_space<vmem>>) attributes {dimension_semantics = [#tpu.dimension_semantics<parallel>, #tpu.dimension_semantics<parallel>, #tpu.dimension_semantics<arbitrary>], iteration_bounds = array<i64: 1, 1, 1>, scalar_prefetch = 0 : i64, scratch_operands = 1 : i64, tpu.core_type = #tpu.core_type<tc>, window_params = [{transform_indices = @transform_0, window_bounds = array<i64: 16, 128>}, {transform_indices = @transform_1, window_bounds = array<i64: 128, 128>}, {transform_indices = @transform_2, window_bounds = array<i64: 1, 128>}, {transform_indices = @transform_3, window_bounds = array<i64: 16, 128>}]} {
    %c0_i32 = arith.constant 0 : i32
    %0 = arith.cmpi eq, %arg2, %c0_i32 : i32
    %1 = arith.extui %0 : i1 to i32
    %c0_i32_0 = arith.constant 0 : i32
    %2 = arith.cmpi ne, %1, %c0_i32_0 : i32
    scf.if %2 {
      %cst_10 = arith.constant 0.000000e+00 : f32
      %12 = vector.broadcast %cst_10 : f32 to vector<16x128xf32>
      %c0_11 = arith.constant 0 : index
      %c0_12 = arith.constant 0 : index
      %13 = vector.load %arg7[%c0_11, %c0_12] : memref<16x128xf32, #tpu.memory_space<vmem>>, vector<16x128xf32>
      tpu.vector_store %arg7[%c0_11, %c0_12], %12 {strides = array<i32>} : memref<16x128xf32, #tpu.memory_space<vmem>>, vector<16x128xf32>,
    } else {
    }
    %c0 = arith.constant 0 : index
    %c0_1 = arith.constant 0 : index
    %3 = vector.load %arg7[%c0, %c0_1] : memref<16x128xf32, #tpu.memory_space<vmem>>, vector<16x128xf32>
    %c0_2 = arith.constant 0 : index
    %c0_3 = arith.constant 0 : index
    %4 = vector.load %arg3[%c0_2, %c0_3] : memref<16x128xf32, #tpu.memory_space<vmem>>, vector<16x128xf32>
    %c0_4 = arith.constant 0 : index
    %c0_5 = arith.constant 0 : index
    %5 = vector.load %arg4[%c0_4, %c0_5] : memref<128x128xf32, #tpu.memory_space<vmem>>, vector<128x128xf32>
    %cst = arith.constant dense<0.000000e+00> : vector<16x128xf32>
    %6 = tpu.matmul %4, %5, %cst {dimension_numbers = #tpu.dot_dimension_numbers<[1], [0], [0], [1], [0, 0, 1, 1], [], []>} : vector<16x128xf32>, vector<128x128xf32>, vector<16x128xf32> -> vector<16x128xf32>
    %7 = arith.addf %3, %6 : vector<16x128xf32>
    %c0_6 = arith.constant 0 : index
    %c0_7 = arith.constant 0 : index
    %8 = vector.load %arg7[%c0_6, %c0_7] : memref<16x128xf32, #tpu.memory_space<vmem>>, vector<16x128xf32>
    tpu.vector_store %arg7[%c0_6, %c0_7], %7 {strides = array<i32>} : memref<16x128xf32, #tpu.memory_space<vmem>>, vector<16x128xf32>,
    %c0_i32_8 = arith.constant 0 : i32
    %9 = arith.cmpi eq, %arg2, %c0_i32_8 : i32
    %10 = arith.extui %9 : i1 to i32
    %c0_i32_9 = arith.constant 0 : i32
    %11 = arith.cmpi ne, %10, %c0_i32_9 : i32
    scf.if %11 {
      %c0_10 = arith.constant 0 : index
      %c0_11 = arith.constant 0 : index
      %12 = vector.load %arg7[%c0_10, %c0_11] : memref<16x128xf32, #tpu.memory_space<vmem>>, vector<16x128xf32>
      %c0_12 = arith.constant 0 : index
      %c0_13 = arith.constant 0 : index
      %13 = vector.load %arg5[%c0_12, %c0_13] : memref<1x128xf32, #tpu.memory_space<vmem>>, vector<1x128xf32>
      %14 = vector.broadcast %13 : vector<1x128xf32> to vector<16x128xf32>
      %15 = arith.addf %12, %14 : vector<16x128xf32>
      %c0_14 = arith.constant 0 : index
      %c0_15 = arith.constant 0 : index
      %16 = vector.load %arg6[%c0_14, %c0_15] : memref<16x128xf32, #tpu.memory_space<vmem>>, vector<16x128xf32>
      tpu.vector_store %arg6[%c0_14, %c0_15], %15 {strides = array<i32>} : memref<16x128xf32, #tpu.memory_space<vmem>>, vector<16x128xf32>,
    } else {
    }
    return
  }
  func.func @transform_0(%arg0: i32, %arg1: i32, %arg2: i32) -> (i32, i32) {
    %c0_i32 = arith.constant 0 : i32
    return %arg0, %arg2 : i32, i32
  }
  func.func @transform_1(%arg0: i32, %arg1: i32, %arg2: i32) -> (i32, i32) {
    %c0_i32 = arith.constant 0 : i32
    return %arg2, %arg1 : i32, i32
  }
  func.func @transform_2(%arg0: i32, %arg1: i32, %arg2: i32) -> (i32, i32) {
    %c0_i32 = arith.constant 0 : i32
    %c0_i32_0 = arith.constant 0 : i32
    return %c0_i32, %arg1 : i32, i32
  }
  func.func @transform_3(%arg0: i32, %arg1: i32, %arg2: i32) -> (i32, i32) {
    %c0_i32 = arith.constant 0 : i32
    return %arg0, %arg1 : i32, i32
  }
}

</mosaic_0001>

<bundles_post_ra>
// kernel: gpt_forward.25
= control target key start
LH: loop header
LB: loop body
LE: loop exit
PB: predicated region body
PF: predicated region fallthrough
CT: control target
= control target key end

     0   :  { %s308_s1 = inlined_call_operand.vmem [shape: f32[128,128], index: 1, kind: input, shape index: {}]   ;;  %s309_s0 = inlined_call_operand.vmem [shape: f32[16,128], index: 0, kind: input, shape index: {}]   ;;  %s310_s2 = inlined_call_operand.vmem [shape: f32[1,128], index: 2, kind: input, shape index: {}]   ;;  %s311_s3 = inlined_call_operand.vmem [shape: f32[16,128], index: 3, kind: output, shape index: {}]  }
   0x1   :  { %v24_v0 = vld [vmem:[%s308_s1] sm:$0xff]  ;;  %v25_v1 = vld [vmem:[%s308_s1 + $0x8] sm:$0xff]  ;;  %v26_v2 = vld [vmem:[%s308_s1 + $0x10] sm:$0xff] }
   0x2   :  { %v193_v3 = vpack.c.bf16 %v25_v1, %v24_v0  ;;  %v27_v4 = vld [vmem:[%s308_s1 + $0x18] sm:$0xff]  ;;  %v28_v6 = vld [vmem:[%s308_s1 + $0x20] sm:$0xff]  ;;  %v29_v7 = vld [vmem:[%s308_s1 + $0x28] sm:$0xff] }
   0x3   :  { %v197_v5 = vpack.c.bf16 %v27_v4, %v26_v2  ;;  %v201_v8 = vpack.c.bf16 %v29_v7, %v28_v6  ;;  %v22_v9 = vld [vmem:[%s309_s0] sm:$0xff]  ;;  %v30_v10 = vld [vmem:[%s308_s1 + $0x30] sm:$0xff]  ;;  %v31_v11 = vld [vmem:[%s308_s1 + $0x38] sm:$0xff] }
   0x4   :  { %194 = vmatprep.subr.bf16.mxu0 %v193_v3  ;;  %190 = vmatprep.mubr.f32.mxu0 %v22_v9  ;;  %v205_v12 = vpack.c.bf16 %v31_v11, %v30_v10  ;;  %v32_v13 = vld [vmem:[%s308_s1 + $0x40] sm:$0xff]  ;;  %v33_v14 = vld [vmem:[%s308_s1 + $0x48] sm:$0xff]  ;;  %v34_v16 = vld [vmem:[%s308_s1 + $0x50] sm:$0xff] }
   0x5   :  { %196 = vmatpush3.bf16.msra.mxu0 %v193_v3  ;;  %v209_v15 = vpack.c.bf16 %v33_v14, %v32_v13  ;;  %v35_v17 = vld [vmem:[%s308_s1 + $0x58] sm:$0xff]  ;;  %v36_v19 = vld [vmem:[%s308_s1 + $0x60] sm:$0xff]  ;;  %v37_v20 = vld [vmem:[%s308_s1 + $0x68] sm:$0xff] }
   0x6   :  { %198 = vmatprep.subr.bf16.mxu0 %v197_v5  ;;  %v213_v18 = vpack.c.bf16 %v35_v17, %v34_v16  ;;  %v217_v21 = vpack.c.bf16 %v37_v20, %v36_v19  ;;  %v38_v22 = vld [vmem:[%s308_s1 + $0x70] sm:$0xff]  ;;  %v39_v23 = vld [vmem:[%s308_s1 + $0x78] sm:$0xff]  ;;  %v23_v25 = vld [vmem:[%s309_s0 + $0x8] sm:$0xff] }
   0x7   :  { %v221_v24 = vpack.c.bf16 %v39_v23, %v38_v22  ;;  %v139_v26 = vld [vmem:[%s310_s2] ss:$0 sm:$0xff] }
   0x9   :  { %200 = vmatpush3.bf16.msra.mxu0 %v197_v5 }
   0xa   :  { %202 = vmatprep.subr.bf16.mxu0 %v201_v8 }
   0xd   :  { %204 = vmatpush3.bf16.msra.mxu0 %v201_v8 }
   0xe   :  { %206 = vmatprep.subr.bf16.mxu0 %v205_v12 }
  0x11   :  { %208 = vmatpush3.bf16.msra.mxu0 %v205_v12 }
  0x12   :  { %210 = vmatprep.subr.bf16.mxu0 %v209_v15 }
  0x15   :  { %212 = vmatpush3.bf16.msra.mxu0 %v209_v15 }
  0x16   :  { %214 = vmatprep.subr.bf16.mxu0 %v213_v18 }
  0x19   :  { %216 = vmatpush3.bf16.msra.mxu0 %v213_v18 }
  0x1a   :  { %218 = vmatprep.subr.bf16.mxu0 %v217_v21 }
  0x1d   :  { %220 = vmatpush3.bf16.msra.mxu0 %v217_v21 }
  0x1e   :  { %222 = vmatprep.subr.bf16.mxu0 %v221_v24 }
  0x21   :  { %224 = vmatpush3.bf16.msra.mxu0 %v221_v24 }
  0x24   :  { %191 = vmatmul.mubr.f32.vlgmr.msra.gmra.mrb[0].mxu0 %v23_v25 }
  0xf7   :  { %v192_v27 = vpop.f32.mrb[0].mxu0 }
  0xf8   :  { %v132_v28 = vadd.f32 %v192_v27, %v139_v26  ;;  %v106_v29 = vpop.f32.mrb[1].mxu0 }
  0xf9   :  { %v131_v30 = vadd.f32 %v139_v26, %v106_v29 }
  0xfa   :  { %134 = vst [vmem:[%s311_s3 + $0x8] sm:$0xff] %v132_v28 }
  0xfb   :  { %133 = vst [vmem:[%s311_s3] sm:$0xff] %v131_v30 }

// kernel: gpt_forward.24
= control target key start
LH: loop header
LB: loop body
LE: loop exit
PB: predicated region body
PF: predicated region fallthrough
CT: control target
= control target key end

     0   :  { %s395_s1 = inlined_call_operand.vmem [shape: f32[128,128], index: 1, kind: input, shape index: {}]   ;;  %s396_s0 = inlined_call_operand.vmem [shape: f32[16,128], index: 0, kind: input, shape index: {}]   ;;  %s397_s2 = inlined_call_operand.vmem [shape: f32[1,128], index: 2, kind: input, shape index: {}]   ;;  %s398_s3 = inlined_call_operand.vmem [shape: f32[16,128], index: 3, kind: input, shape index: {}]   ;;  %s399_s4 = inlined_call_operand.vmem [shape: f32[1,128], index: 4, kind: input, shape index: {}]   ;;  %s400_s5 = inlined_call_operand.vmem [shape: f32[1,128], index: 5, kind: input, shape index: {}]   ;;  %s401_s6 = inlined_call_operand.vmem [shape: f32[16,128], index: 6, kind: output, shape index: {}]  }
   0x1   :  { %v33_v0 = vld [vmem:[%s395_s1] sm:$0xff]  ;;  %v34_v1 = vld [vmem:[%s395_s1 + $0x8] sm:$0xff]  ;;  %v35_v2 = vld [vmem:[%s395_s1 + $0x10] sm:$0xff] }
   0x2   :  { %v249_v3 = vpack.c.bf16 %v34_v1, %v33_v0  ;;  %v36_v4 = vld [vmem:[%s395_s1 + $0x18] sm:$0xff]  ;;  %v37_v6 = vld [vmem:[%s395_s1 + $0x20] sm:$0xff]  ;;  %v38_v7 = vld [vmem:[%s395_s1 + $0x28] sm:$0xff] }
   0x3   :  { %v253_v5 = vpack.c.bf16 %v36_v4, %v35_v2  ;;  %v257_v8 = vpack.c.bf16 %v38_v7, %v37_v6  ;;  %v31_v9 = vld [vmem:[%s396_s0] sm:$0xff]  ;;  %v39_v10 = vld [vmem:[%s395_s1 + $0x30] sm:$0xff]  ;;  %v40_v11 = vld [vmem:[%s395_s1 + $0x38] sm:$0xff] }
   0x4   :  { %250 = vmatprep.subr.bf16.mxu0 %v249_v3  ;;  %246 = vmatprep.mubr.f32.mxu0 %v31_v9  ;;  %v261_v12 = vpack.c.bf16 %v40_v11, %v39_v10  ;;  %v41_v13 = vld [vmem:[%s395_s1 + $0x40] sm:$0xff]  ;;  %v42_v14 = vld [vmem:[%s395_s1 + $0x48] sm:$0xff]  ;;  %v43_v16 = vld [vmem:[%s395_s1 + $0x50] sm:$0xff] }
   0x5   :  { %252 = vmatpush3.bf16.msra.mxu0 %v249_v3  ;;  %v265_v15 = vpack.c.bf16 %v42_v14, %v41_v13  ;;  %v44_v17 = vld [vmem:[%s395_s1 + $0x58] sm:$0xff]  ;;  %v45_v19 = vld [vmem:[%s395_s1 + $0x60] sm:$0xff]  ;;  %v46_v20 = vld [vmem:[%s395_s1 + $0x68] sm:$0xff] }
   0x6   :  { %254 = vmatprep.subr.bf16.mxu0 %v253_v5  ;;  %v269_v18 = vpack.c.bf16 %v44_v17, %v43_v16  ;;  %v273_v21 = vpack.c.bf16 %v46_v20, %v45_v19  ;;  %v47_v22 = vld [vmem:[%s395_s1 + $0x70] sm:$0xff]  ;;  %v48_v23 = vld [vmem:[%s395_s1 + $0x78] sm:$0xff]  ;;  %v32_v25 = vld [vmem:[%s396_s0 + $0x8] sm:$0xff] }
   0x7   :  { %v277_v24 = vpack.c.bf16 %v48_v23, %v47_v22  ;;  %v193_v26 = vld [vmem:[%s397_s2] ss:$0 sm:$0xff]  ;;  %v143_v33 = vld [vmem:[%s398_s3 + $0x8] sm:$0xff] }
   0x8   :  { %v142_v29 = vld [vmem:[%s398_s3] sm:$0xff] }
   0x9   :  { %256 = vmatpush3.bf16.msra.mxu0 %v253_v5  ;;  %v194_v50 = vld [vmem:[%s399_s4] ss:$0 sm:$0xff] }
   0xa   :  { %258 = vmatprep.subr.bf16.mxu0 %v257_v8  ;;  %v195_v52 = vld [vmem:[%s400_s5] ss:$0 sm:$0xff] }
   0xd   :  { %260 = vmatpush3.bf16.msra.mxu0 %v257_v8 }
   0xe   :  { %262 = vmatprep.subr.bf16.mxu0 %v261_v12 }
  0x11   :  { %264 = vmatpush3.bf16.msra.mxu0 %v261_v12 }
  0x12   :  { %266 = vmatprep.subr.bf16.mxu0 %v265_v15 }
  0x15   :  { %268 = vmatpush3.bf16.msra.mxu0 %v265_v15 }
  0x16   :  { %270 = vmatprep.subr.bf16.mxu0 %v269_v18 }
  0x19   :  { %272 = vmatpush3.bf16.msra.mxu0 %v269_v18 }
  0x1a   :  { %274 = vmatprep.subr.bf16.mxu0 %v273_v21 }
  0x1d   :  { %276 = vmatpush3.bf16.msra.mxu0 %v273_v21 }
  0x1e   :  { %278 = vmatprep.subr.bf16.mxu0 %v277_v24 }
  0x21   :  { %280 = vmatpush3.bf16.msra.mxu0 %v277_v24 }
  0x24   :  { %247 = vmatmul.mubr.f32.vlgmr.msra.gmra.mrb[0].mxu0 %v32_v25 }
  0xf7   :  { %v248_v27 = vpop.f32.mrb[0].mxu0 }
  0xf8   :  { %v115_v28 = vpop.f32.mrb[1].mxu0  ;;  %v141_v31 = vadd.f32 %v248_v27, %v193_v26 }
  0xf9   :  { %v140_v30 = vadd.f32 %v193_v26, %v115_v28 }
  0xfa   :  { %v145_v34 = vadd.f32 %v143_v33, %v141_v31 }
  0xfb   :  { %v144_v32 = vadd.f32 %v142_v29, %v140_v30 }
  0xfd   :  { %146 = vadd.xlane.f32.xlu0 %v144_v32 }
 0x101   :  { %148 = vadd.xlane.f32.xlu0 %v145_v34 }
 0x18a   :  { %v147_v35 = vpop.xlane.xlu0 %146 }
 0x18b   :  { %v151_v36 = vmul.f32 0.0078125, %v147_v35 }
 0x18d   :  { %v153_v37 = vsub.f32 %v144_v32, %v151_v36 }
 0x18e   :  { %v149_v38 = vpop.xlane.xlu0 %148 }
 0x18f   :  { %v152_v39 = vmul.f32 0.0078125, %v149_v38  ;;  %v155_v40 = vmul.f32 %v153_v37, %v153_v37 }
 0x191   :  { %v154_v41 = vsub.f32 %v145_v34, %v152_v39  ;;  %157 = vadd.xlane.f32.xlu1 %v155_v40 }
 0x193   :  { %v156_v42 = vmul.f32 %v154_v41, %v154_v41 }
 0x195   :  { %159 = vadd.xlane.f32.xlu1 %v156_v42 }
 0x21e   :  { %v158_v43 = vpop.xlane.xlu1 %157 }
 0x21f   :  { %v161_v44 = vmul.f32 0.0078125, %v158_v43 }
 0x221   :  { %v163_v45 = vadd.f32 1e-05, %v161_v44 }
 0x222   :  { %v160_v46 = vpop.xlane.xlu1 %159 }
 0x223   :  { %281 = vrsqrt.f32 %v163_v45  ;;  %v162_v47 = vmul.f32 0.0078125, %v160_v46 }
 0x225   :  { %v164_v48 = vadd.f32 1e-05, %v162_v47 }
 0x227   :  { %283 = vrsqrt.f32 %v164_v48 }
 0x22d   :  { %v282_v49 = vpop.eup %281 }
 0x22e   :  { %v167_v51 = vmul.f32 %v282_v49, %v153_v37 }
 0x230   :  { %v176_v53 = vmul.f32 %v194_v50, %v167_v51 }
 0x231   :  { %v284_v54 = vpop.eup %283 }
 0x232   :  { %v185_v55 = vadd.f32 %v195_v52, %v176_v53  ;;  %v168_v56 = vmul.f32 %v284_v54, %v154_v41 }
 0x234   :  { %187 = vst [vmem:[%s401_s6] sm:$0xff] %v185_v55  ;;  %v177_v57 = vmul.f32 %v194_v50, %v168_v56 }
 0x236   :  { %v186_v58 = vadd.f32 %v195_v52, %v177_v57 }
 0x238   :  { %188 = vst [vmem:[%s401_s6 + $0x8] sm:$0xff] %v186_v58 }

// kernel: gpt_forward.22
= control target key start
LH: loop header
LB: loop body
LE: loop exit
PB: predicated region body
PF: predicated region fallthrough
CT: control target
= control target key end

     0   :  { %v404_v3 = vmov 0.0   ;;  %s598_s1 = inlined_call_operand.vmem [shape: f32[128,384], index: 1, kind: input, shape index: {}]   ;;  %s599_s0 = inlined_call_operand.vmem [shape: f32[16,128], index: 0, kind: input, shape index: {}]   ;;  %s600_s2 = inlined_call_operand.vmem [shape: f32[1,384], index: 2, kind: input, shape index: {}]   ;;  %s601_s3 = inlined_call_operand.vmem [shape: f32[16,384], index: 3, kind: output, shape index: {}]  }
   0x1   :  { %v33_v0 = vld [vmem:[%s598_s1 + $0x8] sm:$0xff]  ;;  %v36_v1 = vld [vmem:[%s598_s1 + $0x20] sm:$0xff]  ;;  %144 = vmatprep.mubr.f32.mxu0 %v404_v3  ;;  %v35_v5 = vld [vmem:[%s598_s1 + $0x18] sm:$0xff] }
   0x2   :  { %v32_v2 = vld [vmem:[%s598_s1] sm:$0xff]  ;;  %v339_v4 = vpack.c.bf16 %v36_v1, %v33_v0  ;;  %v34_v6 = vld [vmem:[%s598_s1 + $0x10] sm:$0xff]  ;;  %v37_v7 = vld [vmem:[%s598_s1 + $0x28] sm:$0xff] }
   0x3   :  { %v341_v8 = vpack.c.bf16 %v35_v5, %v32_v2  ;;  %v371_v9 = vpack.c.bf16 %v37_v7, %v34_v6  ;;  %v39_v10 = vld [vmem:[%s598_s1 + $0x38] sm:$0xff]  ;;  %v42_v11 = vld [vmem:[%s598_s1 + $0x50] sm:$0xff]  ;;  %v41_v14 = vld [vmem:[%s598_s1 + $0x48] sm:$0xff] }
   0x4   :  { %v38_v12 = vld [vmem:[%s598_s1 + $0x30] sm:$0xff]  ;;  %340 = vmatprep.subr.bf16.mxu0 %v339_v4  ;;  %v343_v13 = vpack.c.bf16 %v42_v11, %v39_v10  ;;  %v40_v15 = vld [vmem:[%s598_s1 + $0x40] sm:$0xff]  ;;  %v43_v16 = vld [vmem:[%s598_s1 + $0x58] sm:$0xff] }
   0x5   :  { %342 = vmatpush1.bf16.msra.mxu0 %v341_v8  ;;  %372 = vmatprep.subr.bf16.mxu1 %v371_v9  ;;  %v345_v17 = vpack.c.bf16 %v41_v14, %v38_v12  ;;  %v375_v18 = vpack.c.bf16 %v43_v16, %v40_v15  ;;  %v45_v19 = vld [vmem:[%s598_s1 + $0x68] sm:$0xff]  ;;  %v48_v20 = vld [vmem:[%s598_s1 + $0x80] sm:$0xff]  ;;  %v47_v23 = vld [vmem:[%s598_s1 + $0x78] sm:$0xff]  ;;  %v255_v12 = vlaneseq }
   0x6   :  { %v44_v21 = vld [vmem:[%s598_s1 + $0x60] sm:$0xff]  ;;  %344 = vmatprep.subr.bf16.mxu0 %v343_v13  ;;  %374 = vmatpush3.bf16.msra.mxu1 %v371_v9  ;;  %v347_v22 = vpack.c.bf16 %v48_v20, %v45_v19  ;;  %v46_v24 = vld [vmem:[%s598_s1 + $0x70] sm:$0xff]  ;;  %v49_v25 = vld [vmem:[%s598_s1 + $0x88] sm:$0xff] }
   0x7   :  { %376 = vmatprep.subr.bf16.mxu1 %v375_v18  ;;  %v379_v26 = vpack.c.bf16 %v49_v25, %v46_v24  ;;  %v51_v27 = vld [vmem:[%s598_s1 + $0x98] sm:$0xff]  ;;  %v54_v28 = vld [vmem:[%s598_s1 + $0xb0] sm:$0xff]  ;;  %v52_v29 = vld [vmem:[%s598_s1 + $0xa0] sm:$0xff]  ;;  %v349_v31 = vpack.c.bf16 %v47_v23, %v44_v21  ;;  %v256_v13 = vshrl.u32 %v255_v12, 7 }
   0x8   :  { %v55_v30 = vld [vmem:[%s598_s1 + $0xb8] sm:$0xff]  ;;  %v351_v32 = vpack.c.bf16 %v54_v28, %v51_v27  ;;  %v50_v33 = vld [vmem:[%s598_s1 + $0x90] sm:$0xff]  ;;  %v53_v34 = vld [vmem:[%s598_s1 + $0xa8] sm:$0xff] }
   0x9   :  { %346 = vmatpush1.bf16.msra.mxu0 %v345_v17  ;;  %v383_v35 = vpack.c.bf16 %v55_v30, %v52_v29  ;;  %v57_v36 = vld [vmem:[%s598_s1 + $0xc8] sm:$0xff]  ;;  %v60_v37 = vld [vmem:[%s598_s1 + $0xe0] sm:$0xff]  ;;  %v58_v38 = vld [vmem:[%s598_s1 + $0xd0] sm:$0xff]  ;;  %v353_v40 = vpack.c.bf16 %v53_v34, %v50_v33  ;;  %v257_v14 = vsub.s32 0, %v256_v13  ;;  %v261_v16 = vsub.s32 1, %v256_v13 }
   0xa   :  { %348 = vmatprep.subr.bf16.mxu0 %v347_v22  ;;  %378 = vmatpush3.bf16.msra.mxu1 %v375_v18  ;;  %v61_v39 = vld [vmem:[%s598_s1 + $0xe8] sm:$0xff]  ;;  %v355_v41 = vpack.c.bf16 %v60_v37, %v57_v36  ;;  %v56_v42 = vld [vmem:[%s598_s1 + $0xc0] sm:$0xff]  ;;  %v59_v43 = vld [vmem:[%s598_s1 + $0xd8] sm:$0xff]  ;;  %v265_v17 = vsub.s32 2, %v256_v13 }
   0xb   :  { %380 = vmatprep.subr.bf16.mxu1 %v379_v26  ;;  %v387_v44 = vpack.c.bf16 %v61_v39, %v58_v38  ;;  %v63_v45 = vld [vmem:[%s598_s1 + $0xf8] sm:$0xff]  ;;  %v66_v46 = vld [vmem:[%s598_s1 + $0x110] sm:$0xff]  ;;  %v64_v47 = vld [vmem:[%s598_s1 + $0x100] sm:$0xff]  ;;  %v357_v49 = vpack.c.bf16 %v59_v43, %v56_v42 }
   0xc   :  { %v67_v48 = vld [vmem:[%s598_s1 + $0x118] sm:$0xff]  ;;  %v359_v50 = vpack.c.bf16 %v66_v46, %v63_v45  ;;  %v62_v51 = vld [vmem:[%s598_s1 + $0xf0] sm:$0xff]  ;;  %v65_v52 = vld [vmem:[%s598_s1 + $0x108] sm:$0xff] }
   0xd   :  { %350 = vmatpush1.bf16.msra.mxu0 %v349_v31  ;;  %v30_v53 = vld [vmem:[%s599_s0] sm:$0xff]  ;;  %v391_v54 = vpack.c.bf16 %v67_v48, %v64_v47  ;;  %v69_v55 = vld [vmem:[%s598_s1 + $0x128] sm:$0xff]  ;;  %v70_v57 = vld [vmem:[%s598_s1 + $0x130] sm:$0xff]  ;;  %v361_v59 = vpack.c.bf16 %v65_v52, %v62_v51 }
   0xe   :  { %352 = vmatprep.subr.bf16.mxu0 %v351_v32  ;;  %382 = vmatpush3.bf16.msra.mxu1 %v379_v26  ;;  %v72_v56 = vld [vmem:[%s598_s1 + $0x140] sm:$0xff]  ;;  %v73_v58 = vld [vmem:[%s598_s1 + $0x148] sm:$0xff]  ;;  %v71_v62 = vld [vmem:[%s598_s1 + $0x138] sm:$0xff] }
   0xf   :  { %384 = vmatprep.subr.bf16.mxu1 %v383_v35  ;;  %336 = vmatprep.mubr.f32.mxu1 %v30_v53  ;;  %v363_v60 = vpack.c.bf16 %v72_v56, %v69_v55  ;;  %v68_v61 = vld [vmem:[%s598_s1 + $0x120] sm:$0xff]  ;;  %v395_v63 = vpack.c.bf16 %v73_v58, %v70_v57  ;;  %v75_v0 = vld [vmem:[%s598_s1 + $0x158] sm:$0xff]  ;;  %v78_v1 = vld [vmem:[%s598_s1 + $0x170] sm:$0xff] }
  0x10   :  { %v76_v2 = vld [vmem:[%s598_s1 + $0x160] sm:$0xff]  ;;  %v79_v4 = vld [vmem:[%s598_s1 + $0x178] sm:$0xff]  ;;  %v365_v5 = vpack.c.bf16 %v71_v62, %v68_v61  ;;  %v367_v6 = vpack.c.bf16 %v78_v1, %v75_v0  ;;  %v74_v7 = vld [vmem:[%s598_s1 + $0x150] sm:$0xff] }
  0x11   :  { %354 = vmatpush1.bf16.msra.mxu0 %v353_v40  ;;  %v77_v8 = vld [vmem:[%s598_s1 + $0x168] sm:$0xff]  ;;  %v399_v9 = vpack.c.bf16 %v79_v4, %v76_v2  ;;  %v253_v15 = vld [vmem:[%s600_s2] sm:$0x7] }
  0x12   :  { %356 = vmatprep.subr.bf16.mxu0 %v355_v41  ;;  %386 = vmatpush3.bf16.msra.mxu1 %v383_v35  ;;  %v369_v10 = vpack.c.bf16 %v77_v8, %v74_v7  ;;  %v31_v11 = vld [vmem:[%s599_s0 + $0x8] sm:$0xff]  ;;  %v258_v18 = vrot.slane %v253_v15, %v257_v14  ;;  %v262_v19 = vrot.slane %v253_v15, %v261_v16 }
  0x13   :  { %388 = vmatprep.subr.bf16.mxu1 %v387_v44  ;;  %v266_v20 = vrot.slane %v253_v15, %v265_v17 }
  0x15   :  { %358 = vmatpush1.bf16.msra.mxu0 %v357_v49 }
  0x16   :  { %360 = vmatprep.subr.bf16.mxu0 %v359_v50  ;;  %390 = vmatpush3.bf16.msra.mxu1 %v387_v44 }
  0x17   :  { %392 = vmatprep.subr.bf16.mxu1 %v391_v54 }
  0x19   :  { %362 = vmatpush1.bf16.msra.mxu0 %v361_v59 }
  0x1a   :  { %364 = vmatprep.subr.bf16.mxu0 %v363_v60  ;;  %394 = vmatpush3.bf16.msra.mxu1 %v391_v54 }
  0x1b   :  { %396 = vmatprep.subr.bf16.mxu1 %v395_v63 }
  0x1d   :  { %366 = vmatpush1.bf16.msra.mxu0 %v365_v5 }
  0x1e   :  { %368 = vmatprep.subr.bf16.mxu0 %v367_v6  ;;  %398 = vmatpush3.bf16.msra.mxu1 %v395_v63 }
  0x1f   :  { %400 = vmatprep.subr.bf16.mxu1 %v399_v9 }
  0x21   :  { %370 = vmatpush1.bf16.msra.mxu0 %v369_v10 }
  0x22   :  { %402 = vmatpush3.bf16.msra.mxu1 %v399_v9 }
  0x24   :  { %145 = vmatmul.mubr.f32.vlgmr.msra.gmra.mrb[0].mxu0 %v30_v53 }
  0x25   :  { %150 = vmatprep.mubr.f32.mxu0 %v404_v3  ;;  %337 = vmatmul.mubr.f32.vlgmr.msra.gmra.mrb[0].mxu1 %v31_v11 }
  0x28   :  { %151 = vmatmul.mubr.f32.gmra.mrb[2].mxu0 %v31_v11 }
  0xf7   :  { %v146_v21 = vpop.f32.mrb[0].mxu0 }
  0xf8   :  { %v270_v22 = vadd.f32 %v258_v18, %v146_v21  ;;  %v148_v23 = vpop.f32.mrb[1].mxu0  ;;  %v338_v24 = vpop.f32.mrb[0].mxu1 }
  0xf9   :  { %v271_v25 = vadd.f32 %v262_v19, %v148_v23  ;;  %v275_v3 = vadd.f32 %v338_v24, %v266_v20  ;;  %v223_v26 = vpop.f32.mrb[1].mxu1 }
  0xfa   :  { %276 = vst [vmem:[%s601_s3] sm:$0xff] %v270_v22  ;;  %v272_v27 = vadd.f32 %v266_v20, %v223_v26 }
  0xfb   :  { %277 = vst [vmem:[%s601_s3 + $0x8] sm:$0xff] %v271_v25  ;;  %281 = vst [vmem:[%s601_s3 + $0x28] sm:$0xff] %v275_v3  ;;  %v152_v28 = vpop.f32.mrb[2].mxu0 }
  0xfc   :  { %v273_v29 = vadd.f32 %v258_v18, %v152_v28  ;;  %278 = vst [vmem:[%s601_s3 + $0x10] sm:$0xff] %v272_v27  ;;  %v154_v30 = vpop.f32.mrb[3].mxu0 }
  0xfd   :  { %v274_v31 = vadd.f32 %v262_v19, %v154_v30 }
  0xfe   :  { %279 = vst [vmem:[%s601_s3 + $0x18] sm:$0xff] %v273_v29 }
  0xff   :  { %280 = vst [vmem:[%s601_s3 + $0x20] sm:$0xff] %v274_v31 }

// kernel: gpt_forward.23
= control target key start
LH: loop header
LB: loop body
LE: loop exit
PB: predicated region body
PF: predicated region fallthrough
CT: control target
= control target key end

     0   :  { %s1185_s12 = smov 0   ;;  %s1187_s13 = smov 0   ;;  %s1296_s0 = inlined_call_operand.vmem [shape: f32[2,8,128], index: 0, kind: input, shape index: {}]   ;;  %s1297_s1 = inlined_call_operand.vmem [shape: f32[2,8,128], index: 1, kind: input, shape index: {}]   ;;  %s1298_s2 = inlined_call_operand.vmem [shape: f32[2,8,128], index: 2, kind: input, shape index: {}]   ;;  %s1299_s3 = inlined_call_operand.vmem [shape: f32[2,8,128], index: 3, kind: output, shape index: {}]  }
   0x1   :  { %s1189_s14 = smov 0  }
   0x2 LB: > { %s25_s15 = sadd.s32 1, %s1154_s13  ;;  %p1016_p0 = scmp.ge.s32.totalorder %s1158_s14, 1  ;;  %s1158_s14 = sphi %s1189_s14, %s13_s14   ;;  %s1154_s13 = sphi %s1187_s13, %s1301_s13   ;;  %s1150_s12 = sphi %s1185_s12, %s1300_s12  }
   0x3   : > { %p27_p1 = scmp.ge.s32.totalorder %s25_s15, 2  ;;  %p173_p2 = scmp.lt.s32.totalorder %s1158_s14, 3 }
   0x5   : > { %s1303_s15 = smov (%p27_p1, %s25_s15), 0  ;;  %p174_p3 = pnand %p1016_p0, %p173_p2 }
   0x6   : > { %p209_p4 = scmp.lt.s32.totalorder (!%p174_p3), %s1150_s12, 1  ;;  %v1160_v0 = vmov (!%p174_p3), 0.0   ;;  %vm1161_vm0 = vmmov (!%p174_p3), 0   ;;  %vm234_vm1 = vcmask (!%p174_p3), 261120   ;;  %vm312_vm2 = vcmask (!%p174_p3), 64512   ;;  %s1162_s23 = smov (!%p174_p3), 96  }
   0x7   : > { %177 = sbr.rel (%p174_p3) target bundleno = 1463 (0x5b7), region = 32  ;;  %1051 = vmatprep.subr.mxu0 (!%p174_p3), %v1160_v0  ;;  %1053 = vmatprep.mubr.msk.f32.mxu0 (!%p174_p3), %vm1161_vm0, %v1160_v0  ;;  %s1163_s24 = smov (!%p174_p3), 64   ;;  %vm909_vm3 = vcmask (!%p174_p3), 523264   ;;  %vm911_vm4 = vcmask (!%p174_p3), 785408  }
   0x8   : > { %1056 = vmatprep.subr.mxu1 (!%p174_p3), %v1160_v0  ;;  %1058 = vmatprep.mubr.msk.f32.mxu1 (!%p174_p3), %vm1161_vm0, %v1160_v0  ;;  %s1164_s25 = smov (!%p174_p3), 32  }
   0xe   : > { %s1305_s12 = smov (!%p209_p4, %s1150_s12), 1 }
   0xf   : > { %s1209_s16 = sshll.u32 %s1305_s12, 3 }
  0x10   : > { %s219_s19 = scalar_lea.vmem %s1297_s1, %s1209_s16  ;;  %s215_s22 = scalar_lea.vmem %s1296_s0, %s1209_s16 }
  0x11   : > { %v232_v1 = vld [vmem:[%s219_s19] sm:$0xff]  ;;  %s223_s28 = scalar_lea.vmem %s1298_s2, %s1209_s16  ;;  %s230_s4 = scalar_lea.vmem %s1299_s3, %s1209_s16 }
  0x12   : > { %1052 = vmatpush3.xpose.msk.msra.mxu0 %vm234_vm1, %v232_v1  ;;  %v231_v2 = vld [vmem:[%s215_s22] sm:$0xff]  ;;  %399 = vrot.lane.b32.xlu1 %v232_v1, %s1162_s23 }
  0x13   : > { %1066 = vmatprep.subr.mxu0 %v1160_v0  ;;  %v1235_v12 = vld [vmem:[%s223_s28] sm:$0xff] }
  0x14   : > { %1057 = vmatpush3.msra.mxu1 %v1235_v12 }
  0x15   : > { %1054 = vmatmul.mubr.msk.f32.vlgmr.msra.gmra.mrb[0].mxu0 %vm234_vm1, %v231_v2  ;;  %1061 = vmatprep.subr.mxu1 %v1160_v0 }
  0x16   : > { %1068 = vmatprep.mubr.msk.f32.mxu0 %vm1161_vm0, %v1160_v0  ;;  %397 = vrot.lane.b32.xlu1 %v231_v2, %s1162_s23 }
  0x1a   : > { %564 = vrot.lane.b32.xlu1 %v231_v2, %s1163_s24 }
  0x1e   : > { %732 = vrot.lane.b32.xlu1 %v232_v1, %s1164_s25 }
  0x22   : > { %730 = vrot.lane.b32.xlu1 %v231_v2, %s1164_s25 }
  0x84   : > { %v400_v13 = vpop.permute.xlu1 %399 }
  0x88   : > { %v398_v15 = vpop.permute.xlu1 %397 }
  0x8c   : > { %v565_v17 = vpop.permute.xlu1 %564 }
  0x90   : > { %v733_v20 = vpop.permute.xlu1 %732 }
  0x94   : > { %v731_v21 = vpop.permute.xlu1 %730 }
  0xe8   : > { %v307_v3 = vpop.f32.mrb[0].mxu0 }
  0xe9   : > { %v311_v4 = vmul.f32 0.17677669, %v307_v3  ;;  %v1055_v5 = vpop.f32.mrb[1].mxu0 }
  0xeb   : > { %v313_v6 = vsel %vm312_vm2, %v311_v4, -inf }
  0xec   : > { %314 = vmax.xlane.f32.xlu0 %v313_v6 }
 0x179   : > { %v315_v7 = vpop.xlane.xlu0 %314 }
 0x17a   : > { %v316_v8 = vsub.f32 %v311_v4, %v315_v7 }
 0x17c   : > { %v317_v9 = vmul.f32 1.442695, %v316_v8 }
 0x17e   : > { %1120 = vpow2.f32 %v317_v9 }
 0x188   : > { %v1121_v10 = vpop.eup %1120 }
 0x189   : > { %v319_v11 = vsel %vm312_vm2, %v1121_v10, 0.0 }
 0x18a   : > { %320 = vadd.xlane.f32.xlu0 %v319_v11 }
 0x1a0   : > { %566 = vrot.lane.b32.xlu0 %v232_v1, %s1163_s24 }
 0x217   : > { %v321_v14 = vpop.xlane.xlu0 %320 }
 0x218   : > { %1122 = vrcp.f32 %v321_v14 }
 0x21b   : > { %v567_v19 = vpop.permute.xlu0 %566 }
 0x222   : > { %v1123_v16 = vpop.eup %1122 }
 0x223   : > { %v323_v18 = vmul.f32 %v1123_v16, %v1121_v10 }
 0x225   : > { %1059 = vmatmul.mubr.msk.f32.vlgmr.msra.gmra.mrb[0].mxu1 %vm312_vm2, %v323_v18 }
 0x226   : > { %1062 = vmatpush3.xpose.msk.msra.mxu1 %vm234_vm1, %v400_v13  ;;  %1063 = vmatprep.mubr.msk.f32.mxu1 %vm1161_vm0, %v1160_v0 }
 0x227   : > { %1071 = vmatprep.subr.mxu1 %v1160_v0 }
 0x229   : > { %1064 = vmatmul.mubr.msk.f32.vlgmr.msra.gmra.mrb[2].mxu1 %vm234_vm1, %v398_v15 }
 0x22a   : > { %1072 = vmatpush3.xpose.msk.msra.mxu1 %vm234_vm1, %v567_v19  ;;  %1073 = vmatprep.mubr.msk.f32.mxu1 %vm1161_vm0, %v1160_v0 }
 0x22b   : > { %1081 = vmatprep.subr.mxu1 %v1160_v0 }
 0x22d   : > { %1074 = vmatmul.mubr.msk.f32.vlgmr.msra.gmra.mrb[4].mxu1 %vm234_vm1, %v565_v17 }
 0x22e   : > { %1082 = vmatpush3.xpose.msk.msra.mxu1 %vm234_vm1, %v733_v20  ;;  %1083 = vmatprep.mubr.msk.f32.mxu1 %vm1161_vm0, %v1160_v0 }
 0x231   : > { %1084 = vmatmul.mubr.msk.f32.vlgmr.msra.gmra.mrb[6].mxu1 %vm234_vm1, %v731_v21 }
 0x2f8   : > { %v1255_v22 = vpop.f32.mrb[0].mxu1 }
 0x2f9   : > { %v1060_v23 = vpop.f32.mrb[1].mxu1 }
 0x2fc   : > { %v471_v24 = vpop.f32.mrb[2].mxu1 }
 0x2fd   : > { %v475_v25 = vmul.f32 0.17677669, %v471_v24  ;;  %v1065_v26 = vpop.f32.mrb[3].mxu1 }
 0x2ff   : > { %v476_v27 = vsel %vm312_vm2, %v475_v25, -inf }
 0x300   : > { %477 = vmax.xlane.f32.xlu1 %v476_v27  ;;  %v638_v28 = vpop.f32.mrb[4].mxu1 }
 0x301   : > { %v642_v29 = vmul.f32 0.17677669, %v638_v28  ;;  %v1075_v30 = vpop.f32.mrb[5].mxu1 }
 0x303   : > { %v643_v31 = vsel %vm312_vm2, %v642_v29, -inf }
 0x304   : > { %644 = vmax.xlane.f32.xlu0 %v643_v31  ;;  %v804_v32 = vpop.f32.mrb[6].mxu1 }
 0x305   : > { %v808_v33 = vmul.f32 0.17677669, %v804_v32  ;;  %v1085_v34 = vpop.f32.mrb[7].mxu1 }
 0x307   : > { %v809_v35 = vsel %vm312_vm2, %v808_v33, -inf }
 0x308   : > { %810 = vmax.xlane.f32.xlu1 %v809_v35 }
 0x38d   : > { %v478_v36 = vpop.xlane.xlu1 %477 }
 0x38e   : > { %v479_v37 = vsub.f32 %v475_v25, %v478_v36 }
 0x390   : > { %v480_v38 = vmul.f32 1.442695, %v479_v37 }
 0x391   : > { %v645_v39 = vpop.xlane.xlu0 %644 }
 0x392   : > { %1124 = vpow2.f32 %v480_v38  ;;  %v646_v40 = vsub.f32 %v642_v29, %v645_v39 }
 0x394   : > { %v647_v41 = vmul.f32 1.442695, %v646_v40 }
 0x395   : > { %v811_v46 = vpop.xlane.xlu1 %810 }
 0x396   : > { %1126 = vpow2.f32 %v647_v41  ;;  %v812_v47 = vsub.f32 %v808_v33, %v811_v46 }
 0x398   : > { %v813_v48 = vmul.f32 1.442695, %v812_v47 }
 0x39a   : > { %1128 = vpow2.f32 %v813_v48 }
 0x39c   : > { %v1125_v42 = vpop.eup %1124 }
 0x39d   : > { %v482_v43 = vsel %vm312_vm2, %v1125_v42, 0.0 }
 0x39e   : > { %483 = vadd.xlane.f32.xlu1 %v482_v43 }
 0x3a0   : > { %v1127_v44 = vpop.eup %1126 }
 0x3a1   : > { %v649_v45 = vsel %vm312_vm2, %v1127_v44, 0.0 }
 0x3a2   : > { %650 = vadd.xlane.f32.xlu0 %v649_v45 }
 0x3a4   : > { %v1129_v49 = vpop.eup %1128 }
 0x3a5   : > { %v815_v50 = vsel %vm312_vm2, %v1129_v49, 0.0 }
 0x3af   : > { %654 = vrot.lane.b32.xlu1 %v1235_v12, %s1163_s24 }
 0x3b8   : > { %488 = vrot.lane.b32.xlu0 %v1235_v12, %s1162_s23 }
 0x3d3   : > { %816 = vadd.xlane.f32.xlu1 %v815_v50 }
 0x3e4   : > { %820 = vrot.lane.b32.xlu1 %v1235_v12, %s1164_s25 }
 0x42b   : > { %v484_v51 = vpop.xlane.xlu1 %483 }
 0x42c   : > { %1130 = vrcp.f32 %v484_v51 }
 0x42f   : > { %v651_v52 = vpop.xlane.xlu0 %650  ;;  %v655_v56 = vpop.permute.xlu1 %654 }
 0x430   : > { %1132 = vrcp.f32 %v651_v52 }
 0x433   : > { %v489_v53 = vpop.permute.xlu0 %488 }
 0x434   : > { %1067 = vmatpush3.msra.mxu0 %v489_v53 }
 0x435   : > { %1076 = vmatprep.subr.mxu0 %v1160_v0 }
 0x436   : > { %v1131_v54 = vpop.eup %1130 }
 0x437   : > { %v486_v55 = vmul.f32 %v1131_v54, %v1125_v42 }
 0x439   : > { %1069 = vmatmul.mubr.msk.f32.vlgmr.msra.gmra.mrb[2].mxu0 %vm312_vm2, %v486_v55 }
 0x43a   : > { %v1133_v57 = vpop.eup %1132  ;;  %1077 = vmatpush3.msra.mxu0 %v655_v56  ;;  %1078 = vmatprep.mubr.msk.f32.mxu0 %vm1161_vm0, %v1160_v0 }
 0x43b   : > { %v653_v58 = vmul.f32 %v1133_v57, %v1127_v44  ;;  %1086 = vmatprep.subr.mxu0 %v1160_v0 }
 0x43d   : > { %1079 = vmatmul.mubr.msk.f32.vlgmr.msra.gmra.mrb[4].mxu0 %vm312_vm2, %v653_v58 }
 0x43e   : > { %1088 = vmatprep.mubr.msk.f32.mxu0 %vm1161_vm0, %v1160_v0 }
 0x460   : > { %v817_v59 = vpop.xlane.xlu1 %816 }
 0x461   : > { %1134 = vrcp.f32 %v817_v59 }
 0x464   : > { %v821_v60 = vpop.permute.xlu1 %820 }
 0x465   : > { %1087 = vmatpush3.msra.mxu0 %v821_v60 }
 0x46b   : > { %v1135_v61 = vpop.eup %1134 }
 0x46c   : > { %v819_v62 = vmul.f32 %v1135_v61, %v1129_v49 }
 0x46e   : > { %1089 = vmatmul.mubr.msk.f32.vlgmr.msra.gmra.mrb[6].mxu0 %vm312_vm2, %v819_v62 }
 0x50c   : > { %v560_v63 = vpop.f32.mrb[2].mxu0 }
 0x50d   : > { %897 = vrot.lane.b32.xlu0 %v560_v63, %s1164_s25  ;;  %v1070_v1 = vpop.f32.mrb[3].mxu0 }
 0x510   : > { %v726_v2 = vpop.f32.mrb[4].mxu0 }
 0x511   : > { %901 = vrot.lane.b32.xlu1 %v726_v2, %s1163_s24  ;;  %v1080_v3 = vpop.f32.mrb[5].mxu0 }
 0x541   : > { %v892_v4 = vpop.f32.mrb[6].mxu0 }
 0x542   : > { %905 = vrot.lane.b32.xlu0 %v892_v4, %s1162_s23  ;;  %v1090_v0 = vpop.f32.mrb[7].mxu0 }
 0x57f   : > { %v898_v5 = vpop.permute.xlu0 %897 }
 0x580   : > { %v908_v7 = vsel %vm234_vm1, %v1255_v22, %v898_v5 }
 0x583   : > { %v902_v6 = vpop.permute.xlu1 %901 }
 0x584   : > { %v910_v8 = vsel %vm909_vm3, %v908_v7, %v902_v6 }
 0x5b4   : > { %v906_v9 = vpop.permute.xlu0 %905 }
 0x5b5   : > { %v912_v10 = vsel %vm911_vm4, %v910_v8, %v906_v9 }
 0x5b6   : > { %913 = vst [vmem:[%s230_s4] sm:$0xff] %v912_v10 }
 0x5b7 PF: > { %s13_s14 = sadd.s32 1, %s1158_s14   ;;  %s1300_s12 = smov %s1154_s13 }
 0x5b8   : > { %p10_p5 = scmp.ge.s32.totalorder %s13_s14, 4   ;;  %s1301_s13 = smov %s1303_s15 }
 0x5ba   :  { %12 = sbr.rel (!%p10_p5) target bundleno = 2 (0x2), region = 68 }

// kernel: gpt_forward.26
= control target key start
LH: loop header
LB: loop body
LE: loop exit
PB: predicated region body
PF: predicated region fallthrough
CT: control target
= control target key end

     0   :  { %v267_v3 = vmov 0.0   ;;  %v188_v53 = vlaneseq  ;;  %s427_s1 = inlined_call_operand.vmem [shape: f32[128,256], index: 1, kind: input, shape index: {}]   ;;  %s428_s0 = inlined_call_operand.vmem [shape: f32[32,128], index: 0, kind: input, shape index: {}]   ;;  %s429_s2 = inlined_call_operand.vmem [shape: f32[1,256], index: 2, kind: input, shape index: {}]   ;;  %s430_s3 = inlined_call_operand.vmem [shape: f32[32,256], index: 3, kind: output, shape index: {}]  }
   0x1   :  { %v39_v0 = vld [vmem:[%s427_s1 + $0x8] sm:$0xff]  ;;  %v41_v1 = vld [vmem:[%s427_s1 + $0x18] sm:$0xff]  ;;  %v38_v2 = vld [vmem:[%s427_s1] sm:$0xff]  ;;  %134 = vmatprep.mubr.f32.mxu0 %v267_v3  ;;  %146 = vmatprep.mubr.f32.mxu1 %v267_v3 }
   0x2   :  { %v218_v4 = vpack.c.bf16 %v41_v1, %v39_v0  ;;  %v40_v5 = vld [vmem:[%s427_s1 + $0x10] sm:$0xff]  ;;  %v43_v6 = vld [vmem:[%s427_s1 + $0x28] sm:$0xff]  ;;  %v45_v7 = vld [vmem:[%s427_s1 + $0x38] sm:$0xff]  ;;  %v189_v54 = vshrl.u32 %v188_v53, 7 }
   0x3   :  { %v220_v8 = vpack.c.bf16 %v40_v5, %v38_v2  ;;  %v222_v9 = vpack.c.bf16 %v45_v7, %v43_v6  ;;  %v42_v10 = vld [vmem:[%s427_s1 + $0x20] sm:$0xff]  ;;  %v44_v11 = vld [vmem:[%s427_s1 + $0x30] sm:$0xff]  ;;  %v47_v12 = vld [vmem:[%s427_s1 + $0x48] sm:$0xff] }
   0x4   :  { %219 = vmatprep.subr.bf16.mxu0 %v218_v4  ;;  %250 = vmatprep.subr.bf16.mxu1 %v218_v4  ;;  %v49_v13 = vld [vmem:[%s427_s1 + $0x58] sm:$0xff]  ;;  %v224_v14 = vpack.c.bf16 %v44_v11, %v42_v10  ;;  %v46_v16 = vld [vmem:[%s427_s1 + $0x40] sm:$0xff]  ;;  %v48_v17 = vld [vmem:[%s427_s1 + $0x50] sm:$0xff]  ;;  %v190_v55 = vsub.s32 0, %v189_v54  ;;  %v194_v57 = vsub.s32 1, %v189_v54 }
   0x5   :  { %221 = vmatpush1.bf16.msra.mxu0 %v220_v8  ;;  %258 = vmatpush1.bf16.msra.mxu1 %v220_v8  ;;  %v226_v15 = vpack.c.bf16 %v49_v13, %v47_v12  ;;  %v51_v18 = vld [vmem:[%s427_s1 + $0x68] sm:$0xff]  ;;  %v53_v19 = vld [vmem:[%s427_s1 + $0x78] sm:$0xff]  ;;  %v228_v20 = vpack.c.bf16 %v48_v17, %v46_v16  ;;  %v50_v22 = vld [vmem:[%s427_s1 + $0x60] sm:$0xff] }
   0x6   :  { %223 = vmatprep.subr.bf16.mxu0 %v222_v9  ;;  %251 = vmatprep.subr.bf16.mxu1 %v222_v9  ;;  %v230_v21 = vpack.c.bf16 %v53_v19, %v51_v18  ;;  %v52_v23 = vld [vmem:[%s427_s1 + $0x70] sm:$0xff]  ;;  %v55_v24 = vld [vmem:[%s427_s1 + $0x88] sm:$0xff]  ;;  %v57_v25 = vld [vmem:[%s427_s1 + $0x98] sm:$0xff] }
   0x7   :  { %v232_v26 = vpack.c.bf16 %v52_v23, %v50_v22  ;;  %v234_v27 = vpack.c.bf16 %v57_v25, %v55_v24  ;;  %v54_v28 = vld [vmem:[%s427_s1 + $0x80] sm:$0xff]  ;;  %v56_v29 = vld [vmem:[%s427_s1 + $0x90] sm:$0xff]  ;;  %v59_v30 = vld [vmem:[%s427_s1 + $0xa8] sm:$0xff] }
   0x8   :  { %v61_v31 = vld [vmem:[%s427_s1 + $0xb8] sm:$0xff]  ;;  %v236_v32 = vpack.c.bf16 %v56_v29, %v54_v28  ;;  %v58_v34 = vld [vmem:[%s427_s1 + $0xa0] sm:$0xff]  ;;  %v60_v35 = vld [vmem:[%s427_s1 + $0xb0] sm:$0xff] }
   0x9   :  { %225 = vmatpush1.bf16.msra.mxu0 %v224_v14  ;;  %259 = vmatpush1.bf16.msra.mxu1 %v224_v14  ;;  %v238_v33 = vpack.c.bf16 %v61_v31, %v59_v30  ;;  %v63_v36 = vld [vmem:[%s427_s1 + $0xc8] sm:$0xff]  ;;  %v65_v37 = vld [vmem:[%s427_s1 + $0xd8] sm:$0xff]  ;;  %v240_v38 = vpack.c.bf16 %v60_v35, %v58_v34  ;;  %v62_v40 = vld [vmem:[%s427_s1 + $0xc0] sm:$0xff] }
   0xa   :  { %227 = vmatprep.subr.bf16.mxu0 %v226_v15  ;;  %252 = vmatprep.subr.bf16.mxu1 %v226_v15  ;;  %v242_v39 = vpack.c.bf16 %v65_v37, %v63_v36  ;;  %v64_v41 = vld [vmem:[%s427_s1 + $0xd0] sm:$0xff]  ;;  %v67_v42 = vld [vmem:[%s427_s1 + $0xe8] sm:$0xff]  ;;  %v69_v43 = vld [vmem:[%s427_s1 + $0xf8] sm:$0xff] }
   0xb   :  { %v244_v44 = vpack.c.bf16 %v64_v41, %v62_v40  ;;  %v246_v45 = vpack.c.bf16 %v69_v43, %v67_v42  ;;  %v66_v46 = vld [vmem:[%s427_s1 + $0xe0] sm:$0xff]  ;;  %v68_v47 = vld [vmem:[%s427_s1 + $0xf0] sm:$0xff]  ;;  %v35_v51 = vld [vmem:[%s428_s0 + $0x8] sm:$0xff] }
   0xc   :  { %v248_v48 = vpack.c.bf16 %v68_v47, %v66_v46  ;;  %v34_v49 = vld [vmem:[%s428_s0] sm:$0xff]  ;;  %v36_v50 = vld [vmem:[%s428_s0 + $0x10] sm:$0xff]  ;;  %v37_v52 = vld [vmem:[%s428_s0 + $0x18] sm:$0xff] }
   0xd   :  { %229 = vmatpush1.bf16.msra.mxu0 %v228_v20  ;;  %260 = vmatpush1.bf16.msra.mxu1 %v228_v20  ;;  %v186_v56 = vld [vmem:[%s429_s2] sm:$0x3] }
   0xe   :  { %231 = vmatprep.subr.bf16.mxu0 %v230_v21  ;;  %253 = vmatprep.subr.bf16.mxu1 %v230_v21  ;;  %v191_v58 = vrot.slane %v186_v56, %v190_v55  ;;  %v195_v59 = vrot.slane %v186_v56, %v194_v57 }
  0x11   :  { %233 = vmatpush1.bf16.msra.mxu0 %v232_v26  ;;  %261 = vmatpush1.bf16.msra.mxu1 %v232_v26 }
  0x12   :  { %235 = vmatprep.subr.bf16.mxu0 %v234_v27  ;;  %254 = vmatprep.subr.bf16.mxu1 %v234_v27 }
  0x15   :  { %237 = vmatpush1.bf16.msra.mxu0 %v236_v32  ;;  %262 = vmatpush1.bf16.msra.mxu1 %v236_v32 }
  0x16   :  { %239 = vmatprep.subr.bf16.mxu0 %v238_v33  ;;  %255 = vmatprep.subr.bf16.mxu1 %v238_v33 }
  0x19   :  { %241 = vmatpush1.bf16.msra.mxu0 %v240_v38  ;;  %263 = vmatpush1.bf16.msra.mxu1 %v240_v38 }
  0x1a   :  { %243 = vmatprep.subr.bf16.mxu0 %v242_v39  ;;  %256 = vmatprep.subr.bf16.mxu1 %v242_v39 }
  0x1d   :  { %245 = vmatpush1.bf16.msra.mxu0 %v244_v44  ;;  %264 = vmatpush1.bf16.msra.mxu1 %v244_v44 }
  0x1e   :  { %247 = vmatprep.subr.bf16.mxu0 %v246_v45  ;;  %257 = vmatprep.subr.bf16.mxu1 %v246_v45 }
  0x21   :  { %249 = vmatpush1.bf16.msra.mxu0 %v248_v48  ;;  %265 = vmatpush1.bf16.msra.mxu1 %v248_v48 }
  0x24   :  { %135 = vmatmul.mubr.f32.vlgmr.msra.gmra.mrb[0].mxu0 %v34_v49  ;;  %147 = vmatmul.mubr.f32.vlgmr.msra.gmra.mrb[0].mxu1 %v36_v50 }
  0x25   :  { %140 = vmatprep.mubr.f32.mxu0 %v267_v3  ;;  %152 = vmatprep.mubr.f32.mxu1 %v267_v3 }
  0x28   :  { %141 = vmatmul.mubr.f32.gmra.mrb[2].mxu0 %v35_v51  ;;  %153 = vmatmul.mubr.f32.gmra.mrb[2].mxu1 %v37_v52 }
  0xf7   :  { %v136_v60 = vpop.f32.mrb[0].mxu0  ;;  %v148_v61 = vpop.f32.mrb[0].mxu1 }
  0xf8   :  { %v198_v62 = vadd.f32 %v191_v58, %v136_v60  ;;  %v202_v63 = vadd.f32 %v191_v58, %v148_v61  ;;  %v138_v0 = vpop.f32.mrb[1].mxu0  ;;  %v150_v1 = vpop.f32.mrb[1].mxu1 }
  0xf9   :  { %v199_v2 = vadd.f32 %v195_v59, %v138_v0  ;;  %v203_v3 = vadd.f32 %v195_v59, %v150_v1 }
  0xfa   :  { %206 = vst [vmem:[%s430_s3] sm:$0xff] %v198_v62  ;;  %210 = vst [vmem:[%s430_s3 + $0x20] sm:$0xff] %v202_v63 }
  0xfb   :  { %207 = vst [vmem:[%s430_s3 + $0x8] sm:$0xff] %v199_v2  ;;  %211 = vst [vmem:[%s430_s3 + $0x28] sm:$0xff] %v203_v3  ;;  %v142_v4 = vpop.f32.mrb[2].mxu0  ;;  %v154_v5 = vpop.f32.mrb[2].mxu1 }
  0xfc   :  { %v200_v6 = vadd.f32 %v191_v58, %v142_v4  ;;  %v204_v7 = vadd.f32 %v191_v58, %v154_v5  ;;  %v144_v8 = vpop.f32.mrb[3].mxu0  ;;  %v156_v9 = vpop.f32.mrb[3].mxu1 }
  0xfd   :  { %v201_v10 = vadd.f32 %v195_v59, %v144_v8  ;;  %v205_v11 = vadd.f32 %v195_v59, %v156_v9 }
  0xfe   :  { %208 = vst [vmem:[%s430_s3 + $0x10] sm:$0xff] %v200_v6  ;;  %212 = vst [vmem:[%s430_s3 + $0x30] sm:$0xff] %v204_v7 }
  0xff   :  { %209 = vst [vmem:[%s430_s3 + $0x18] sm:$0xff] %v201_v10  ;;  %213 = vst [vmem:[%s430_s3 + $0x38] sm:$0xff] %v205_v11 }

// kernel: gpt_forward.21
= control target key start
LH: loop header
LB: loop body
LE: loop exit
PB: predicated region body
PF: predicated region fallthrough
CT: control target
= control target key end

     0   :  { %s153_s0 = inlined_call_operand.vmem [shape: f32[32,128], index: 0, kind: input, shape index: {}]   ;;  %s154_s1 = inlined_call_operand.vmem [shape: f32[1,128], index: 1, kind: input, shape index: {}]   ;;  %s155_s2 = inlined_call_operand.vmem [shape: f32[1,128], index: 2, kind: input, shape index: {}]   ;;  %s156_s3 = inlined_call_operand.vmem [shape: f32[32,128], index: 3, kind: output, shape index: {}]  }
   0x1   :  { %v14_v0 = vld [vmem:[%s153_s0] sm:$0xff]  ;;  %v16_v1 = vld [vmem:[%s153_s0 + $0x10] sm:$0xff]  ;;  %v15_v2 = vld [vmem:[%s153_s0 + $0x8] sm:$0xff] }
   0x2   :  { %20 = vadd.xlane.f32.xlu0 %v14_v0  ;;  %24 = vadd.xlane.f32.xlu1 %v16_v1  ;;  %v17_v3 = vld [vmem:[%s153_s0 + $0x18] sm:$0xff]  ;;  %v93_v33 = vld [vmem:[%s154_s1] ss:$0 sm:$0xff] }
   0x3   :  { %v94_v35 = vld [vmem:[%s155_s2] ss:$0 sm:$0xff] }
   0x6   :  { %22 = vadd.xlane.f32.xlu0 %v15_v2  ;;  %26 = vadd.xlane.f32.xlu1 %v17_v3 }
  0x8f   :  { %v21_v4 = vpop.xlane.xlu0 %20  ;;  %v25_v5 = vpop.xlane.xlu1 %24 }
  0x90   :  { %v29_v6 = vmul.f32 0.0078125, %v21_v4  ;;  %v31_v7 = vmul.f32 0.0078125, %v25_v5 }
  0x92   :  { %v33_v8 = vsub.f32 %v14_v0, %v29_v6  ;;  %v35_v9 = vsub.f32 %v16_v1, %v31_v7 }
  0x93   :  { %v23_v10 = vpop.xlane.xlu0 %22  ;;  %v27_v11 = vpop.xlane.xlu1 %26 }
  0x94   :  { %v30_v12 = vmul.f32 0.0078125, %v23_v10  ;;  %v37_v13 = vmul.f32 %v33_v8, %v33_v8  ;;  %v32_v14 = vmul.f32 0.0078125, %v27_v11  ;;  %v39_v17 = vmul.f32 %v35_v9, %v35_v9 }
  0x96   :  { %v34_v15 = vsub.f32 %v15_v2, %v30_v12  ;;  %41 = vadd.xlane.f32.xlu0 %v37_v13  ;;  %v36_v16 = vsub.f32 %v17_v3, %v32_v14 }
  0x98   :  { %v38_v18 = vmul.f32 %v34_v15, %v34_v15  ;;  %v40_v19 = vmul.f32 %v36_v16, %v36_v16 }
  0x9a   :  { %45 = vadd.xlane.f32.xlu0 %v39_v17  ;;  %43 = vadd.xlane.f32.xlu1 %v38_v18 }
  0x9e   :  { %47 = vadd.xlane.f32.xlu1 %v40_v19 }
 0x123   :  { %v42_v20 = vpop.xlane.xlu0 %41 }
 0x124   :  { %v49_v21 = vmul.f32 0.0078125, %v42_v20 }
 0x126   :  { %v53_v22 = vadd.f32 1e-05, %v49_v21 }
 0x127   :  { %v44_v23 = vpop.xlane.xlu1 %43  ;;  %v46_v24 = vpop.xlane.xlu0 %45 }
 0x128   :  { %95 = vrsqrt.f32 %v53_v22  ;;  %v50_v25 = vmul.f32 0.0078125, %v44_v23  ;;  %v51_v26 = vmul.f32 0.0078125, %v46_v24 }
 0x12a   :  { %v54_v27 = vadd.f32 1e-05, %v50_v25  ;;  %v55_v28 = vadd.f32 1e-05, %v51_v26 }
 0x12b   :  { %v48_v29 = vpop.xlane.xlu1 %47 }
 0x12c   :  { %97 = vrsqrt.f32 %v54_v27  ;;  %v52_v30 = vmul.f32 0.0078125, %v48_v29 }
 0x12d   :  { %99 = vrsqrt.f32 %v55_v28 }
 0x12e   :  { %v56_v31 = vadd.f32 1e-05, %v52_v30 }
 0x130   :  { %101 = vrsqrt.f32 %v56_v31 }
 0x132   :  { %v96_v32 = vpop.eup %95 }
 0x133   :  { %v61_v34 = vmul.f32 %v96_v32, %v33_v8 }
 0x135   :  { %v71_v36 = vmul.f32 %v93_v33, %v61_v34 }
 0x136   :  { %v98_v37 = vpop.eup %97 }
 0x137   :  { %v100_v38 = vpop.eup %99  ;;  %v81_v39 = vadd.f32 %v94_v35, %v71_v36  ;;  %v62_v40 = vmul.f32 %v98_v37, %v34_v15 }
 0x138   :  { %v63_v41 = vmul.f32 %v100_v38, %v35_v9 }
 0x139   :  { %85 = vst [vmem:[%s156_s3] sm:$0xff] %v81_v39  ;;  %v72_v42 = vmul.f32 %v93_v33, %v62_v40 }
 0x13a   :  { %v102_v43 = vpop.eup %101  ;;  %v73_v44 = vmul.f32 %v93_v33, %v63_v41 }
 0x13b   :  { %v82_v45 = vadd.f32 %v94_v35, %v72_v42  ;;  %v64_v46 = vmul.f32 %v102_v43, %v36_v16 }
 0x13c   :  { %v83_v47 = vadd.f32 %v94_v35, %v73_v44 }
 0x13d   :  { %86 = vst [vmem:[%s156_s3 + $0x8] sm:$0xff] %v82_v45  ;;  %v74_v48 = vmul.f32 %v93_v33, %v64_v46 }
 0x13e   :  { %87 = vst [vmem:[%s156_s3 + $0x10] sm:$0xff] %v83_v47 }
 0x13f   :  { %v84_v49 = vadd.f32 %v94_v35, %v74_v48 }
 0x141   :  { %88 = vst [vmem:[%s156_s3 + $0x18] sm:$0xff] %v84_v49 }

// kernel: gpt_forward.27
= control target key start
LH: loop header
LB: loop body
LE: loop exit
PB: predicated region body
PF: predicated region fallthrough
CT: control target
= control target key end

     0   :  { %s1310_s12 = smov 0   ;;  %s1312_s13 = smov 0   ;;  %s1447_s0 = inlined_call_operand.vmem [shape: f32[2,8,128], index: 0, kind: input, shape index: {}]   ;;  %s1448_s1 = inlined_call_operand.vmem [shape: f32[2,16,128], index: 1, kind: input, shape index: {}]   ;;  %s1449_s2 = inlined_call_operand.vmem [shape: f32[2,16,128], index: 2, kind: input, shape index: {}]   ;;  %s1450_s3 = inlined_call_operand.vmem [shape: f32[2,8,128], index: 3, kind: output, shape index: {}]  }
   0x1   :  { %s1314_s14 = smov 0  }
   0x2 LB: > { %s25_s15 = sadd.s32 1, %s1278_s13  ;;  %p1049_p0 = scmp.ge.s32.totalorder %s1282_s14, 1  ;;  %s1282_s14 = sphi %s1314_s14, %s13_s14   ;;  %s1278_s13 = sphi %s1312_s13, %s1454_s13   ;;  %s1274_s12 = sphi %s1310_s12, %s1453_s12  }
   0x3   : > { %p27_p1 = scmp.ge.s32.totalorder %s25_s15, 2  ;;  %p175_p2 = scmp.lt.s32.totalorder %s1282_s14, 3 }
   0x5   : > { %s1456_s15 = smov (%p27_p1, %s25_s15), 0  ;;  %p176_p3 = pnand %p1049_p0, %p175_p2 }
   0x6   : > { %p213_p4 = scmp.lt.s32.totalorder (!%p176_p3), %s1274_s12, 1  ;;  %v1284_v0 = vmov (!%p176_p3), 0.0|0.0   ;;  %vm1285_vm0 = vmmov (!%p176_p3), 0   ;;  %v1286_v1 = vmov (!%p176_p3), 0.0   ;;  %vm242_vm1 = vcmask (!%p176_p3), 261120   ;;  %s1287_s24 = smov (!%p176_p3), 96  }
   0x7   : > { %179 = sbr.rel (%p176_p3) target bundleno = 2492 (0x9bc), region = 32  ;;  %1156 = vmatprep.subr.bf16.mxu0 (!%p176_p3), %v1284_v0  ;;  %1104 = vmatprep.mubr.msk.f32.mxu0 (!%p176_p3), %vm1285_vm0, %v1286_v1  ;;  %vm1344_vm2 = vmpackc.low (!%p176_p3), %vm242_vm1, %vm242_vm1  ;;  %vm323_vm3 = vcmask (!%p176_p3), 130048   ;;  %s1288_s28 = smov (!%p176_p3), 64   ;;  %vm942_vm4 = vcmask (!%p176_p3), 523264   ;;  %vm944_vm5 = vcmask (!%p176_p3), 785408  }
   0x8   : > { %1160 = vmatprep.subr.bf16.mxu1 (!%p176_p3), %v1284_v0  ;;  %1111 = vmatprep.mubr.msk.f32.mxu1 (!%p176_p3), %vm1285_vm0, %v1286_v1  ;;  %s1289_s29 = smov (!%p176_p3), 32  }
   0xe   : > { %s1458_s12 = smov (!%p213_p4, %s1274_s12), 1 }
   0xf   : > { %s1074_s16 = sshll.u32 %s1458_s12, 4  ;;  %s1050_s20 = sshll.u32 %s1458_s12, 3 }
  0x10   : > { %s224_s19 = scalar_lea.vmem %s1448_s1, %s1074_s16  ;;  %s219_s23 = scalar_lea.vmem %s1447_s0, %s1050_s20 }
  0x11   : > { %v238_v2 = vld [vmem:[%s224_s19] sm:$0xff]  ;;  %v239_v3 = vld [vmem:[%s224_s19 + $0x8] sm:$0xff]  ;;  %s229_s27 = scalar_lea.vmem %s1449_s2, %s1074_s16  ;;  %s236_s5 = scalar_lea.vmem %s1450_s3, %s1050_s20 }
  0x12   : > { %v1157_v5 = vpack.c.bf16 %v239_v3, %v238_v2  ;;  %v1357_v6 = vld [vmem:[%s219_s23] sm:$0xff]  ;;  %v1364_v11 = vpack.i.bf16 %v239_v3, %v238_v2  ;;  %v241_v18 = vld [vmem:[%s229_s27 + $0x8] sm:$0xff] }
  0x13   : > { %v240_v17 = vld [vmem:[%s229_s27] sm:$0xff] }
  0x14   : > { %1159 = vmatpush3.bf16.xpose.msk.msra.mxu0 %vm1344_vm2, %v1157_v5  ;;  %1215 = vrot.lane.b32.xlu1 %v1364_v11, %s1287_s24  ;;  %v1161_v19 = vpack.c.bf16 %v241_v18, %v240_v17  ;;  %v1389_v34 = vpack.i.bf16 %v241_v18, %v240_v17 }
  0x15   : > { %1167 = vmatprep.subr.bf16.mxu0 %v1284_v0 }
  0x16   : > { %1162 = vmatpush3.bf16.msra.mxu1 %v1161_v19 }
  0x17   : > { %1163 = vmatprep.subr.bf16.mxu1 %v1284_v0 }
  0x18   : > { %408 = vrot.lane.b32.xlu1 %v1357_v6, %s1287_s24 }
  0x1b   : > { %1105 = vmatmul.mubr.msk.f32.vlgmr.msra.gmra.mrb[0].mxu0 %vm242_vm1, %v1357_v6 }
  0x1c   : > { %1125 = vmatprep.mubr.msk.f32.mxu0 %vm1285_vm0, %v1286_v1 }
  0x86   : > { %v1216_v21 = vpop.permute.xlu1 %1215 }
  0x87   : > { %v1218_v22 = vunpack.i.h.bf16 %v1216_v21  ;;  %v1217_v23 = vunpack.i.l.bf16 %v1216_v21 }
  0x89   : > { %v1164_v25 = vpack.c.bf16 %v1218_v22, %v1217_v23 }
  0x8a   : > { %v409_v27 = vpop.permute.xlu1 %408 }
  0xee   : > { %v318_v7 = vpop.f32.mrb[0].mxu0 }
  0xef   : > { %v322_v8 = vmul.f32 0.17677669, %v318_v7  ;;  %v1106_v9 = vpop.f32.mrb[1].mxu0 }
  0xf1   : > { %v324_v10 = vsel %vm323_vm3, %v322_v8, -inf }
  0xf2   : > { %325 = vmax.xlane.f32.xlu0 %v324_v10 }
 0x17f   : > { %v326_v12 = vpop.xlane.xlu0 %325 }
 0x180   : > { %v327_v13 = vsub.f32 %v322_v8, %v326_v12 }
 0x182   : > { %v328_v14 = vmul.f32 1.442695, %v327_v13 }
 0x184   : > { %1244 = vpow2.f32 %v328_v14 }
 0x18e   : > { %v1245_v15 = vpop.eup %1244 }
 0x18f   : > { %v330_v16 = vsel %vm323_vm3, %v1245_v15, 0.0 }
 0x190   : > { %331 = vadd.xlane.f32.xlu0 %v330_v16 }
 0x21d   : > { %v332_v20 = vpop.xlane.xlu0 %331 }
 0x21e   : > { %1246 = vrcp.f32 %v332_v20 }
 0x228   : > { %v1247_v24 = vpop.eup %1246 }
 0x229   : > { %v334_v26 = vmul.f32 %v1247_v24, %v1245_v15 }
 0x22b   : > { %1112 = vmatmul.mubr.msk.f32.vlgmr.msra.gmra.mrb[0].mxu1 %vm323_vm3, %v334_v26 }
 0x22c   : > { %1166 = vmatpush3.bf16.xpose.msk.msra.mxu1 %vm1344_vm2, %v1164_v25  ;;  %1118 = vmatprep.mubr.msk.f32.mxu1 %vm1285_vm0, %v1286_v1 }
 0x22d   : > { %1174 = vmatprep.subr.bf16.mxu1 %v1284_v0 }
 0x233   : > { %1119 = vmatmul.mubr.msk.f32.vlgmr.msra.gmra.mrb[2].mxu1 %vm242_vm1, %v409_v27 }
 0x234   : > { %1139 = vmatprep.mubr.msk.f32.mxu1 %vm1285_vm0, %v1286_v1 }
 0x2fe   : > { %v1386_v28 = vpop.f32.mrb[0].mxu1 }
 0x2ff   : > { %v1113_v29 = vpop.f32.mrb[1].mxu1 }
 0x306   : > { %v486_v30 = vpop.f32.mrb[2].mxu1 }
 0x307   : > { %v490_v31 = vmul.f32 0.17677669, %v486_v30  ;;  %v1120_v32 = vpop.f32.mrb[3].mxu1 }
 0x309   : > { %v491_v33 = vsel %vm323_vm3, %v490_v31, -inf }
 0x30a   : > { %492 = vmax.xlane.f32.xlu0 %v491_v33 }
 0x320   : > { %1220 = vrot.lane.b32.xlu0 %v1389_v34, %s1287_s24 }
 0x324   : > { %1225 = vrot.lane.b32.xlu0 %v1364_v11, %s1288_s28 }
 0x328   : > { %583 = vrot.lane.b32.xlu0 %v1357_v6, %s1288_s28 }
 0x397   : > { %v493_v35 = vpop.xlane.xlu0 %492 }
 0x398   : > { %v494_v36 = vsub.f32 %v490_v31, %v493_v35 }
 0x39a   : > { %v495_v37 = vmul.f32 1.442695, %v494_v36 }
 0x39b   : > { %v1221_v40 = vpop.permute.xlu0 %1220 }
 0x39c   : > { %1248 = vpow2.f32 %v495_v37  ;;  %v1223_v41 = vunpack.i.h.bf16 %v1221_v40  ;;  %v1222_v42 = vunpack.i.l.bf16 %v1221_v40 }
 0x39e   : > { %v1168_v43 = vpack.c.bf16 %v1223_v41, %v1222_v42 }
 0x39f   : > { %v1226_v45 = vpop.permute.xlu0 %1225 }
 0x3a0   : > { %1169 = vmatpush3.bf16.msra.mxu0 %v1168_v43  ;;  %v1228_v46 = vunpack.i.h.bf16 %v1226_v45  ;;  %v1227_v47 = vunpack.i.l.bf16 %v1226_v45 }
 0x3a1   : > { %1170 = vmatprep.subr.bf16.mxu0 %v1284_v0 }
 0x3a2   : > { %v1171_v49 = vpack.c.bf16 %v1228_v46, %v1227_v47 }
 0x3a3   : > { %v584_v51 = vpop.permute.xlu0 %583 }
 0x3a6   : > { %v1249_v38 = vpop.eup %1248 }
 0x3a7   : > { %v497_v39 = vsel %vm323_vm3, %v1249_v38, 0.0 }
 0x3a8   : > { %498 = vadd.xlane.f32.xlu1 %v497_v39 }
 0x3b9   : > { %1230 = vrot.lane.b32.xlu1 %v1389_v34, %s1288_s28 }
 0x3bd   : > { %1235 = vrot.lane.b32.xlu1 %v1364_v11, %s1289_s29 }
 0x435   : > { %v499_v44 = vpop.xlane.xlu1 %498 }
 0x436   : > { %1250 = vrcp.f32 %v499_v44 }
 0x439   : > { %v1231_v58 = vpop.permute.xlu1 %1230 }
 0x43a   : > { %v1233_v59 = vunpack.i.h.bf16 %v1231_v58  ;;  %v1232_v60 = vunpack.i.l.bf16 %v1231_v58 }
 0x43c   : > { %v1175_v61 = vpack.c.bf16 %v1233_v59, %v1232_v60 }
 0x43d   : > { %v1236_v7 = vpop.permute.xlu1 %1235 }
 0x43e   : > { %1176 = vmatpush3.bf16.msra.mxu1 %v1175_v61  ;;  %v1238_v9 = vunpack.i.h.bf16 %v1236_v7  ;;  %v1237_v10 = vunpack.i.l.bf16 %v1236_v7 }
 0x43f   : > { %1177 = vmatprep.subr.bf16.mxu1 %v1284_v0 }
 0x440   : > { %v1251_v48 = vpop.eup %1250  ;;  %v1178_v13 = vpack.c.bf16 %v1238_v9, %v1237_v10 }
 0x441   : > { %v501_v50 = vmul.f32 %v1251_v48, %v1249_v38 }
 0x443   : > { %1126 = vmatmul.mubr.msk.f32.vlgmr.msra.gmra.mrb[2].mxu0 %vm323_vm3, %v501_v50 }
 0x444   : > { %1173 = vmatpush3.bf16.xpose.msk.msra.mxu0 %vm1344_vm2, %v1171_v49  ;;  %1132 = vmatprep.mubr.msk.f32.mxu0 %vm1285_vm0, %v1286_v1 }
 0x445   : > { %1181 = vmatprep.subr.bf16.mxu0 %v1284_v0 }
 0x44b   : > { %1133 = vmatmul.mubr.msk.f32.vlgmr.msra.gmra.mrb[4].mxu0 %vm242_vm1, %v584_v51 }
 0x44c   : > { %1153 = vmatprep.mubr.msk.f32.mxu0 %vm1285_vm0, %v1286_v1 }
 0x516   : > { %v579_v52 = vpop.f32.mrb[2].mxu0 }
 0x517   : > { %v1127_v53 = vpop.f32.mrb[3].mxu0 }
 0x51e   : > { %v661_v54 = vpop.f32.mrb[4].mxu0 }
 0x51f   : > { %v665_v55 = vmul.f32 0.17677669, %v661_v54  ;;  %v1134_v56 = vpop.f32.mrb[5].mxu0 }
 0x521   : > { %v666_v57 = vsel %vm323_vm3, %v665_v55, -inf }
 0x522   : > { %667 = vmax.xlane.f32.xlu0 %v666_v57 }
 0x5af   : > { %v668_v62 = vpop.xlane.xlu0 %667 }
 0x5b0   : > { %v669_v63 = vsub.f32 %v665_v55, %v668_v62 }
 0x5b2   : > { %v670_v2 = vmul.f32 1.442695, %v669_v63 }
 0x5b4   : > { %1252 = vpow2.f32 %v670_v2 }
 0x5be   : > { %v1253_v3 = vpop.eup %1252 }
 0x5bf   : > { %v672_v5 = vsel %vm323_vm3, %v1253_v3, 0.0 }
 0x5c0   : > { %673 = vadd.xlane.f32.xlu1 %v672_v5 }
 0x5d1   : > { %756 = vrot.lane.b32.xlu1 %v1357_v6, %s1289_s29 }
 0x64d   : > { %v674_v8 = vpop.xlane.xlu1 %673 }
 0x64e   : > { %1254 = vrcp.f32 %v674_v8 }
 0x651   : > { %v757_v0 = vpop.permute.xlu1 %756 }
 0x658   : > { %v1255_v11 = vpop.eup %1254 }
 0x659   : > { %v676_v12 = vmul.f32 %v1255_v11, %v1253_v3 }
 0x65b   : > { %1140 = vmatmul.mubr.msk.f32.vlgmr.msra.gmra.mrb[4].mxu1 %vm323_vm3, %v676_v12 }
 0x65c   : > { %1180 = vmatpush3.bf16.xpose.msk.msra.mxu1 %vm1344_vm2, %v1178_v13  ;;  %1146 = vmatprep.mubr.msk.f32.mxu1 %vm1285_vm0, %v1286_v1 }
 0x663   : > { %1147 = vmatmul.mubr.msk.f32.vlgmr.msra.gmra.mrb[6].mxu1 %vm242_vm1, %v757_v0 }
 0x72e   : > { %v752_v6 = vpop.f32.mrb[4].mxu1 }
 0x72f   : > { %v1141_v14 = vpop.f32.mrb[5].mxu1 }
 0x736   : > { %v834_v15 = vpop.f32.mrb[6].mxu1 }
 0x737   : > { %v838_v16 = vmul.f32 0.17677669, %v834_v15  ;;  %v1148_v17 = vpop.f32.mrb[7].mxu1 }
 0x739   : > { %v839_v18 = vsel %vm323_vm3, %v838_v16, -inf }
 0x73a   : > { %840 = vmax.xlane.f32.xlu0 %v839_v18 }
 0x750   : > { %1240 = vrot.lane.b32.xlu0 %v1389_v34, %s1289_s29 }
 0x754   : > { %930 = vrot.lane.b32.xlu0 %v579_v52, %s1289_s29 }
 0x758   : > { %934 = vrot.lane.b32.xlu0 %v752_v6, %s1288_s28 }
 0x7c7   : > { %v841_v4 = vpop.xlane.xlu0 %840 }
 0x7c8   : > { %v842_v1 = vsub.f32 %v838_v16, %v841_v4 }
 0x7ca   : > { %v843_v19 = vmul.f32 1.442695, %v842_v1 }
 0x7cb   : > { %v1241_v20 = vpop.permute.xlu0 %1240 }
 0x7cc   : > { %1256 = vpow2.f32 %v843_v19  ;;  %v1243_v21 = vunpack.i.h.bf16 %v1241_v20  ;;  %v1242_v22 = vunpack.i.l.bf16 %v1241_v20 }
 0x7ce   : > { %v1182_v23 = vpack.c.bf16 %v1243_v21, %v1242_v22 }
 0x7cf   : > { %v931_v32 = vpop.permute.xlu0 %930 }
 0x7d0   : > { %1183 = vmatpush3.bf16.msra.mxu0 %v1182_v23  ;;  %v941_v34 = vsel %vm242_vm1, %v1386_v28, %v931_v32 }
 0x7d3   : > { %v935_v33 = vpop.permute.xlu0 %934 }
 0x7d4   : > { %v943_v35 = vsel %vm942_vm4, %v941_v34, %v935_v33 }
 0x7d6   : > { %v1257_v24 = vpop.eup %1256 }
 0x7d7   : > { %v845_v25 = vsel %vm323_vm3, %v1257_v24, 0.0 }
 0x7d8   : > { %846 = vadd.xlane.f32.xlu1 %v845_v25 }
 0x865   : > { %v847_v26 = vpop.xlane.xlu1 %846 }
 0x866   : > { %1258 = vrcp.f32 %v847_v26 }
 0x870   : > { %v1259_v27 = vpop.eup %1258 }
 0x871   : > { %v849_v29 = vmul.f32 %v1259_v27, %v1257_v24 }
 0x873   : > { %1154 = vmatmul.mubr.msk.f32.vlgmr.msra.gmra.mrb[6].mxu0 %vm323_vm3, %v849_v29 }
 0x946   : > { %v925_v30 = vpop.f32.mrb[6].mxu0 }
 0x947   : > { %938 = vrot.lane.b32.xlu0 %v925_v30, %s1287_s24  ;;  %v1155_v31 = vpop.f32.mrb[7].mxu0 }
 0x9b9   : > { %v939_v36 = vpop.permute.xlu0 %938 }
 0x9ba   : > { %v945_v37 = vsel %vm944_vm5, %v943_v35, %v939_v36 }
 0x9bb   : > { %946 = vst [vmem:[%s236_s5] sm:$0xff] %v945_v37 }
 0x9bc PF: > { %s13_s14 = sadd.s32 1, %s1282_s14   ;;  %s1453_s12 = smov %s1278_s13 }
 0x9bd   : > { %p10_p5 = scmp.ge.s32.totalorder %s13_s14, 4   ;;  %s1454_s13 = smov %s1456_s15 }
 0x9bf   :  { %12 = sbr.rel (!%p10_p5) target bundleno = 2 (0x2), region = 68 }

// kernel: gpt_forward.29
= control target key start
LH: loop header
LB: loop body
LE: loop exit
PB: predicated region body
PF: predicated region fallthrough
CT: control target
= control target key end

     0   :  { %v444_v3 = vmov 0.0   ;;  %s694_s1 = inlined_call_operand.vmem [shape: f32[128,512], index: 1, kind: input, shape index: {}]   ;;  %s695_s0 = inlined_call_operand.vmem [shape: f32[16,128], index: 0, kind: input, shape index: {}]   ;;  %s696_s2 = inlined_call_operand.vmem [shape: f32[1,512], index: 2, kind: input, shape index: {}]   ;;  %s697_s3 = inlined_call_operand.vmem [shape: f32[16,512], index: 3, kind: output, shape index: {}]  }
   0x1   :  { %v37_v0 = vld [vmem:[%s694_s1 + $0x8] sm:$0xff]  ;;  %v39_v2 = vld [vmem:[%s694_s1 + $0x18] sm:$0xff]  ;;  %164 = vmatprep.mubr.f32.mxu0 %v444_v3  ;;  %241 = vmatprep.mubr.f32.mxu1 %v444_v3  ;;  %v36_v6 = vld [vmem:[%s694_s1] sm:$0xff] }
   0x2   :  { %v41_v1 = vld [vmem:[%s694_s1 + $0x28] sm:$0xff]  ;;  %v43_v5 = vld [vmem:[%s694_s1 + $0x38] sm:$0xff]  ;;  %v40_v7 = vld [vmem:[%s694_s1 + $0x20] sm:$0xff] }
   0x3   :  { %v363_v4 = vpack.c.bf16 %v41_v1, %v37_v0  ;;  %v395_v8 = vpack.c.bf16 %v43_v5, %v39_v2  ;;  %v365_v9 = vpack.c.bf16 %v40_v7, %v36_v6  ;;  %v38_v10 = vld [vmem:[%s694_s1 + $0x10] sm:$0xff]  ;;  %v45_v12 = vld [vmem:[%s694_s1 + $0x48] sm:$0xff]  ;;  %v47_v15 = vld [vmem:[%s694_s1 + $0x58] sm:$0xff] }
   0x4   :  { %v42_v11 = vld [vmem:[%s694_s1 + $0x30] sm:$0xff]  ;;  %v49_v14 = vld [vmem:[%s694_s1 + $0x68] sm:$0xff]  ;;  %v51_v16 = vld [vmem:[%s694_s1 + $0x78] sm:$0xff] }
   0x5   :  { %364 = vmatprep.subr.bf16.mxu0 %v363_v4  ;;  %v397_v13 = vpack.c.bf16 %v42_v11, %v38_v10  ;;  %396 = vmatprep.subr.bf16.mxu1 %v395_v8  ;;  %v367_v17 = vpack.c.bf16 %v49_v14, %v45_v12  ;;  %v399_v18 = vpack.c.bf16 %v51_v16, %v47_v15  ;;  %v44_v19 = vld [vmem:[%s694_s1 + $0x40] sm:$0xff]  ;;  %v46_v21 = vld [vmem:[%s694_s1 + $0x50] sm:$0xff]  ;;  %v53_v24 = vld [vmem:[%s694_s1 + $0x88] sm:$0xff] }
   0x6   :  { %366 = vmatpush1.bf16.msra.mxu0 %v365_v9  ;;  %v48_v20 = vld [vmem:[%s694_s1 + $0x60] sm:$0xff]  ;;  %v50_v23 = vld [vmem:[%s694_s1 + $0x70] sm:$0xff]  ;;  %v57_v25 = vld [vmem:[%s694_s1 + $0xa8] sm:$0xff] }
   0x7   :  { %398 = vmatpush1.bf16.msra.mxu1 %v397_v13  ;;  %v369_v22 = vpack.c.bf16 %v48_v20, %v44_v19  ;;  %368 = vmatprep.subr.bf16.mxu0 %v367_v17  ;;  %v401_v26 = vpack.c.bf16 %v50_v23, %v46_v21  ;;  %v371_v27 = vpack.c.bf16 %v57_v25, %v53_v24  ;;  %v55_v28 = vld [vmem:[%s694_s1 + $0x98] sm:$0xff]  ;;  %v52_v30 = vld [vmem:[%s694_s1 + $0x80] sm:$0xff]  ;;  %v54_v33 = vld [vmem:[%s694_s1 + $0x90] sm:$0xff] }
   0x8   :  { %400 = vmatprep.subr.bf16.mxu1 %v399_v18  ;;  %v59_v29 = vld [vmem:[%s694_s1 + $0xb8] sm:$0xff]  ;;  %v56_v32 = vld [vmem:[%s694_s1 + $0xa0] sm:$0xff]  ;;  %v58_v34 = vld [vmem:[%s694_s1 + $0xb0] sm:$0xff] }
   0x9   :  { %v403_v31 = vpack.c.bf16 %v59_v29, %v55_v28  ;;  %v373_v35 = vpack.c.bf16 %v56_v32, %v52_v30  ;;  %v61_v36 = vld [vmem:[%s694_s1 + $0xc8] sm:$0xff]  ;;  %v63_v38 = vld [vmem:[%s694_s1 + $0xd8] sm:$0xff]  ;;  %v405_v39 = vpack.c.bf16 %v58_v34, %v54_v33  ;;  %v60_v42 = vld [vmem:[%s694_s1 + $0xc0] sm:$0xff] }
   0xa   :  { %370 = vmatpush1.bf16.msra.mxu0 %v369_v22  ;;  %v65_v37 = vld [vmem:[%s694_s1 + $0xe8] sm:$0xff]  ;;  %v67_v41 = vld [vmem:[%s694_s1 + $0xf8] sm:$0xff]  ;;  %v64_v43 = vld [vmem:[%s694_s1 + $0xe0] sm:$0xff] }
   0xb   :  { %402 = vmatpush1.bf16.msra.mxu1 %v401_v26  ;;  %372 = vmatprep.subr.bf16.mxu0 %v371_v27  ;;  %v375_v40 = vpack.c.bf16 %v65_v37, %v61_v36  ;;  %v407_v44 = vpack.c.bf16 %v67_v41, %v63_v38  ;;  %v62_v45 = vld [vmem:[%s694_s1 + $0xd0] sm:$0xff]  ;;  %v69_v47 = vld [vmem:[%s694_s1 + $0x108] sm:$0xff]  ;;  %v71_v49 = vld [vmem:[%s694_s1 + $0x118] sm:$0xff]  ;;  %v377_v51 = vpack.c.bf16 %v64_v43, %v60_v42  ;;  %v283_v36 = vlaneseq }
   0xc   :  { %404 = vmatprep.subr.bf16.mxu1 %v403_v31  ;;  %v66_v46 = vld [vmem:[%s694_s1 + $0xf0] sm:$0xff]  ;;  %v73_v48 = vld [vmem:[%s694_s1 + $0x128] sm:$0xff]  ;;  %v75_v50 = vld [vmem:[%s694_s1 + $0x138] sm:$0xff] }
   0xd   :  { %v409_v52 = vpack.c.bf16 %v66_v46, %v62_v45  ;;  %v379_v53 = vpack.c.bf16 %v73_v48, %v69_v47  ;;  %v68_v54 = vld [vmem:[%s694_s1 + $0x100] sm:$0xff]  ;;  %v70_v56 = vld [vmem:[%s694_s1 + $0x110] sm:$0xff]  ;;  %v411_v57 = vpack.c.bf16 %v75_v50, %v71_v49  ;;  %v77_v59 = vld [vmem:[%s694_s1 + $0x148] sm:$0xff]  ;;  %v284_v37 = vshrl.u32 %v283_v36, 7 }
   0xe   :  { %374 = vmatpush1.bf16.msra.mxu0 %v373_v35  ;;  %v72_v55 = vld [vmem:[%s694_s1 + $0x120] sm:$0xff]  ;;  %v74_v58 = vld [vmem:[%s694_s1 + $0x130] sm:$0xff]  ;;  %v81_v60 = vld [vmem:[%s694_s1 + $0x168] sm:$0xff] }
   0xf   :  { %406 = vmatpush1.bf16.msra.mxu1 %v405_v39  ;;  %376 = vmatprep.subr.bf16.mxu0 %v375_v40  ;;  %v79_v61 = vld [vmem:[%s694_s1 + $0x158] sm:$0xff]  ;;  %v381_v63 = vpack.c.bf16 %v72_v55, %v68_v54  ;;  %v413_v0 = vpack.c.bf16 %v74_v58, %v70_v56  ;;  %v383_v1 = vpack.c.bf16 %v81_v60, %v77_v59  ;;  %v76_v2 = vld [vmem:[%s694_s1 + $0x140] sm:$0xff]  ;;  %v78_v5 = vld [vmem:[%s694_s1 + $0x150] sm:$0xff]  ;;  %v285_v38 = vsub.s32 0, %v284_v37 }
  0x10   :  { %408 = vmatprep.subr.bf16.mxu1 %v407_v44  ;;  %v83_v62 = vld [vmem:[%s694_s1 + $0x178] sm:$0xff]  ;;  %v80_v4 = vld [vmem:[%s694_s1 + $0x160] sm:$0xff]  ;;  %v82_v7 = vld [vmem:[%s694_s1 + $0x170] sm:$0xff]  ;;  %v293_v40 = vsub.s32 2, %v284_v37  ;;  %v289_v41 = vsub.s32 1, %v284_v37  ;;  %v297_v42 = vsub.s32 3, %v284_v37 }
  0x11   :  { %v415_v6 = vpack.c.bf16 %v83_v62, %v79_v61  ;;  %v85_v8 = vld [vmem:[%s694_s1 + $0x188] sm:$0xff]  ;;  %v87_v10 = vld [vmem:[%s694_s1 + $0x198] sm:$0xff]  ;;  %v385_v12 = vpack.c.bf16 %v80_v4, %v76_v2  ;;  %v417_v13 = vpack.c.bf16 %v82_v7, %v78_v5  ;;  %v84_v15 = vld [vmem:[%s694_s1 + $0x180] sm:$0xff] }
  0x12   :  { %378 = vmatpush1.bf16.msra.mxu0 %v377_v51  ;;  %v89_v9 = vld [vmem:[%s694_s1 + $0x1a8] sm:$0xff]  ;;  %v91_v11 = vld [vmem:[%s694_s1 + $0x1b8] sm:$0xff]  ;;  %v88_v16 = vld [vmem:[%s694_s1 + $0x1a0] sm:$0xff] }
  0x13   :  { %410 = vmatpush1.bf16.msra.mxu1 %v409_v52  ;;  %380 = vmatprep.subr.bf16.mxu0 %v379_v53  ;;  %v387_v14 = vpack.c.bf16 %v89_v9, %v85_v8  ;;  %v86_v17 = vld [vmem:[%s694_s1 + $0x190] sm:$0xff]  ;;  %v419_v18 = vpack.c.bf16 %v91_v11, %v87_v10  ;;  %v93_v20 = vld [vmem:[%s694_s1 + $0x1c8] sm:$0xff]  ;;  %v95_v22 = vld [vmem:[%s694_s1 + $0x1d8] sm:$0xff]  ;;  %v389_v24 = vpack.c.bf16 %v88_v16, %v84_v15 }
  0x14   :  { %412 = vmatprep.subr.bf16.mxu1 %v411_v57  ;;  %v90_v19 = vld [vmem:[%s694_s1 + $0x1b0] sm:$0xff]  ;;  %v97_v21 = vld [vmem:[%s694_s1 + $0x1e8] sm:$0xff]  ;;  %v99_v23 = vld [vmem:[%s694_s1 + $0x1f8] sm:$0xff] }
  0x15   :  { %v421_v25 = vpack.c.bf16 %v90_v19, %v86_v17  ;;  %v391_v26 = vpack.c.bf16 %v97_v21, %v93_v20  ;;  %v92_v27 = vld [vmem:[%s694_s1 + $0x1c0] sm:$0xff]  ;;  %v423_v29 = vpack.c.bf16 %v99_v23, %v95_v22  ;;  %v94_v30 = vld [vmem:[%s694_s1 + $0x1d0] sm:$0xff]  ;;  %v35_v35 = vld [vmem:[%s695_s0 + $0x8] sm:$0xff] }
  0x16   :  { %382 = vmatpush1.bf16.msra.mxu0 %v381_v63  ;;  %v96_v28 = vld [vmem:[%s694_s1 + $0x1e0] sm:$0xff]  ;;  %v98_v31 = vld [vmem:[%s694_s1 + $0x1f0] sm:$0xff] }
  0x17   :  { %414 = vmatpush1.bf16.msra.mxu1 %v413_v0  ;;  %384 = vmatprep.subr.bf16.mxu0 %v383_v1  ;;  %v393_v32 = vpack.c.bf16 %v96_v28, %v92_v27  ;;  %v425_v33 = vpack.c.bf16 %v98_v31, %v94_v30  ;;  %v34_v34 = vld [vmem:[%s695_s0] sm:$0xff] }
  0x18   :  { %416 = vmatprep.subr.bf16.mxu1 %v415_v6  ;;  %v281_v39 = vld [vmem:[%s696_s2] sm:$0xf] }
  0x19   :  { %v286_v43 = vrot.slane %v281_v39, %v285_v38  ;;  %v294_v44 = vrot.slane %v281_v39, %v293_v40  ;;  %v290_v45 = vrot.slane %v281_v39, %v289_v41  ;;  %v298_v46 = vrot.slane %v281_v39, %v297_v42 }
  0x1a   :  { %386 = vmatpush1.bf16.msra.mxu0 %v385_v12 }
  0x1b   :  { %418 = vmatpush1.bf16.msra.mxu1 %v417_v13  ;;  %388 = vmatprep.subr.bf16.mxu0 %v387_v14 }
  0x1c   :  { %420 = vmatprep.subr.bf16.mxu1 %v419_v18 }
  0x1e   :  { %390 = vmatpush1.bf16.msra.mxu0 %v389_v24 }
  0x1f   :  { %422 = vmatpush1.bf16.msra.mxu1 %v421_v25  ;;  %392 = vmatprep.subr.bf16.mxu0 %v391_v26 }
  0x20   :  { %424 = vmatprep.subr.bf16.mxu1 %v423_v29 }
  0x22   :  { %394 = vmatpush1.bf16.msra.mxu0 %v393_v32 }
  0x23   :  { %426 = vmatpush1.bf16.msra.mxu1 %v425_v33 }
  0x25   :  { %165 = vmatmul.mubr.f32.vlgmr.msra.gmra.mrb[0].mxu0 %v34_v34 }
  0x26   :  { %242 = vmatmul.mubr.f32.vlgmr.msra.gmra.mrb[0].mxu1 %v34_v34  ;;  %170 = vmatprep.mubr.f32.mxu0 %v444_v3 }
  0x27   :  { %247 = vmatprep.mubr.f32.mxu1 %v444_v3 }
  0x29   :  { %171 = vmatmul.mubr.f32.gmra.mrb[2].mxu0 %v35_v35 }
  0x2a   :  { %248 = vmatmul.mubr.f32.gmra.mrb[2].mxu1 %v35_v35 }
  0xf8   :  { %v166_v47 = vpop.f32.mrb[0].mxu0 }
  0xf9   :  { %v303_v48 = vadd.f32 %v286_v43, %v166_v47  ;;  %v243_v49 = vpop.f32.mrb[0].mxu1  ;;  %v168_v3 = vpop.f32.mrb[1].mxu0 }
  0xfa   :  { %v305_v50 = vadd.f32 %v294_v44, %v243_v49  ;;  %v304_v51 = vadd.f32 %v290_v45, %v168_v3  ;;  %v245_v52 = vpop.f32.mrb[1].mxu1 }
  0xfb   :  { %v319_v53 = vmul.f32 0.70710677, %v303_v48  ;;  %v306_v54 = vadd.f32 %v298_v46, %v245_v52  ;;  %v311_v9 = vmul.f32 0.5, %v303_v48 }
  0xfc   :  { %v321_v55 = vmul.f32 0.70710677, %v305_v50  ;;  %v320_v56 = vmul.f32 0.70710677, %v304_v51  ;;  %v172_v58 = vpop.f32.mrb[2].mxu0  ;;  %v313_v12 = vmul.f32 0.5, %v305_v50 }
  0xfd   :  { %428 = verf.f32 %v319_v53  ;;  %v322_v57 = vmul.f32 0.70710677, %v306_v54  ;;  %v249_v59 = vpop.f32.mrb[2].mxu1  ;;  %v307_v60 = vadd.f32 %v286_v43, %v172_v58  ;;  %v174_v62 = vpop.f32.mrb[3].mxu0  ;;  %v312_v16 = vmul.f32 0.5, %v304_v51 }
  0xfe   :  { %430 = verf.f32 %v321_v55  ;;  %v309_v61 = vadd.f32 %v294_v44, %v249_v59  ;;  %v251_v63 = vpop.f32.mrb[3].mxu1  ;;  %v308_v0 = vadd.f32 %v290_v45, %v174_v62  ;;  %v314_v19 = vmul.f32 0.5, %v306_v54 }
  0xff   :  { %432 = verf.f32 %v320_v56  ;;  %v310_v1 = vadd.f32 %v298_v46, %v251_v63  ;;  %v323_v2 = vmul.f32 0.70710677, %v307_v60  ;;  %v315_v25 = vmul.f32 0.5, %v307_v60 }
 0x100   :  { %434 = verf.f32 %v322_v57  ;;  %v325_v4 = vmul.f32 0.70710677, %v309_v61  ;;  %v324_v5 = vmul.f32 0.70710677, %v308_v0  ;;  %v317_v28 = vmul.f32 0.5, %v309_v61 }
 0x101   :  { %436 = verf.f32 %v323_v2  ;;  %v326_v6 = vmul.f32 0.70710677, %v310_v1  ;;  %v316_v32 = vmul.f32 0.5, %v308_v0  ;;  %v318_v35 = vmul.f32 0.5, %v310_v1 }
 0x102   :  { %438 = verf.f32 %v325_v4 }
 0x103   :  { %440 = verf.f32 %v324_v5 }
 0x104   :  { %442 = verf.f32 %v326_v6 }
 0x107   :  { %v429_v7 = vpop.eup %428 }
 0x108   :  { %v431_v8 = vpop.eup %430  ;;  %v335_v10 = vadd.f32 1.0, %v429_v7 }
 0x109   :  { %v433_v11 = vpop.eup %432  ;;  %v337_v13 = vadd.f32 1.0, %v431_v8 }
 0x10a   :  { %v435_v14 = vpop.eup %434  ;;  %v343_v15 = vmul.f32 %v335_v10, %v311_v9  ;;  %v336_v17 = vadd.f32 1.0, %v433_v11 }
 0x10b   :  { %v345_v18 = vmul.f32 %v337_v13, %v313_v12  ;;  %v338_v20 = vadd.f32 1.0, %v435_v14  ;;  %v437_v21 = vpop.eup %436 }
 0x10c   :  { %351 = vst [vmem:[%s697_s3] sm:$0xff] %v343_v15  ;;  %v344_v22 = vmul.f32 %v336_v17, %v312_v16  ;;  %v439_v23 = vpop.eup %438  ;;  %v339_v26 = vadd.f32 1.0, %v437_v21 }
 0x10d   :  { %353 = vst [vmem:[%s697_s3 + $0x10] sm:$0xff] %v345_v18  ;;  %v346_v24 = vmul.f32 %v338_v20, %v314_v19  ;;  %v441_v27 = vpop.eup %440  ;;  %v341_v29 = vadd.f32 1.0, %v439_v23 }
 0x10e   :  { %352 = vst [vmem:[%s697_s3 + $0x8] sm:$0xff] %v344_v22  ;;  %v443_v30 = vpop.eup %442  ;;  %v347_v31 = vmul.f32 %v339_v26, %v315_v25  ;;  %v340_v33 = vadd.f32 1.0, %v441_v27 }
 0x10f   :  { %354 = vst [vmem:[%s697_s3 + $0x18] sm:$0xff] %v346_v24  ;;  %v349_v34 = vmul.f32 %v341_v29, %v317_v28  ;;  %v342_v36 = vadd.f32 1.0, %v443_v30 }
 0x110   :  { %355 = vst [vmem:[%s697_s3 + $0x20] sm:$0xff] %v347_v31  ;;  %v348_v37 = vmul.f32 %v340_v33, %v316_v32 }
 0x111   :  { %357 = vst [vmem:[%s697_s3 + $0x30] sm:$0xff] %v349_v34  ;;  %v350_v38 = vmul.f32 %v342_v36, %v318_v35 }
 0x112   :  { %356 = vst [vmem:[%s697_s3 + $0x28] sm:$0xff] %v348_v37 }
 0x113   :  { %358 = vst [vmem:[%s697_s3 + $0x38] sm:$0xff] %v350_v38 }

// kernel: gpt_forward.40
= control target key start
LH: loop header
LB: loop body
LE: loop exit
PB: predicated region body
PF: predicated region fallthrough
CT: control target
= control target key end

     0   :  { %s175_s0 = inlined_call_operand.vmem [shape: f32[16,128], index: 0, kind: input, shape index: {}]   ;;  %s176_s1 = inlined_call_operand.vmem [shape: f32[1,128], index: 1, kind: input, shape index: {}]   ;;  %s177_s2 = inlined_call_operand.vmem [shape: f32[1,128], index: 2, kind: input, shape index: {}]   ;;  %s178_s3 = inlined_call_operand.vmem [shape: f32[1,128], index: 3, kind: input, shape index: {}]   ;;  %s179_s4 = inlined_call_operand.vmem [shape: f32[1,128], index: 4, kind: input, shape index: {}]   ;;  %s180_s5 = inlined_call_operand.vmem [shape: f32[16,128], index: 5, kind: output, shape index: {}]  }
   0x1   :  { %v20_v0 = vld [vmem:[%s175_s0] sm:$0xff]  ;;  %v21_v1 = vld [vmem:[%s175_s0 + $0x8] sm:$0xff] }
   0x2   :  { %24 = vadd.xlane.f32.xlu0 %v20_v0  ;;  %v109_v17 = vld [vmem:[%s176_s1] ss:$0 sm:$0xff] }
   0x3   :  { %v110_v19 = vld [vmem:[%s177_s2] ss:$0 sm:$0xff] }
   0x4   :  { %v111_v41 = vld [vmem:[%s178_s3] ss:$0 sm:$0xff] }
   0x5   :  { %v112_v43 = vld [vmem:[%s179_s4] ss:$0 sm:$0xff] }
   0x6   :  { %26 = vadd.xlane.f32.xlu0 %v21_v1 }
  0x8f   :  { %v25_v2 = vpop.xlane.xlu0 %24 }
  0x90   :  { %v29_v3 = vmul.f32 0.0078125, %v25_v2 }
  0x92   :  { %v31_v4 = vsub.f32 %v20_v0, %v29_v3 }
  0x93   :  { %v27_v5 = vpop.xlane.xlu0 %26 }
  0x94   :  { %v30_v6 = vmul.f32 0.0078125, %v27_v5  ;;  %v33_v7 = vmul.f32 %v31_v4, %v31_v4 }
  0x96   :  { %v32_v8 = vsub.f32 %v21_v1, %v30_v6  ;;  %35 = vadd.xlane.f32.xlu1 %v33_v7 }
  0x98   :  { %v34_v9 = vmul.f32 %v32_v8, %v32_v8 }
  0x9a   :  { %37 = vadd.xlane.f32.xlu1 %v34_v9 }
 0x123   :  { %v36_v10 = vpop.xlane.xlu1 %35 }
 0x124   :  { %v39_v11 = vmul.f32 0.0078125, %v36_v10 }
 0x126   :  { %v41_v12 = vadd.f32 1e-05, %v39_v11 }
 0x127   :  { %v38_v13 = vpop.xlane.xlu1 %37 }
 0x128   :  { %113 = vrsqrt.f32 %v41_v12  ;;  %v40_v14 = vmul.f32 0.0078125, %v38_v13 }
 0x12a   :  { %v42_v15 = vadd.f32 1e-05, %v40_v14 }
 0x12c   :  { %115 = vrsqrt.f32 %v42_v15 }
 0x132   :  { %v114_v16 = vpop.eup %113 }
 0x133   :  { %v45_v18 = vmul.f32 %v114_v16, %v31_v4 }
 0x135   :  { %v53_v20 = vmul.f32 %v109_v17, %v45_v18 }
 0x136   :  { %v116_v21 = vpop.eup %115 }
 0x137   :  { %v61_v22 = vadd.f32 %v110_v19, %v53_v20  ;;  %v46_v23 = vmul.f32 %v116_v21, %v32_v8 }
 0x139   :  { %65 = vadd.xlane.f32.xlu0 %v61_v22  ;;  %v54_v24 = vmul.f32 %v109_v17, %v46_v23 }
 0x13b   :  { %v62_v25 = vadd.f32 %v110_v19, %v54_v24 }
 0x13d   :  { %67 = vadd.xlane.f32.xlu1 %v62_v25 }
 0x1c6   :  { %v66_v26 = vpop.xlane.xlu0 %65 }
 0x1c7   :  { %v69_v27 = vmul.f32 0.0078125, %v66_v26 }
 0x1c9   :  { %v71_v28 = vsub.f32 %v61_v22, %v69_v27 }
 0x1ca   :  { %v68_v29 = vpop.xlane.xlu1 %67 }
 0x1cb   :  { %v70_v30 = vmul.f32 0.0078125, %v68_v29  ;;  %v73_v31 = vmul.f32 %v71_v28, %v71_v28 }
 0x1cd   :  { %v72_v32 = vsub.f32 %v62_v25, %v70_v30  ;;  %75 = vadd.xlane.f32.xlu0 %v73_v31 }
 0x1cf   :  { %v74_v33 = vmul.f32 %v72_v32, %v72_v32 }
 0x1d1   :  { %77 = vadd.xlane.f32.xlu1 %v74_v33 }
 0x25a   :  { %v76_v34 = vpop.xlane.xlu0 %75 }
 0x25b   :  { %v79_v35 = vmul.f32 0.0078125, %v76_v34 }
 0x25d   :  { %v81_v36 = vadd.f32 1e-05, %v79_v35 }
 0x25e   :  { %v78_v37 = vpop.xlane.xlu1 %77 }
 0x25f   :  { %117 = vrsqrt.f32 %v81_v36  ;;  %v80_v38 = vmul.f32 0.0078125, %v78_v37 }
 0x261   :  { %v82_v39 = vadd.f32 1e-05, %v80_v38 }
 0x263   :  { %119 = vrsqrt.f32 %v82_v39 }
 0x269   :  { %v118_v40 = vpop.eup %117 }
 0x26a   :  { %v85_v42 = vmul.f32 %v118_v40, %v71_v28 }
 0x26c   :  { %v93_v44 = vmul.f32 %v111_v41, %v85_v42 }
 0x26d   :  { %v120_v45 = vpop.eup %119 }
 0x26e   :  { %v101_v46 = vadd.f32 %v112_v43, %v93_v44  ;;  %v86_v47 = vmul.f32 %v120_v45, %v72_v32 }
 0x270   :  { %103 = vst [vmem:[%s180_s5] sm:$0xff] %v101_v46  ;;  %v94_v48 = vmul.f32 %v111_v41, %v86_v47 }
 0x272   :  { %v102_v49 = vadd.f32 %v112_v43, %v94_v48 }
 0x274   :  { %104 = vst [vmem:[%s180_s5 + $0x8] sm:$0xff] %v102_v49 }

// kernel: gpt_forward.30
= control target key start
LH: loop header
LB: loop body
LE: loop exit
PB: predicated region body
PF: predicated region fallthrough
CT: control target
= control target key end

     0   :  { %s741_s1 = inlined_call_operand.vmem [shape: f32[512,128], index: 1, kind: input, shape index: {}]   ;;  %s742_s0 = inlined_call_operand.vmem [shape: f32[16,512], index: 0, kind: input, shape index: {}]   ;;  %s743_s2 = inlined_call_operand.vmem [shape: f32[1,128], index: 2, kind: input, shape index: {}]   ;;  %s744_s3 = inlined_call_operand.vmem [shape: f32[16,128], index: 3, kind: input, shape index: {}]   ;;  %s745_s4 = inlined_call_operand.vmem [shape: f32[1,128], index: 4, kind: input, shape index: {}]   ;;  %s746_s5 = inlined_call_operand.vmem [shape: f32[1,128], index: 5, kind: input, shape index: {}]   ;;  %s747_s6 = inlined_call_operand.vmem [shape: f32[16,128], index: 6, kind: output, shape index: {}]  }
   0x1   :  { %v55_v0 = vld [vmem:[%s741_s1 + $0x80] sm:$0xff]  ;;  %v56_v1 = vld [vmem:[%s741_s1 + $0x88] sm:$0xff]  ;;  %v57_v11 = vld [vmem:[%s741_s1 + $0x90] sm:$0xff] }
   0x2   :  { %v87_v2 = vld [vmem:[%s741_s1 + $0x180] sm:$0xff]  ;;  %v401_v3 = vpack.c.bf16 %v56_v1, %v55_v0  ;;  %v88_v4 = vld [vmem:[%s741_s1 + $0x188] sm:$0xff]  ;;  %v58_v13 = vld [vmem:[%s741_s1 + $0x98] sm:$0xff] }
   0x3   :  { %v39_v5 = vld [vmem:[%s741_s1] sm:$0xff]  ;;  %v40_v6 = vld [vmem:[%s741_s1 + $0x8] sm:$0xff]  ;;  %v433_v7 = vpack.c.bf16 %v88_v4, %v87_v2  ;;  %v89_v14 = vld [vmem:[%s741_s1 + $0x190] sm:$0xff]  ;;  %v405_v16 = vpack.c.bf16 %v58_v13, %v57_v11 }
   0x4   :  { %v403_v8 = vpack.c.bf16 %v40_v6, %v39_v5  ;;  %v71_v9 = vld [vmem:[%s741_s1 + $0x100] sm:$0xff]  ;;  %v72_v10 = vld [vmem:[%s741_s1 + $0x108] sm:$0xff]  ;;  %402 = vmatprep.subr.bf16.mxu0 %v401_v3  ;;  %v90_v15 = vld [vmem:[%s741_s1 + $0x198] sm:$0xff] }
   0x5   :  { %v435_v12 = vpack.c.bf16 %v72_v10, %v71_v9  ;;  %434 = vmatprep.subr.bf16.mxu1 %v433_v7  ;;  %v437_v17 = vpack.c.bf16 %v90_v15, %v89_v14  ;;  %v41_v18 = vld [vmem:[%s741_s1 + $0x10] sm:$0xff]  ;;  %v42_v19 = vld [vmem:[%s741_s1 + $0x18] sm:$0xff]  ;;  %v59_v23 = vld [vmem:[%s741_s1 + $0xa0] sm:$0xff] }
   0x6   :  { %404 = vmatpush3.bf16.msra.mxu0 %v403_v8  ;;  %v73_v20 = vld [vmem:[%s741_s1 + $0x110] sm:$0xff]  ;;  %v407_v21 = vpack.c.bf16 %v42_v19, %v41_v18  ;;  %v74_v22 = vld [vmem:[%s741_s1 + $0x118] sm:$0xff]  ;;  %v60_v24 = vld [vmem:[%s741_s1 + $0xa8] sm:$0xff] }
   0x7   :  { %436 = vmatpush3.bf16.msra.mxu1 %v435_v12  ;;  %406 = vmatprep.subr.bf16.mxu0 %v405_v16  ;;  %v439_v25 = vpack.c.bf16 %v74_v22, %v73_v20  ;;  %v409_v26 = vpack.c.bf16 %v60_v24, %v59_v23  ;;  %v91_v27 = vld [vmem:[%s741_s1 + $0x1a0] sm:$0xff]  ;;  %v92_v28 = vld [vmem:[%s741_s1 + $0x1a8] sm:$0xff]  ;;  %v61_v35 = vld [vmem:[%s741_s1 + $0xb0] sm:$0xff] }
   0x8   :  { %438 = vmatprep.subr.bf16.mxu1 %v437_v17  ;;  %v43_v29 = vld [vmem:[%s741_s1 + $0x20] sm:$0xff]  ;;  %v441_v30 = vpack.c.bf16 %v92_v28, %v91_v27  ;;  %v44_v31 = vld [vmem:[%s741_s1 + $0x28] sm:$0xff]  ;;  %v62_v36 = vld [vmem:[%s741_s1 + $0xb8] sm:$0xff] }
   0x9   :  { %v75_v32 = vld [vmem:[%s741_s1 + $0x120] sm:$0xff]  ;;  %v76_v33 = vld [vmem:[%s741_s1 + $0x128] sm:$0xff]  ;;  %v411_v34 = vpack.c.bf16 %v44_v31, %v43_v29  ;;  %v93_v37 = vld [vmem:[%s741_s1 + $0x1b0] sm:$0xff]  ;;  %v413_v39 = vpack.c.bf16 %v62_v36, %v61_v35 }
   0xa   :  { %408 = vmatpush3.bf16.msra.mxu0 %v407_v21  ;;  %v443_v38 = vpack.c.bf16 %v76_v33, %v75_v32  ;;  %v94_v40 = vld [vmem:[%s741_s1 + $0x1b8] sm:$0xff]  ;;  %v45_v41 = vld [vmem:[%s741_s1 + $0x30] sm:$0xff]  ;;  %v63_v46 = vld [vmem:[%s741_s1 + $0xc0] sm:$0xff] }
   0xb   :  { %440 = vmatpush3.bf16.msra.mxu1 %v439_v25  ;;  %410 = vmatprep.subr.bf16.mxu0 %v409_v26  ;;  %v46_v42 = vld [vmem:[%s741_s1 + $0x38] sm:$0xff]  ;;  %v445_v43 = vpack.c.bf16 %v94_v40, %v93_v37  ;;  %v77_v44 = vld [vmem:[%s741_s1 + $0x130] sm:$0xff]  ;;  %v64_v47 = vld [vmem:[%s741_s1 + $0xc8] sm:$0xff] }
   0xc   :  { %442 = vmatprep.subr.bf16.mxu1 %v441_v30  ;;  %v78_v45 = vld [vmem:[%s741_s1 + $0x138] sm:$0xff]  ;;  %v95_v48 = vld [vmem:[%s741_s1 + $0x1c0] sm:$0xff]  ;;  %v96_v49 = vld [vmem:[%s741_s1 + $0x1c8] sm:$0xff]  ;;  %v415_v50 = vpack.c.bf16 %v46_v42, %v45_v41  ;;  %v417_v52 = vpack.c.bf16 %v64_v47, %v63_v46 }
   0xd   :  { %v447_v51 = vpack.c.bf16 %v78_v45, %v77_v44  ;;  %v47_v53 = vld [vmem:[%s741_s1 + $0x40] sm:$0xff]  ;;  %v48_v54 = vld [vmem:[%s741_s1 + $0x48] sm:$0xff]  ;;  %v449_v56 = vpack.c.bf16 %v96_v49, %v95_v48  ;;  %v65_v58 = vld [vmem:[%s741_s1 + $0xd0] sm:$0xff] }
   0xe   :  { %412 = vmatpush3.bf16.msra.mxu0 %v411_v34  ;;  %v79_v55 = vld [vmem:[%s741_s1 + $0x140] sm:$0xff]  ;;  %v80_v57 = vld [vmem:[%s741_s1 + $0x148] sm:$0xff]  ;;  %v66_v59 = vld [vmem:[%s741_s1 + $0xd8] sm:$0xff]  ;;  %v419_v62 = vpack.c.bf16 %v48_v54, %v47_v53 }
   0xf   :  { %444 = vmatpush3.bf16.msra.mxu1 %v443_v38  ;;  %414 = vmatprep.subr.bf16.mxu0 %v413_v39  ;;  %v97_v60 = vld [vmem:[%s741_s1 + $0x1d0] sm:$0xff]  ;;  %v98_v61 = vld [vmem:[%s741_s1 + $0x1d8] sm:$0xff]  ;;  %v451_v63 = vpack.c.bf16 %v80_v57, %v79_v55  ;;  %v421_v0 = vpack.c.bf16 %v66_v59, %v65_v58  ;;  %v67_v6 = vld [vmem:[%s741_s1 + $0xe0] sm:$0xff] }
  0x10   :  { %446 = vmatprep.subr.bf16.mxu1 %v445_v43  ;;  %v49_v1 = vld [vmem:[%s741_s1 + $0x50] sm:$0xff]  ;;  %v50_v2 = vld [vmem:[%s741_s1 + $0x58] sm:$0xff]  ;;  %v453_v4 = vpack.c.bf16 %v98_v61, %v97_v60  ;;  %v68_v7 = vld [vmem:[%s741_s1 + $0xe8] sm:$0xff] }
  0x11   :  { %v81_v3 = vld [vmem:[%s741_s1 + $0x150] sm:$0xff]  ;;  %v82_v5 = vld [vmem:[%s741_s1 + $0x158] sm:$0xff]  ;;  %v99_v8 = vld [vmem:[%s741_s1 + $0x1e0] sm:$0xff]  ;;  %v423_v10 = vpack.c.bf16 %v50_v2, %v49_v1  ;;  %v425_v14 = vpack.c.bf16 %v68_v7, %v67_v6 }
  0x12   :  { %416 = vmatpush3.bf16.msra.mxu0 %v415_v50  ;;  %v100_v9 = vld [vmem:[%s741_s1 + $0x1e8] sm:$0xff]  ;;  %v51_v11 = vld [vmem:[%s741_s1 + $0x60] sm:$0xff]  ;;  %v455_v13 = vpack.c.bf16 %v82_v5, %v81_v3  ;;  %v34_v17 = vld [vmem:[%s742_s0 + $0x18] sm:$0xff] }
  0x13   :  { %448 = vmatpush3.bf16.msra.mxu1 %v447_v51  ;;  %418 = vmatprep.subr.bf16.mxu0 %v417_v52  ;;  %v52_v12 = vld [vmem:[%s741_s1 + $0x68] sm:$0xff]  ;;  %v83_v15 = vld [vmem:[%s741_s1 + $0x160] sm:$0xff]  ;;  %v457_v18 = vpack.c.bf16 %v100_v9, %v99_v8  ;;  %v69_v20 = vld [vmem:[%s741_s1 + $0xf0] sm:$0xff] }
  0x14   :  { %450 = vmatprep.subr.bf16.mxu1 %v449_v56  ;;  %v32_v16 = vld [vmem:[%s742_s0 + $0x8] sm:$0xff]  ;;  %v70_v21 = vld [vmem:[%s741_s1 + $0xf8] sm:$0xff]  ;;  %v101_v22 = vld [vmem:[%s741_s1 + $0x1f0] sm:$0xff]  ;;  %242 = vmatprep.mubr.f32.mxu1 %v34_v17  ;;  %v427_v24 = vpack.c.bf16 %v52_v12, %v51_v11 }
  0x15   :  { %v84_v19 = vld [vmem:[%s741_s1 + $0x168] sm:$0xff]  ;;  %167 = vmatprep.mubr.f32.mxu0 %v32_v16  ;;  %v102_v23 = vld [vmem:[%s741_s1 + $0x1f8] sm:$0xff]  ;;  %v429_v26 = vpack.c.bf16 %v70_v21, %v69_v20  ;;  %v53_v27 = vld [vmem:[%s741_s1 + $0x70] sm:$0xff] }
  0x16   :  { %420 = vmatpush3.bf16.msra.mxu0 %v419_v62  ;;  %v459_v25 = vpack.c.bf16 %v84_v19, %v83_v15  ;;  %v54_v28 = vld [vmem:[%s741_s1 + $0x78] sm:$0xff]  ;;  %v461_v29 = vpack.c.bf16 %v102_v23, %v101_v22  ;;  %v85_v30 = vld [vmem:[%s741_s1 + $0x170] sm:$0xff]  ;;  %v31_v34 = vld [vmem:[%s742_s0] sm:$0xff] }
  0x17   :  { %452 = vmatpush3.bf16.msra.mxu1 %v451_v63  ;;  %422 = vmatprep.subr.bf16.mxu0 %v421_v0  ;;  %v86_v31 = vld [vmem:[%s741_s1 + $0x178] sm:$0xff]  ;;  %v431_v32 = vpack.c.bf16 %v54_v28, %v53_v27  ;;  %v33_v35 = vld [vmem:[%s742_s0 + $0x10] sm:$0xff]  ;;  %v36_v36 = vld [vmem:[%s742_s0 + $0x28] sm:$0xff] }
  0x18   :  { %454 = vmatprep.subr.bf16.mxu1 %v453_v4  ;;  %v463_v33 = vpack.c.bf16 %v86_v31, %v85_v30  ;;  %v38_v37 = vld [vmem:[%s742_s0 + $0x38] sm:$0xff]  ;;  %v35_v38 = vld [vmem:[%s742_s0 + $0x20] sm:$0xff]  ;;  %v37_v39 = vld [vmem:[%s742_s0 + $0x30] sm:$0xff] }
  0x19   :  { %v322_v47 = vld [vmem:[%s743_s2] ss:$0 sm:$0xff]  ;;  %v272_v58 = vld [vmem:[%s744_s3 + $0x8] sm:$0xff] }
  0x1a   :  { %424 = vmatpush3.bf16.msra.mxu0 %v423_v10  ;;  %v271_v53 = vld [vmem:[%s744_s3] sm:$0xff] }
  0x1b   :  { %456 = vmatpush3.bf16.msra.mxu1 %v455_v13  ;;  %426 = vmatprep.subr.bf16.mxu0 %v425_v14  ;;  %v323_v12 = vld [vmem:[%s745_s4] ss:$0 sm:$0xff] }
  0x1c   :  { %458 = vmatprep.subr.bf16.mxu1 %v457_v18  ;;  %v324_v14 = vld [vmem:[%s746_s5] ss:$0 sm:$0xff] }
  0x1e   :  { %428 = vmatpush3.bf16.msra.mxu0 %v427_v24 }
  0x1f   :  { %460 = vmatpush3.bf16.msra.mxu1 %v459_v25  ;;  %430 = vmatprep.subr.bf16.mxu0 %v429_v26 }
  0x20   :  { %462 = vmatprep.subr.bf16.mxu1 %v461_v29 }
  0x22   :  { %432 = vmatpush3.bf16.msra.mxu0 %v431_v32 }
  0x23   :  { %464 = vmatpush3.bf16.msra.mxu1 %v463_v33 }
  0x25   :  { %168 = vmatmul.mubr.f32.vlgmr.msra.gmra.mrb[0].mxu0 %v31_v34 }
  0x26   :  { %243 = vmatmul.mubr.f32.vlgmr.msra.gmra.mrb[0].mxu1 %v33_v35  ;;  %172 = vmatprep.mubr.f32.mxu0 %v36_v36 }
  0x27   :  { %247 = vmatprep.mubr.f32.mxu1 %v38_v37 }
  0x29   :  { %173 = vmatmul.mubr.f32.gmra.mrb[2].mxu0 %v35_v38 }
  0x2a   :  { %248 = vmatmul.mubr.f32.gmra.mrb[2].mxu1 %v37_v39 }
  0xf8   :  { %v357_v40 = vpop.f32.mrb[0].mxu0 }
  0xf9   :  { %v395_v41 = vpop.f32.mrb[0].mxu1  ;;  %v358_v42 = vpop.f32.mrb[1].mxu0 }
  0xfa   :  { %v359_v43 = vadd.f32 %v358_v42, %v357_v40  ;;  %v396_v44 = vpop.f32.mrb[1].mxu1 }
  0xfb   :  { %v397_v45 = vadd.f32 %v396_v44, %v395_v41 }
  0xfc   :  { %v360_v46 = vpop.f32.mrb[2].mxu0 }
  0xfd   :  { %v245_v48 = vadd.f32 %v397_v45, %v359_v43  ;;  %v398_v49 = vpop.f32.mrb[2].mxu1  ;;  %v361_v50 = vpop.f32.mrb[3].mxu0 }
  0xfe   :  { %v362_v51 = vadd.f32 %v361_v50, %v360_v46  ;;  %v399_v52 = vpop.f32.mrb[3].mxu1 }
  0xff   :  { %v400_v54 = vadd.f32 %v399_v52, %v398_v49  ;;  %v269_v55 = vadd.f32 %v322_v47, %v245_v48 }
 0x101   :  { %v250_v56 = vadd.f32 %v400_v54, %v362_v51  ;;  %v273_v57 = vadd.f32 %v271_v53, %v269_v55 }
 0x103   :  { %275 = vadd.xlane.f32.xlu0 %v273_v57  ;;  %v270_v59 = vadd.f32 %v322_v47, %v250_v56 }
 0x105   :  { %v274_v60 = vadd.f32 %v272_v58, %v270_v59 }
 0x107   :  { %277 = vadd.xlane.f32.xlu0 %v274_v60 }
 0x190   :  { %v276_v61 = vpop.xlane.xlu0 %275 }
 0x191   :  { %v280_v62 = vmul.f32 0.0078125, %v276_v61 }
 0x193   :  { %v282_v63 = vsub.f32 %v273_v57, %v280_v62 }
 0x194   :  { %v278_v0 = vpop.xlane.xlu0 %277 }
 0x195   :  { %v281_v1 = vmul.f32 0.0078125, %v278_v0  ;;  %v284_v2 = vmul.f32 %v282_v63, %v282_v63 }
 0x197   :  { %v283_v3 = vsub.f32 %v274_v60, %v281_v1  ;;  %286 = vadd.xlane.f32.xlu1 %v284_v2 }
 0x199   :  { %v285_v4 = vmul.f32 %v283_v3, %v283_v3 }
 0x19b   :  { %288 = vadd.xlane.f32.xlu1 %v285_v4 }
 0x224   :  { %v287_v5 = vpop.xlane.xlu1 %286 }
 0x225   :  { %v290_v6 = vmul.f32 0.0078125, %v287_v5 }
 0x227   :  { %v292_v7 = vadd.f32 1e-05, %v290_v6 }
 0x228   :  { %v289_v8 = vpop.xlane.xlu1 %288 }
 0x229   :  { %465 = vrsqrt.f32 %v292_v7  ;;  %v291_v9 = vmul.f32 0.0078125, %v289_v8 }
 0x22b   :  { %v293_v10 = vadd.f32 1e-05, %v291_v9 }
 0x22d   :  { %467 = vrsqrt.f32 %v293_v10 }
 0x233   :  { %v466_v11 = vpop.eup %465 }
 0x234   :  { %v296_v13 = vmul.f32 %v466_v11, %v282_v63 }
 0x236   :  { %v305_v15 = vmul.f32 %v323_v12, %v296_v13 }
 0x237   :  { %v468_v16 = vpop.eup %467 }
 0x238   :  { %v314_v17 = vadd.f32 %v324_v14, %v305_v15  ;;  %v297_v18 = vmul.f32 %v468_v16, %v283_v3 }
 0x23a   :  { %316 = vst [vmem:[%s747_s6] sm:$0xff] %v314_v17  ;;  %v306_v19 = vmul.f32 %v323_v12, %v297_v18 }
 0x23c   :  { %v315_v20 = vadd.f32 %v324_v14, %v306_v19 }
 0x23e   :  { %317 = vst [vmem:[%s747_s6 + $0x8] sm:$0xff] %v315_v20 }

// kernel: gpt_forward.41
= control target key start
LH: loop header
LB: loop body
LE: loop exit
PB: predicated region body
PF: predicated region fallthrough
CT: control target
= control target key end

     0   :  { %s357_s0 = inlined_call_operand.vmem [shape: f32[16,128], index: 0, kind: input, shape index: {}]   ;;  %s358_s1 = inlined_call_operand.vmem [shape: f32[128,128], index: 1, kind: input, shape index: {}]   ;;  %s359_s2 = inlined_call_operand.vmem [shape: f32[1,128], index: 2, kind: input, shape index: {}]   ;;  %s360_s3 = inlined_call_operand.hbm [shape: f32[16,128], index: 3, kind: output, shape index: {}]  }
   0x1   :  { %v25_v0 = vld [vmem:[%s358_s1] sm:$0xff]  ;;  %v26_v1 = vld [vmem:[%s358_s1 + $0x8] sm:$0xff]  ;;  %v27_v2 = vld [vmem:[%s358_s1 + $0x10] sm:$0xff] }
   0x2   :  { %v206_v3 = vpack.c.bf16 %v26_v1, %v25_v0  ;;  %v28_v4 = vld [vmem:[%s358_s1 + $0x18] sm:$0xff]  ;;  %v29_v6 = vld [vmem:[%s358_s1 + $0x20] sm:$0xff]  ;;  %v30_v7 = vld [vmem:[%s358_s1 + $0x28] sm:$0xff] }
   0x3   :  { %v210_v5 = vpack.c.bf16 %v28_v4, %v27_v2  ;;  %v214_v8 = vpack.c.bf16 %v30_v7, %v29_v6  ;;  %v23_v9 = vld [vmem:[%s357_s0] sm:$0xff]  ;;  %v31_v10 = vld [vmem:[%s358_s1 + $0x30] sm:$0xff]  ;;  %v32_v11 = vld [vmem:[%s358_s1 + $0x38] sm:$0xff] }
   0x4   :  { %207 = vmatprep.subr.bf16.mxu0 %v206_v3  ;;  %203 = vmatprep.mubr.f32.mxu0 %v23_v9 }
   0x5   :  { %209 = vmatpush3.bf16.msra.mxu0 %v206_v3 }
   0x6   :  { %211 = vmatprep.subr.bf16.mxu0 %v210_v5 }
   0x7   :  { %8 = vsyncpa [#allocation4], 0  ;;  %v218_v12 = vpack.c.bf16 %v32_v11, %v31_v10  ;;  %v33_v13 = vld [vmem:[%s358_s1 + $0x40] sm:$0xff]  ;;  %v34_v14 = vld [vmem:[%s358_s1 + $0x48] sm:$0xff]  ;;  %s265_s23 = smov [#allocation3]  }
   0x8   :  { %v222_v15 = vpack.c.bf16 %v34_v14, %v33_v13  ;;  %v35_v16 = vld [vmem:[%s358_s1 + $0x50] sm:$0xff]  ;;  %v36_v17 = vld [vmem:[%s358_s1 + $0x58] sm:$0xff]  ;;  %v37_v19 = vld [vmem:[%s358_s1 + $0x60] sm:$0xff]  ;;  %s141_s24 = sshll.u32 %s265_s23, 4  ;;  %s142_s24 = int_to_ptr.vmem [resolvable:$true] %s141_s24 }
   0x9   :  { %213 = vmatpush3.bf16.msra.mxu0 %v210_v5  ;;  %v226_v18 = vpack.c.bf16 %v36_v17, %v35_v16  ;;  %v38_v20 = vld [vmem:[%s358_s1 + $0x68] sm:$0xff]  ;;  %v39_v22 = vld [vmem:[%s358_s1 + $0x70] sm:$0xff]  ;;  %v40_v23 = vld [vmem:[%s358_s1 + $0x78] sm:$0xff]  ;;  %s241_s1 = scalar_lea.vmem %s142_s24, 256  ;;  %p246_p1 = scmp.lt.s32.totalorder %s142_s24, %s142_s24 }
   0xa   :  { %215 = vmatprep.subr.bf16.mxu0 %v214_v8  ;;  %v230_v21 = vpack.c.bf16 %v38_v20, %v37_v19  ;;  %v234_v24 = vpack.c.bf16 %v40_v23, %v39_v22  ;;  %v24_v25 = vld [vmem:[%s357_s0 + $0x8] sm:$0xff]  ;;  %v152_v26 = vld [vmem:[%s359_s2] ss:$0 sm:$0xff]  ;;  %p242_p0 = scmp.ne.s32.totalorder %s142_s24, %s241_s1  ;;  %p247_p2 = scmp.lt.s32.totalorder %s241_s1, %s241_s1 }
   0xc   :  { %p248_p3 = por %p247_p2, %p246_p1 }
   0xd   :  { %217 = vmatpush3.bf16.msra.mxu0 %v214_v8 }
   0xe   :  { %219 = vmatprep.subr.bf16.mxu0 %v218_v12  ;;  %p249_p4 = pnand %p248_p3, %p242_p0 }
  0x11   :  { %221 = vmatpush3.bf16.msra.mxu0 %v218_v12 }
  0x12   :  { %223 = vmatprep.subr.bf16.mxu0 %v222_v15 }
  0x15   :  { %225 = vmatpush3.bf16.msra.mxu0 %v222_v15 }
  0x16   :  { %227 = vmatprep.subr.bf16.mxu0 %v226_v18 }
  0x19   :  { %229 = vmatpush3.bf16.msra.mxu0 %v226_v18 }
  0x1a   :  { %231 = vmatprep.subr.bf16.mxu0 %v230_v21 }
  0x1d   :  { %233 = vmatpush3.bf16.msra.mxu0 %v230_v21 }
  0x1e   :  { %235 = vmatprep.subr.bf16.mxu0 %v234_v24 }
  0x21   :  { %237 = vmatpush3.bf16.msra.mxu0 %v234_v24 }
  0x24   :  { %204 = vmatmul.mubr.f32.vlgmr.msra.gmra.mrb[0].mxu0 %v24_v25 }
  0xf7   :  { %v205_v27 = vpop.f32.mrb[0].mxu0 }
  0xf8   :  { %v133_v28 = vadd.f32 %v205_v27, %v152_v26  ;;  %v107_v29 = vpop.f32.mrb[1].mxu0 }
  0xf9   :  { %v132_v30 = vadd.f32 %v152_v26, %v107_v29 }
  0xfa   :  { %135 = vst [vmem:[#allocation3 + $0x8] sm:$0xff] %v133_v28 }
  0xfb   :  { %134 = vst [vmem:[#allocation3] sm:$0xff] %v132_v30 }
  0xfc   :  { %252 = shalt.err (!%p249_p4)
}
  0xfd   :  { %s253_s2 = scalar_lea.hbm %s360_s3, 256 }
  0xfe   :  { %p254_p5 = scmp.ne.s32.totalorder %s360_s3, %s253_s2  ;;  %p257_p6 = scmp.lt.u32.totalorder %s253_s2, %s360_s3 }
 0x100   :  { %p259_p7 = pnand %p257_p6, %p254_p5 }
 0x102   :  { %262 = shalt.err (!%p259_p7)
}
 0x103   :  { %s266_s30 = smov 128   ;;  %s267_s4 = smov 8  }
 0x104   :  { %147 = dma.vmem_to_hbm [thread:$0]  %s142_s24, 256, %s360_s3, [#allocation4], %s266_s30, %s266_s30, %s267_s4  }
 0x105   :  { %263 = dma.done.wait [#allocation4], 256  }
 0x106   :  { %264 = vsyncadd [#allocation4], 4294967040 }
 0x107   :  { %151 = vsyncpa [#allocation4], 1 }

</bundles_post_ra>
